<compile_context>
chip_gen: v5e
topology: v5e:2x2
jax: 0.10.0
libtpu: 0.0.40
codegen_flags: <defaults>
</compile_context>

<pallas_src>
import jax
import jax.numpy as jnp
from jax import lax
from jax.experimental import pallas as pl
from jax.experimental.pallas import tpu as pltpu

EPS = 1e-5
LANE = 128  # channel padding target: lane-dense vregs / unmasked stores


def _round_up(n, m):
    return (n + m - 1) // m * m


# --------------------------- stage kernels ----------------------------------


def _conv1_kernel(x_ref, w1_ref, y1_ref, st_ref):
    """conv1 (1x1) -> bf16 y1 tile + per-tile BN1 partial (sum, sumsq)."""
    _, TR, W, Cp = x_ref.shape
    Pp = w1_ref.shape[1]
    x2d = x_ref[...].reshape(TR * W, Cp).astype(jnp.bfloat16)
    y = jnp.dot(x2d, w1_ref[...], preferred_element_type=jnp.float32)
    yb = y.astype(jnp.bfloat16)
    y1_ref[...] = yb.reshape(1, TR, W, Pp)
    # stats computed from the bf16-rounded values the next stage will read
    yf = yb.astype(jnp.float32)
    st_ref[0, 0, 0:1, :] = jnp.sum(yf, axis=0, keepdims=True)
    st_ref[0, 0, 1:2, :] = jnp.sum(yf * yf, axis=0, keepdims=True)


def _conv2_kernel(sc1_ref, sh1_ref, yc_ref, yu_ref, yd_ref, w2_ref,
                  y2_ref, st_ref, pad_ref):
    """bn1+relu fused, conv2 (3x3, pad=1) as 9 accumulated dots, BN2 partials."""
    _, TR, W, Pp = yc_ref.shape
    t = pl.program_id(1)
    last_t = pl.num_programs(1) - 1
    sc, sh = sc1_ref[...], sh1_ref[...]                       # (1, Pp) f32

    def bn_relu_bf16(v2d):                                    # (M, Pp) bf16
        v = v2d.astype(jnp.float32)
        return jnp.maximum(v * sc + sh, 0.0).astype(jnp.bfloat16)

    center = bn_relu_bf16(yc_ref[...].reshape(TR * W, Pp)).reshape(TR, W, Pp)
    top = bn_relu_bf16(yu_ref[...].reshape(W, Pp))
    bot = bn_relu_bf16(yd_ref[...].reshape(W, Pp))
    top = jnp.where(t == 0, jnp.zeros_like(top), top)          # image top edge
    bot = jnp.where(t == last_t, jnp.zeros_like(bot), bot)     # image bottom

    # halo scratch: zero the 1-px W border, fill halo rows + interior
    zcol = jnp.zeros((TR + 2, 1, Pp), jnp.bfloat16)
    pad_ref[:, 0:1, :] = zcol
    pad_ref[:, W + 1:W + 2, :] = zcol
    pad_ref[0, 1:W + 1, :] = top
    pad_ref[TR + 1, 1:W + 1, :] = bot
    pad_ref[1:TR + 1, 1:W + 1, :] = center

    # 3x3 conv: nine bf16 MXU dots accumulated in f32 (no im2col slab)
    acc = jnp.zeros((TR * W, Pp), jnp.float32)
    for k in range(9):
        ky, kx = divmod(k, 3)
        lhs = pad_ref[ky:ky + TR, kx:kx + W, :].reshape(TR * W, Pp)
        acc = acc + jnp.dot(lhs, w2_ref[k], preferred_element_type=jnp.float32)

    yb = acc.astype(jnp.bfloat16)
    y2_ref[...] = yb.reshape(1, TR, W, Pp)
    yf = yb.astype(jnp.float32)
    st_ref[0, 0, 0:1, :] = jnp.sum(yf, axis=0, keepdims=True)
    st_ref[0, 0, 1:2, :] = jnp.sum(yf * yf, axis=0, keepdims=True)


def _conv3_kernel(sc2_ref, sh2_ref, y2_ref, w3_ref, y3_ref, st_ref):
    """bn2+relu fused, conv3 (1x1), BN3 partials."""
    _, TR, W, Pp = y2_ref.shape
    Cp = w3_ref.shape[1]
    v = y2_ref[...].reshape(TR * W, Pp).astype(jnp.float32)
    v = jnp.maximum(v * sc2_ref[...] + sh2_ref[...], 0.0)
    y = jnp.dot(v.astype(jnp.bfloat16), w3_ref[...],
                preferred_element_type=jnp.float32)
    yb = y.astype(jnp.bfloat16)
    y3_ref[...] = yb.reshape(1, TR, W, Cp)
    yf = yb.astype(jnp.float32)
    st_ref[0, 0, 0:1, :] = jnp.sum(yf, axis=0, keepdims=True)
    st_ref[0, 0, 1:2, :] = jnp.sum(yf * yf, axis=0, keepdims=True)


def _residual_kernel(sc3_ref, sh3_ref, y3_ref, x_ref, out_ref):
    """bn3 (no relu) + residual add + relu."""
    _, TR, W, Cp = x_ref.shape
    y = y3_ref[...].reshape(TR * W, Cp).astype(jnp.float32)
    x = x_ref[...].reshape(TR * W, Cp)
    out = jnp.maximum(y * sc3_ref[...] + sh3_ref[...] + x, 0.0)
    out_ref[...] = out.reshape(1, TR, W, Cp).astype(out_ref.dtype)


# ------------------------------- wrapper -------------------------------------


def _fold_bn(stats, gamma, beta, count):
    """Global fold of per-tile (sum, sumsq) partials -> folded scale/shift.

    Single-pass (E[x^2]-E[x]^2) variance with a clamp; fine at these scales
    (activations are zero-mean-ish); switch to a Welford/Chan combine if |mean|
    ever dominates std.
    """
    s = jnp.sum(stats, axis=(0, 1))                      # (2, C)
    mean = s[0] / count
    var = jnp.maximum(s[1] / count - mean * mean, 0.0)   # biased, torch training BN
    scale = gamma * lax.rsqrt(var + EPS)                 # (1, C)
    shift = beta - mean * scale
    return scale, shift


def bottleneck_forward(x_nhwc, params, *, tile_rows=8):
    N, H, W, Cin = x_nhwc.shape
    P = params["w1"].shape[1]
    C4 = params["w3"].shape[1]
    assert Cin == C4, "downsample=None requires inplanes == planes * 4"

    TR = tile_rows if H % tile_rows == 0 else H
    HT = H // TR
    Cp = _round_up(Cin, LANE)
    Pp = _round_up(P, LANE)
    f32, bf16 = jnp.float32, jnp.bfloat16
    count = float(N * H * W)

    # Lane-dense, MXU-friendly operand prep.  Zero padding keeps the math
    # exact: padded weight rows/cols and gamma/beta lanes are zero, so padded
    # channels stay identically zero through every stage.
    xp = jnp.pad(x_nhwc, ((0, 0), (0, 0), (0, 0), (0, Cp - Cin))).astype(f32)
    w1 = jnp.pad(params["w1"], ((0, Cp - Cin), (0, Pp - P))).astype(bf16)
    w2 = jnp.pad(params["w2"], ((0, 0), (0, 0), (0, Pp - P), (0, Pp - P)))
    w2 = w2.reshape(9, Pp, Pp).astype(bf16)              # tap-major weight layout
    w3 = jnp.pad(params["w3"], ((0, Pp - P), (0, Cp - C4))).astype(bf16)

    def pad_vec(v, c):
        return jnp.pad(v, ((0, 0), (0, c - v.shape[1]))).astype(f32)

    g1, b1 = pad_vec(params["g1"], Pp), pad_vec(params["b1"], Pp)
    g2, b2 = pad_vec(params["g2"], Pp), pad_vec(params["b2"], Pp)
    g3, b3 = pad_vec(params["g3"], Cp), pad_vec(params["b3"], Cp)

    grid = (N, HT)
    cparams = pltpu.CompilerParams(
        dimension_semantics=("parallel", "parallel"),
        vmem_limit_bytes=32 * 1024 * 1024)

    # activation / stats / weight block specs
    tile_c4 = pl.BlockSpec((1, TR, W, Cp), lambda n, t: (n, t, 0, 0))
    tile_p  = pl.BlockSpec((1, TR, W, Pp), lambda n, t: (n, t, 0, 0))
    row_up  = pl.BlockSpec((1, 1, W, Pp),
                           lambda n, t: (n, jnp.maximum(t * TR - 1, 0), 0, 0))
    row_dn  = pl.BlockSpec((1, 1, W, Pp),
                           lambda n, t: (n, jnp.minimum(t * TR + TR, H - 1), 0, 0))
    stat_p  = pl.BlockSpec((1, 1, 2, Pp), lambda n, t: (n, t, 0, 0))
    stat_c  = pl.BlockSpec((1, 1, 2, Cp), lambda n, t: (n, t, 0, 0))
    vec_p   = pl.BlockSpec((1, Pp), lambda n, t: (0, 0))
    vec_c   = pl.BlockSpec((1, Cp), lambda n, t: (0, 0))
    w1_spec = pl.BlockSpec((Cp, Pp), lambda n, t: (0, 0))
    w2_spec = pl.BlockSpec((9, Pp, Pp), lambda n, t: (0, 0, 0))
    w3_spec = pl.BlockSpec((Pp, Cp), lambda n, t: (0, 0))

    # ---- stage 1: conv1 (1x1) + BN1 partial stats ----
    y1, st1 = pl.pallas_call(
        _conv1_kernel,
        grid=grid,
        in_specs=[tile_c4, w1_spec],
        out_specs=(tile_p, stat_p),
        out_shape=(jax.ShapeDtypeStruct((N, H, W, Pp), bf16),
                   jax.ShapeDtypeStruct((N, HT, 2, Pp), f32)),
        compiler_params=cparams,
    )(xp, w1)
    sc1, sh1 = _fold_bn(st1, g1, b1, count)

    # ---- stage 2: bn1+relu fused into conv2 (3x3) + BN2 partial stats ----
    y2, st2 = pl.pallas_call(
        _conv2_kernel,
        grid=grid,
        in_specs=[vec_p, vec_p, tile_p, row_up, row_dn, w2_spec],
        out_specs=(tile_p, stat_p),
        out_shape=(jax.ShapeDtypeStruct((N, H, W, Pp), bf16),
                   jax.ShapeDtypeStruct((N, HT, 2, Pp), f32)),
        scratch_shapes=[pltpu.VMEM((TR + 2, W + 2, Pp), bf16)],
        compiler_params=cparams,
    )(sc1, sh1, y1, y1, y1, w2)
    sc2, sh2 = _fold_bn(st2, g2, b2, count)

    # ---- stage 3: bn2+relu fused into conv3 (1x1) + BN3 partial stats ----
    y3, st3 = pl.pallas_call(
        _conv3_kernel,
        grid=grid,
        in_specs=[vec_p, vec_p, tile_p, w3_spec],
        out_specs=(tile_c4, stat_c),
        out_shape=(jax.ShapeDtypeStruct((N, H, W, Cp), bf16),
                   jax.ShapeDtypeStruct((N, HT, 2, Cp), f32)),
        compiler_params=cparams,
    )(sc2, sh2, y2, w3)
    sc3, sh3 = _fold_bn(st3, g3, b3, count)

    # ---- stage 4: bn3 + residual add + relu ----
    out_p = pl.pallas_call(
        _residual_kernel,
        grid=grid,
        in_specs=[vec_c, vec_c, tile_c4, tile_c4],
        out_specs=tile_c4,
        out_shape=jax.ShapeDtypeStruct((N, H, W, Cp), f32),
        compiler_params=cparams,
    )(sc3, sh3, y3, xp)

    # TODO(synk): keep padded-NHWC / bf16 between blocks in a full network so
    # this slice (and the wrapper-side pads / NCHW transposes) happen once, not
    # once per Bottleneck.
    return out_p[..., :C4]


# ------------------------------ reference ------------------------------------


def bottleneck_reference(x_nhwc, params):
    """Pure-JAX f32 reference mirroring the PyTorch forward (training-mode BN)."""
    def bn(y, g, b, relu=True):
        m = jnp.mean(y, axis=(0, 1, 2), keepdims=True)
        v = jnp.mean((y - m) ** 2, axis=(0, 1, 2), keepdims=True)
        out = (y - m) * lax.rsqrt(v + EPS) * g + b
        return jnp.maximum(out, 0.0) if relu else out

    y = jnp.einsum("nhwc,co->nhwo", x_nhwc, params["w1"],
                   precision=lax.Precision.HIGHEST)
    y = bn(y, params["g1"], params["b1"])
    y = lax.conv_general_dilated(
        y, params["w2"], window_strides=(1, 1), padding=((1, 1), (1, 1)),
        dimension_numbers=("NHWC", "HWIO", "NHWC"),
        precision=lax.Precision.HIGHEST)
    y = bn(y, params["g2"], params["b2"])
    y = jnp.einsum("nhwc,co->nhwo", y, params["w3"],
                   precision=lax.Precision.HIGHEST)
    y = bn(y, params["g3"], params["b3"], relu=False)
    return jnp.maximum(y + x_nhwc, 0.0)


def make_params(key, inplanes, planes):
    ks = jax.random.split(key, 9)
    c4 = planes * 4
    return {
        "w1": 0.2 * jax.random.normal(ks[0], (inplanes, planes), jnp.float32),
        "w2": 0.2 * jax.random.normal(ks[1], (3, 3, planes, planes), jnp.float32),
        "w3": 0.2 * jax.random.normal(ks[2], (planes, c4), jnp.float32),
        "g1": 1.0 + 0.1 * jax.random.normal(ks[3], (1, planes), jnp.float32),
        "b1": 0.1 * jax.random.normal(ks[4], (1, planes), jnp.float32),
        "g2": 1.0 + 0.1 * jax.random.normal(ks[5], (1, planes), jnp.float32),
        "b2": 0.1 * jax.random.normal(ks[6], (1, planes), jnp.float32),
        "g3": 1.0 + 0.1 * jax.random.normal(ks[7], (1, c4), jnp.float32),
        "b3": 0.1 * jax.random.normal(ks[8], (1, c4), jnp.float32),
    }


if __name__ == "__main__":
    # Module config: Bottleneck(inplanes=128, planes=32)  (expansion=4)
    N, H, W = 2, 16, 16
    planes, inplanes = 32, 128

    key = jax.random.PRNGKey(0)
    kx, kp = jax.random.split(key)
    x_nchw = jax.random.normal(kx, (N, inplanes, H, W), jnp.float32)  # PyTorch layout
    x_nhwc = jnp.transpose(x_nchw, (0, 2, 3, 1))                      # kernel layout

    params = make_params(kp, inplanes, planes)

    fwd = jax.jit(bottleneck_forward)
    out = jax.block_until_ready(fwd(x_nhwc, params))
    ref = jax.block_until_ready(bottleneck_reference(x_nhwc, params))

    assert out.shape == (N, H, W, planes * 4)
    max_err = jnp.max(jnp.abs(out - ref))
    # bf16 MXU operands + bf16 inter-stage activations (f32 accumulation and
    # f32 BN math) vs a Precision.HIGHEST f32 reference -> a few-percent
    # relative deviation; structural bugs would be O(1), so this stays a tight
    # correctness check.
    assert jnp.allclose(out, ref, atol=1e-1, rtol=5e-2), \
        f"max abs err {max_err}"

    # back to NCHW to match the PyTorch output convention (shape check only)
    out_nchw = jnp.transpose(out, (0, 3, 1, 2))
    assert out_nchw.shape == (N, planes * 4, H, W)

    print("KERNEL_OK")
</pallas_src>

<mosaic_0001>
module attributes {stable_mosaic.version = 11 : i64} {
  func.func @_conv1_kernel(%arg0: i32, %arg1: i32, %arg2: memref<1x8x16x128xf32, #tpu.memory_space<vmem>>, %arg3: memref<128x128xbf16, #tpu.memory_space<vmem>>, %arg4: memref<1x8x16x128xbf16, #tpu.memory_space<vmem>>, %arg5: memref<1x1x2x128xf32, #tpu.memory_space<vmem>>) attributes {dimension_semantics = [#tpu.dimension_semantics<parallel>, #tpu.dimension_semantics<parallel>], iteration_bounds = array<i64: 2, 2>, scalar_prefetch = 0 : i64, scratch_operands = 0 : i64, tpu.core_type = #tpu.core_type<tc>, window_params = [{transform_indices = @transform_0, window_bounds = array<i64: 1, 8, 16, 128>}, {pipeline_mode = #tpu.pipeline_mode<synchronous>, transform_indices = @transform_1, window_bounds = array<i64: 128, 128>}, {transform_indices = @transform_2, window_bounds = array<i64: 1, 8, 16, 128>}, {transform_indices = @transform_3, window_bounds = array<i64: 1, 1, 2, 128>}]} {
    %c0 = arith.constant 0 : index
    %c0_0 = arith.constant 0 : index
    %c0_1 = arith.constant 0 : index
    %c0_2 = arith.constant 0 : index
    %0 = vector.load %arg2[%c0, %c0_0, %c0_1, %c0_2] : memref<1x8x16x128xf32, #tpu.memory_space<vmem>>, vector<1x8x16x128xf32>
    %1 = vector.shape_cast %0 : vector<1x8x16x128xf32> to vector<128x128xf32>
    %2 = arith.truncf %1 : vector<128x128xf32> to vector<128x128xbf16>
    %c0_3 = arith.constant 0 : index
    %c0_4 = arith.constant 0 : index
    %3 = vector.load %arg3[%c0_3, %c0_4] : memref<128x128xbf16, #tpu.memory_space<vmem>>, vector<128x128xbf16>
    %cst = arith.constant dense<0.000000e+00> : vector<128x128xf32>
    %4 = tpu.matmul %2, %3, %cst {dimension_numbers = #tpu.dot_dimension_numbers<[1], [0], [0], [1], [0, 0, 1, 1], [], []>} : vector<128x128xbf16>, vector<128x128xbf16>, vector<128x128xf32> -> vector<128x128xf32>
    %5 = arith.truncf %4 : vector<128x128xf32> to vector<128x128xbf16>
    %6 = vector.shape_cast %5 : vector<128x128xbf16> to vector<1x8x16x128xbf16>
    %c0_5 = arith.constant 0 : index
    %c0_6 = arith.constant 0 : index
    %c0_7 = arith.constant 0 : index
    %c0_8 = arith.constant 0 : index
    %7 = vector.load %arg4[%c0_5, %c0_6, %c0_7, %c0_8] : memref<1x8x16x128xbf16, #tpu.memory_space<vmem>>, vector<1x8x16x128xbf16>
    tpu.vector_store %arg4[%c0_5, %c0_6, %c0_7, %c0_8], %6 {strides = array<i32>} : memref<1x8x16x128xbf16, #tpu.memory_space<vmem>>, vector<1x8x16x128xbf16>,
    %8 = arith.extf %5 : vector<128x128xbf16> to vector<128x128xf32>
    %cst_9 = arith.constant dense<0.000000e+00> : vector<128xf32>
    %9 = vector.multi_reduction <add>, %8, %cst_9 [0] : vector<128x128xf32> to vector<128xf32>
    %10 = vector.shape_cast %9 : vector<128xf32> to vector<1x128xf32>
    %c0_10 = arith.constant 0 : index
    %c0_11 = arith.constant 0 : index
    %c0_12 = arith.constant 0 : index
    %c0_13 = arith.constant 0 : index
    %11 = vector.load %arg5[%c0_10, %c0_11, %c0_12, %c0_13] : memref<1x1x2x128xf32, #tpu.memory_space<vmem>>, vector<1x1x1x128xf32>
    %12 = vector.shape_cast %11 : vector<1x1x1x128xf32> to vector<1x128xf32>
    %13 = vector.shape_cast %10 : vector<1x128xf32> to vector<1x1x1x128xf32>
    tpu.vector_store %arg5[%c0_10, %c0_11, %c0_12, %c0_13], %13 {strides = array<i32>} : memref<1x1x2x128xf32, #tpu.memory_space<vmem>>, vector<1x1x1x128xf32>,
    %14 = arith.mulf %8, %8 : vector<128x128xf32>
    %cst_14 = arith.constant dense<0.000000e+00> : vector<128xf32>
    %15 = vector.multi_reduction <add>, %14, %cst_14 [0] : vector<128x128xf32> to vector<128xf32>
    %16 = vector.shape_cast %15 : vector<128xf32> to vector<1x128xf32>
    %c0_15 = arith.constant 0 : index
    %c0_16 = arith.constant 0 : index
    %c1 = arith.constant 1 : index
    %c0_17 = arith.constant 0 : index
    %17 = vector.load %arg5[%c0_15, %c0_16, %c1, %c0_17] : memref<1x1x2x128xf32, #tpu.memory_space<vmem>>, vector<1x1x1x128xf32>
    %18 = vector.shape_cast %17 : vector<1x1x1x128xf32> to vector<1x128xf32>
    %19 = vector.shape_cast %16 : vector<1x128xf32> to vector<1x1x1x128xf32>
    tpu.vector_store %arg5[%c0_15, %c0_16, %c1, %c0_17], %19 {strides = array<i32>} : memref<1x1x2x128xf32, #tpu.memory_space<vmem>>, vector<1x1x1x128xf32>,
    return
  }
  func.func @transform_0(%arg0: i32, %arg1: i32) -> (i32, i32, i32, i32) {
    %c0_i32 = arith.constant 0 : i32
    %c0_i32_0 = arith.constant 0 : i32
    %c0_i32_1 = arith.constant 0 : i32
    return %arg0, %arg1, %c0_i32, %c0_i32_0 : i32, i32, i32, i32
  }
  func.func @transform_1(%arg0: i32, %arg1: i32) -> (i32, i32) {
    %c0_i32 = arith.constant 0 : i32
    %c0_i32_0 = arith.constant 0 : i32
    %c0_i32_1 = arith.constant 0 : i32
    return %c0_i32, %c0_i32_0 : i32, i32
  }
  func.func @transform_2(%arg0: i32, %arg1: i32) -> (i32, i32, i32, i32) {
    %c0_i32 = arith.constant 0 : i32
    %c0_i32_0 = arith.constant 0 : i32
    %c0_i32_1 = arith.constant 0 : i32
    return %arg0, %arg1, %c0_i32, %c0_i32_0 : i32, i32, i32, i32
  }
  func.func @transform_3(%arg0: i32, %arg1: i32) -> (i32, i32, i32, i32) {
    %c0_i32 = arith.constant 0 : i32
    %c0_i32_0 = arith.constant 0 : i32
    %c0_i32_1 = arith.constant 0 : i32
    return %arg0, %arg1, %c0_i32, %c0_i32_0 : i32, i32, i32, i32
  }
}

module attributes {stable_mosaic.version = 11 : i64} {
  func.func @_conv2_kernel(%arg0: i32, %arg1: i32, %arg2: memref<1x128xf32, #tpu.memory_space<vmem>>, %arg3: memref<1x128xf32, #tpu.memory_space<vmem>>, %arg4: memref<1x8x16x128xbf16, #tpu.memory_space<vmem>>, %arg5: memref<1x1x16x128xbf16, #tpu.memory_space<vmem>>, %arg6: memref<1x1x16x128xbf16, #tpu.memory_space<vmem>>, %arg7: memref<9x128x128xbf16, #tpu.memory_space<vmem>>, %arg8: memref<1x8x16x128xbf16, #tpu.memory_space<vmem>>, %arg9: memref<1x1x2x128xf32, #tpu.memory_space<vmem>>, %arg10: memref<10x18x128xbf16, #tpu.memory_space<vmem>>) attributes {dimension_semantics = [#tpu.dimension_semantics<parallel>, #tpu.dimension_semantics<parallel>], iteration_bounds = array<i64: 2, 2>, scalar_prefetch = 0 : i64, scratch_operands = 1 : i64, tpu.core_type = #tpu.core_type<tc>, window_params = [{pipeline_mode = #tpu.pipeline_mode<synchronous>, transform_indices = @transform_0, window_bounds = array<i64: 1, 128>}, {pipeline_mode = #tpu.pipeline_mode<synchronous>, transform_indices = @transform_1, window_bounds = array<i64: 1, 128>}, {transform_indices = @transform_2, window_bounds = array<i64: 1, 8, 16, 128>}, {transform_indices = @transform_3, window_bounds = array<i64: 1, 1, 16, 128>}, {transform_indices = @transform_4, window_bounds = array<i64: 1, 1, 16, 128>}, {pipeline_mode = #tpu.pipeline_mode<synchronous>, transform_indices = @transform_5, window_bounds = array<i64: 9, 128, 128>}, {transform_indices = @transform_6, window_bounds = array<i64: 1, 8, 16, 128>}, {transform_indices = @transform_7, window_bounds = array<i64: 1, 1, 2, 128>}]} {
    %c0 = arith.constant 0 : index
    %c0_0 = arith.constant 0 : index
    %0 = vector.load %arg2[%c0, %c0_0] : memref<1x128xf32, #tpu.memory_space<vmem>>, vector<1x128xf32>
    %c0_1 = arith.constant 0 : index
    %c0_2 = arith.constant 0 : index
    %1 = vector.load %arg3[%c0_1, %c0_2] : memref<1x128xf32, #tpu.memory_space<vmem>>, vector<1x128xf32>
    %c0_3 = arith.constant 0 : index
    %c0_4 = arith.constant 0 : index
    %c0_5 = arith.constant 0 : index
    %c0_6 = arith.constant 0 : index
    %2 = vector.load %arg4[%c0_3, %c0_4, %c0_5, %c0_6] : memref<1x8x16x128xbf16, #tpu.memory_space<vmem>>, vector<1x8x16x128xbf16>
    %3 = vector.shape_cast %2 : vector<1x8x16x128xbf16> to vector<128x128xbf16>
    %4 = arith.extf %3 : vector<128x128xbf16> to vector<128x128xf32>
    %5 = vector.broadcast %0 : vector<1x128xf32> to vector<128x128xf32>
    %6 = arith.mulf %4, %5 : vector<128x128xf32>
    %7 = vector.broadcast %1 : vector<1x128xf32> to vector<128x128xf32>
    %8 = arith.addf %6, %7 : vector<128x128xf32>
    %cst = arith.constant 0.000000e+00 : f32
    %9 = vector.broadcast %cst : f32 to vector<128x128xf32>
    %10 = arith.maximumf %8, %9 : vector<128x128xf32>
    %11 = arith.truncf %10 : vector<128x128xf32> to vector<128x128xbf16>
    %12 = vector.shape_cast %11 : vector<128x128xbf16> to vector<8x16x128xbf16>
    %c0_7 = arith.constant 0 : index
    %c0_8 = arith.constant 0 : index
    %c0_9 = arith.constant 0 : index
    %c0_10 = arith.constant 0 : index
    %13 = vector.load %arg5[%c0_7, %c0_8, %c0_9, %c0_10] : memref<1x1x16x128xbf16, #tpu.memory_space<vmem>>, vector<1x1x16x128xbf16>
    %14 = vector.shape_cast %13 : vector<1x1x16x128xbf16> to vector<16x128xbf16>
    %15 = arith.extf %14 : vector<16x128xbf16> to vector<16x128xf32>
    %16 = vector.broadcast %0 : vector<1x128xf32> to vector<16x128xf32>
    %17 = arith.mulf %15, %16 : vector<16x128xf32>
    %18 = vector.broadcast %1 : vector<1x128xf32> to vector<16x128xf32>
    %19 = arith.addf %17, %18 : vector<16x128xf32>
    %cst_11 = arith.constant 0.000000e+00 : f32
    %20 = vector.broadcast %cst_11 : f32 to vector<16x128xf32>
    %21 = arith.maximumf %19, %20 : vector<16x128xf32>
    %22 = arith.truncf %21 : vector<16x128xf32> to vector<16x128xbf16>
    %c0_12 = arith.constant 0 : index
    %c0_13 = arith.constant 0 : index
    %c0_14 = arith.constant 0 : index
    %c0_15 = arith.constant 0 : index
    %23 = vector.load %arg6[%c0_12, %c0_13, %c0_14, %c0_15] : memref<1x1x16x128xbf16, #tpu.memory_space<vmem>>, vector<1x1x16x128xbf16>
    %24 = vector.shape_cast %23 : vector<1x1x16x128xbf16> to vector<16x128xbf16>
    %25 = arith.extf %24 : vector<16x128xbf16> to vector<16x128xf32>
    %26 = vector.broadcast %0 : vector<1x128xf32> to vector<16x128xf32>
    %27 = arith.mulf %25, %26 : vector<16x128xf32>
    %28 = vector.broadcast %1 : vector<1x128xf32> to vector<16x128xf32>
    %29 = arith.addf %27, %28 : vector<16x128xf32>
    %cst_16 = arith.constant 0.000000e+00 : f32
    %30 = vector.broadcast %cst_16 : f32 to vector<16x128xf32>
    %31 = arith.maximumf %29, %30 : vector<16x128xf32>
    %32 = arith.truncf %31 : vector<16x128xf32> to vector<16x128xbf16>
    %c0_i32 = arith.constant 0 : i32
    %33 = arith.cmpi eq, %arg1, %c0_i32 : i32
    %cst_17 = arith.constant 0.000000e+00 : bf16
    %34 = vector.broadcast %cst_17 : bf16 to vector<16x128xbf16>
    %35 = arith.select %33, %34, %22 : vector<16x128xbf16>
    %c1_i32 = arith.constant 1 : i32
    %36 = arith.cmpi eq, %arg1, %c1_i32 : i32
    %cst_18 = arith.constant 0.000000e+00 : bf16
    %37 = vector.broadcast %cst_18 : bf16 to vector<16x128xbf16>
    %38 = arith.select %36, %37, %32 : vector<16x128xbf16>
    %cst_19 = arith.constant 0.000000e+00 : bf16
    %39 = vector.broadcast %cst_19 : bf16 to vector<10x1x128xbf16>
    %c0_20 = arith.constant 0 : index
    %c0_21 = arith.constant 0 : index
    %c0_22 = arith.constant 0 : index
    %40 = vector.load %arg10[%c0_20, %c0_21, %c0_22] : memref<10x18x128xbf16, #tpu.memory_space<vmem>>, vector<10x1x128xbf16>
    tpu.vector_store %arg10[%c0_20, %c0_21, %c0_22], %39 {strides = array<i32>} : memref<10x18x128xbf16, #tpu.memory_space<vmem>>, vector<10x1x128xbf16>,
    %c0_23 = arith.constant 0 : index
    %c17 = arith.constant 17 : index
    %c0_24 = arith.constant 0 : index
    %41 = vector.load %arg10[%c0_23, %c17, %c0_24] : memref<10x18x128xbf16, #tpu.memory_space<vmem>>, vector<10x1x128xbf16>
    tpu.vector_store %arg10[%c0_23, %c17, %c0_24], %39 {strides = array<i32>} : memref<10x18x128xbf16, #tpu.memory_space<vmem>>, vector<10x1x128xbf16>,
    %c0_25 = arith.constant 0 : index
    %c1 = arith.constant 1 : index
    %c0_26 = arith.constant 0 : index
    %42 = vector.load %arg10[%c0_25, %c1, %c0_26] : memref<10x18x128xbf16, #tpu.memory_space<vmem>>, vector<1x16x128xbf16>
    %43 = vector.shape_cast %42 : vector<1x16x128xbf16> to vector<16x128xbf16>
    %44 = vector.shape_cast %35 : vector<16x128xbf16> to vector<1x16x128xbf16>
    tpu.vector_store %arg10[%c0_25, %c1, %c0_26], %44 {strides = array<i32>} : memref<10x18x128xbf16, #tpu.memory_space<vmem>>, vector<1x16x128xbf16>,
    %c9 = arith.constant 9 : index
    %c1_27 = arith.constant 1 : index
    %c0_28 = arith.constant 0 : index
    %45 = vector.load %arg10[%c9, %c1_27, %c0_28] : memref<10x18x128xbf16, #tpu.memory_space<vmem>>, vector<1x16x128xbf16>
    %46 = vector.shape_cast %45 : vector<1x16x128xbf16> to vector<16x128xbf16>
    %47 = vector.shape_cast %38 : vector<16x128xbf16> to vector<1x16x128xbf16>
    tpu.vector_store %arg10[%c9, %c1_27, %c0_28], %47 {strides = array<i32>} : memref<10x18x128xbf16, #tpu.memory_space<vmem>>, vector<1x16x128xbf16>,
    %c1_29 = arith.constant 1 : index
    %c1_30 = arith.constant 1 : index
    %c0_31 = arith.constant 0 : index
    %48 = vector.load %arg10[%c1_29, %c1_30, %c0_31] : memref<10x18x128xbf16, #tpu.memory_space<vmem>>, vector<8x16x128xbf16>
    tpu.vector_store %arg10[%c1_29, %c1_30, %c0_31], %12 {strides = array<i32>} : memref<10x18x128xbf16, #tpu.memory_space<vmem>>, vector<8x16x128xbf16>,
    %cst_32 = arith.constant 0.000000e+00 : f32
    %49 = vector.broadcast %cst_32 : f32 to vector<128x128xf32>
    %c0_33 = arith.constant 0 : index
    %c0_34 = arith.constant 0 : index
    %c0_35 = arith.constant 0 : index
    %50 = vector.load %arg10[%c0_33, %c0_34, %c0_35] : memref<10x18x128xbf16, #tpu.memory_space<vmem>>, vector<8x16x128xbf16>
    %51 = vector.shape_cast %50 : vector<8x16x128xbf16> to vector<128x128xbf16>
    %c0_36 = arith.constant 0 : index
    %c0_37 = arith.constant 0 : index
    %c0_38 = arith.constant 0 : index
    %52 = vector.load %arg7[%c0_36, %c0_37, %c0_38] : memref<9x128x128xbf16, #tpu.memory_space<vmem>>, vector<1x128x128xbf16>
    %53 = vector.shape_cast %52 : vector<1x128x128xbf16> to vector<128x128xbf16>
    %cst_39 = arith.constant dense<0.000000e+00> : vector<128x128xf32>
    %54 = tpu.matmul %51, %53, %cst_39 {dimension_numbers = #tpu.dot_dimension_numbers<[1], [0], [0], [1], [0, 0, 1, 1], [], []>} : vector<128x128xbf16>, vector<128x128xbf16>, vector<128x128xf32> -> vector<128x128xf32>
    %55 = arith.addf %49, %54 : vector<128x128xf32>
    %c0_40 = arith.constant 0 : index
    %c1_41 = arith.constant 1 : index
    %c0_42 = arith.constant 0 : index
    %56 = vector.load %arg10[%c0_40, %c1_41, %c0_42] : memref<10x18x128xbf16, #tpu.memory_space<vmem>>, vector<8x16x128xbf16>
    %57 = vector.shape_cast %56 : vector<8x16x128xbf16> to vector<128x128xbf16>
    %c1_43 = arith.constant 1 : index
    %c0_44 = arith.constant 0 : index
    %c0_45 = arith.constant 0 : index
    %58 = vector.load %arg7[%c1_43, %c0_44, %c0_45] : memref<9x128x128xbf16, #tpu.memory_space<vmem>>, vector<1x128x128xbf16>
    %59 = vector.shape_cast %58 : vector<1x128x128xbf16> to vector<128x128xbf16>
    %cst_46 = arith.constant dense<0.000000e+00> : vector<128x128xf32>
    %60 = tpu.matmul %57, %59, %cst_46 {dimension_numbers = #tpu.dot_dimension_numbers<[1], [0], [0], [1], [0, 0, 1, 1], [], []>} : vector<128x128xbf16>, vector<128x128xbf16>, vector<128x128xf32> -> vector<128x128xf32>
    %61 = arith.addf %55, %60 : vector<128x128xf32>
    %c0_47 = arith.constant 0 : index
    %c2 = arith.constant 2 : index
    %c0_48 = arith.constant 0 : index
    %62 = vector.load %arg10[%c0_47, %c2, %c0_48] : memref<10x18x128xbf16, #tpu.memory_space<vmem>>, vector<8x16x128xbf16>
    %63 = vector.shape_cast %62 : vector<8x16x128xbf16> to vector<128x128xbf16>
    %c2_49 = arith.constant 2 : index
    %c0_50 = arith.constant 0 : index
    %c0_51 = arith.constant 0 : index
    %64 = vector.load %arg7[%c2_49, %c0_50, %c0_51] : memref<9x128x128xbf16, #tpu.memory_space<vmem>>, vector<1x128x128xbf16>
    %65 = vector.shape_cast %64 : vector<1x128x128xbf16> to vector<128x128xbf16>
    %cst_52 = arith.constant dense<0.000000e+00> : vector<128x128xf32>
    %66 = tpu.matmul %63, %65, %cst_52 {dimension_numbers = #tpu.dot_dimension_numbers<[1], [0], [0], [1], [0, 0, 1, 1], [], []>} : vector<128x128xbf16>, vector<128x128xbf16>, vector<128x128xf32> -> vector<128x128xf32>
    %67 = arith.addf %61, %66 : vector<128x128xf32>
    %c1_53 = arith.constant 1 : index
    %c0_54 = arith.constant 0 : index
    %c0_55 = arith.constant 0 : index
    %68 = vector.load %arg10[%c1_53, %c0_54, %c0_55] : memref<10x18x128xbf16, #tpu.memory_space<vmem>>, vector<8x16x128xbf16>
    %69 = vector.shape_cast %68 : vector<8x16x128xbf16> to vector<128x128xbf16>
    %c3 = arith.constant 3 : index
    %c0_56 = arith.constant 0 : index
    %c0_57 = arith.constant 0 : index
    %70 = vector.load %arg7[%c3, %c0_56, %c0_57] : memref<9x128x128xbf16, #tpu.memory_space<vmem>>, vector<1x128x128xbf16>
    %71 = vector.shape_cast %70 : vector<1x128x128xbf16> to vector<128x128xbf16>
    %cst_58 = arith.constant dense<0.000000e+00> : vector<128x128xf32>
    %72 = tpu.matmul %69, %71, %cst_58 {dimension_numbers = #tpu.dot_dimension_numbers<[1], [0], [0], [1], [0, 0, 1, 1], [], []>} : vector<128x128xbf16>, vector<128x128xbf16>, vector<128x128xf32> -> vector<128x128xf32>
    %73 = arith.addf %67, %72 : vector<128x128xf32>
    %c1_59 = arith.constant 1 : index
    %c1_60 = arith.constant 1 : index
    %c0_61 = arith.constant 0 : index
    %74 = vector.load %arg10[%c1_59, %c1_60, %c0_61] : memref<10x18x128xbf16, #tpu.memory_space<vmem>>, vector<8x16x128xbf16>
    %75 = vector.shape_cast %74 : vector<8x16x128xbf16> to vector<128x128xbf16>
    %c4 = arith.constant 4 : index
    %c0_62 = arith.constant 0 : index
    %c0_63 = arith.constant 0 : index
    %76 = vector.load %arg7[%c4, %c0_62, %c0_63] : memref<9x128x128xbf16, #tpu.memory_space<vmem>>, vector<1x128x128xbf16>
    %77 = vector.shape_cast %76 : vector<1x128x128xbf16> to vector<128x128xbf16>
    %cst_64 = arith.constant dense<0.000000e+00> : vector<128x128xf32>
    %78 = tpu.matmul %75, %77, %cst_64 {dimension_numbers = #tpu.dot_dimension_numbers<[1], [0], [0], [1], [0, 0, 1, 1], [], []>} : vector<128x128xbf16>, vector<128x128xbf16>, vector<128x128xf32> -> vector<128x128xf32>
    %79 = arith.addf %73, %78 : vector<128x128xf32>
    %c1_65 = arith.constant 1 : index
    %c2_66 = arith.constant 2 : index
    %c0_67 = arith.constant 0 : index
    %80 = vector.load %arg10[%c1_65, %c2_66, %c0_67] : memref<10x18x128xbf16, #tpu.memory_space<vmem>>, vector<8x16x128xbf16>
    %81 = vector.shape_cast %80 : vector<8x16x128xbf16> to vector<128x128xbf16>
    %c5 = arith.constant 5 : index
    %c0_68 = arith.constant 0 : index
    %c0_69 = arith.constant 0 : index
    %82 = vector.load %arg7[%c5, %c0_68, %c0_69] : memref<9x128x128xbf16, #tpu.memory_space<vmem>>, vector<1x128x128xbf16>
    %83 = vector.shape_cast %82 : vector<1x128x128xbf16> to vector<128x128xbf16>
    %cst_70 = arith.constant dense<0.000000e+00> : vector<128x128xf32>
    %84 = tpu.matmul %81, %83, %cst_70 {dimension_numbers = #tpu.dot_dimension_numbers<[1], [0], [0], [1], [0, 0, 1, 1], [], []>} : vector<128x128xbf16>, vector<128x128xbf16>, vector<128x128xf32> -> vector<128x128xf32>
    %85 = arith.addf %79, %84 : vector<128x128xf32>
    %c2_71 = arith.constant 2 : index
    %c0_72 = arith.constant 0 : index
    %c0_73 = arith.constant 0 : index
    %86 = vector.load %arg10[%c2_71, %c0_72, %c0_73] : memref<10x18x128xbf16, #tpu.memory_space<vmem>>, vector<8x16x128xbf16>
    %87 = vector.shape_cast %86 : vector<8x16x128xbf16> to vector<128x128xbf16>
    %c6 = arith.constant 6 : index
    %c0_74 = arith.constant 0 : index
    %c0_75 = arith.constant 0 : index
    %88 = vector.load %arg7[%c6, %c0_74, %c0_75] : memref<9x128x128xbf16, #tpu.memory_space<vmem>>, vector<1x128x128xbf16>
    %89 = vector.shape_cast %88 : vector<1x128x128xbf16> to vector<128x128xbf16>
    %cst_76 = arith.constant dense<0.000000e+00> : vector<128x128xf32>
    %90 = tpu.matmul %87, %89, %cst_76 {dimension_numbers = #tpu.dot_dimension_numbers<[1], [0], [0], [1], [0, 0, 1, 1], [], []>} : vector<128x128xbf16>, vector<128x128xbf16>, vector<128x128xf32> -> vector<128x128xf32>
    %91 = arith.addf %85, %90 : vector<128x128xf32>
    %c2_77 = arith.constant 2 : index
    %c1_78 = arith.constant 1 : index
    %c0_79 = arith.constant 0 : index
    %92 = vector.load %arg10[%c2_77, %c1_78, %c0_79] : memref<10x18x128xbf16, #tpu.memory_space<vmem>>, vector<8x16x128xbf16>
    %93 = vector.shape_cast %92 : vector<8x16x128xbf16> to vector<128x128xbf16>
    %c7 = arith.constant 7 : index
    %c0_80 = arith.constant 0 : index
    %c0_81 = arith.constant 0 : index
    %94 = vector.load %arg7[%c7, %c0_80, %c0_81] : memref<9x128x128xbf16, #tpu.memory_space<vmem>>, vector<1x128x128xbf16>
    %95 = vector.shape_cast %94 : vector<1x128x128xbf16> to vector<128x128xbf16>
    %cst_82 = arith.constant dense<0.000000e+00> : vector<128x128xf32>
    %96 = tpu.matmul %93, %95, %cst_82 {dimension_numbers = #tpu.dot_dimension_numbers<[1], [0], [0], [1], [0, 0, 1, 1], [], []>} : vector<128x128xbf16>, vector<128x128xbf16>, vector<128x128xf32> -> vector<128x128xf32>
    %97 = arith.addf %91, %96 : vector<128x128xf32>
    %c2_83 = arith.constant 2 : index
    %c2_84 = arith.constant 2 : index
    %c0_85 = arith.constant 0 : index
    %98 = vector.load %arg10[%c2_83, %c2_84, %c0_85] : memref<10x18x128xbf16, #tpu.memory_space<vmem>>, vector<8x16x128xbf16>
    %99 = vector.shape_cast %98 : vector<8x16x128xbf16> to vector<128x128xbf16>
    %c8 = arith.constant 8 : index
    %c0_86 = arith.constant 0 : index
    %c0_87 = arith.constant 0 : index
    %100 = vector.load %arg7[%c8, %c0_86, %c0_87] : memref<9x128x128xbf16, #tpu.memory_space<vmem>>, vector<1x128x128xbf16>
    %101 = vector.shape_cast %100 : vector<1x128x128xbf16> to vector<128x128xbf16>
    %cst_88 = arith.constant dense<0.000000e+00> : vector<128x128xf32>
    %102 = tpu.matmul %99, %101, %cst_88 {dimension_numbers = #tpu.dot_dimension_numbers<[1], [0], [0], [1], [0, 0, 1, 1], [], []>} : vector<128x128xbf16>, vector<128x128xbf16>, vector<128x128xf32> -> vector<128x128xf32>
    %103 = arith.addf %97, %102 : vector<128x128xf32>
    %104 = arith.truncf %103 : vector<128x128xf32> to vector<128x128xbf16>
    %105 = vector.shape_cast %104 : vector<128x128xbf16> to vector<1x8x16x128xbf16>
    %c0_89 = arith.constant 0 : index
    %c0_90 = arith.constant 0 : index
    %c0_91 = arith.constant 0 : index
    %c0_92 = arith.constant 0 : index
    %106 = vector.load %arg8[%c0_89, %c0_90, %c0_91, %c0_92] : memref<1x8x16x128xbf16, #tpu.memory_space<vmem>>, vector<1x8x16x128xbf16>
    tpu.vector_store %arg8[%c0_89, %c0_90, %c0_91, %c0_92], %105 {strides = array<i32>} : memref<1x8x16x128xbf16, #tpu.memory_space<vmem>>, vector<1x8x16x128xbf16>,
    %107 = arith.extf %104 : vector<128x128xbf16> to vector<128x128xf32>
    %cst_93 = arith.constant dense<0.000000e+00> : vector<128xf32>
    %108 = vector.multi_reduction <add>, %107, %cst_93 [0] : vector<128x128xf32> to vector<128xf32>
    %109 = vector.shape_cast %108 : vector<128xf32> to vector<1x128xf32>
    %c0_94 = arith.constant 0 : index
    %c0_95 = arith.constant 0 : index
    %c0_96 = arith.constant 0 : index
    %c0_97 = arith.constant 0 : index
    %110 = vector.load %arg9[%c0_94, %c0_95, %c0_96, %c0_97] : memref<1x1x2x128xf32, #tpu.memory_space<vmem>>, vector<1x1x1x128xf32>
    %111 = vector.shape_cast %110 : vector<1x1x1x128xf32> to vector<1x128xf32>
    %112 = vector.shape_cast %109 : vector<1x128xf32> to vector<1x1x1x128xf32>
    tpu.vector_store %arg9[%c0_94, %c0_95, %c0_96, %c0_97], %112 {strides = array<i32>} : memref<1x1x2x128xf32, #tpu.memory_space<vmem>>, vector<1x1x1x128xf32>,
    %113 = arith.mulf %107, %107 : vector<128x128xf32>
    %cst_98 = arith.constant dense<0.000000e+00> : vector<128xf32>
    %114 = vector.multi_reduction <add>, %113, %cst_98 [0] : vector<128x128xf32> to vector<128xf32>
    %115 = vector.shape_cast %114 : vector<128xf32> to vector<1x128xf32>
    %c0_99 = arith.constant 0 : index
    %c0_100 = arith.constant 0 : index
    %c1_101 = arith.constant 1 : index
    %c0_102 = arith.constant 0 : index
    %116 = vector.load %arg9[%c0_99, %c0_100, %c1_101, %c0_102] : memref<1x1x2x128xf32, #tpu.memory_space<vmem>>, vector<1x1x1x128xf32>
    %117 = vector.shape_cast %116 : vector<1x1x1x128xf32> to vector<1x128xf32>
    %118 = vector.shape_cast %115 : vector<1x128xf32> to vector<1x1x1x128xf32>
    tpu.vector_store %arg9[%c0_99, %c0_100, %c1_101, %c0_102], %118 {strides = array<i32>} : memref<1x1x2x128xf32, #tpu.memory_space<vmem>>, vector<1x1x1x128xf32>,
    return
  }
  func.func @transform_0(%arg0: i32, %arg1: i32) -> (i32, i32) {
    %c0_i32 = arith.constant 0 : i32
    %c0_i32_0 = arith.constant 0 : i32
    %c0_i32_1 = arith.constant 0 : i32
    return %c0_i32, %c0_i32_0 : i32, i32
  }
  func.func @transform_1(%arg0: i32, %arg1: i32) -> (i32, i32) {
    %c0_i32 = arith.constant 0 : i32
    %c0_i32_0 = arith.constant 0 : i32
    %c0_i32_1 = arith.constant 0 : i32
    return %c0_i32, %c0_i32_0 : i32, i32
  }
  func.func @transform_2(%arg0: i32, %arg1: i32) -> (i32, i32, i32, i32) {
    %c0_i32 = arith.constant 0 : i32
    %c0_i32_0 = arith.constant 0 : i32
    %c0_i32_1 = arith.constant 0 : i32
    return %arg0, %arg1, %c0_i32, %c0_i32_0 : i32, i32, i32, i32
  }
  func.func @transform_3(%arg0: i32, %arg1: i32) -> (i32, i32, i32, i32) {
    %c8_i32 = arith.constant 8 : i32
    %0 = arith.muli %arg1, %c8_i32 : i32
    %c1_i32 = arith.constant 1 : i32
    %1 = arith.subi %0, %c1_i32 : i32
    %c0_i32 = arith.constant 0 : i32
    %2 = arith.maxsi %1, %c0_i32 : i32
    %c0_i32_0 = arith.constant 0 : i32
    %c0_i32_1 = arith.constant 0 : i32
    %c0_i32_2 = arith.constant 0 : i32
    return %arg0, %2, %c0_i32_0, %c0_i32_1 : i32, i32, i32, i32
  }
  func.func @transform_4(%arg0: i32, %arg1: i32) -> (i32, i32, i32, i32) {
    %c8_i32 = arith.constant 8 : i32
    %0 = arith.muli %arg1, %c8_i32 : i32
    %c8_i32_0 = arith.constant 8 : i32
    %1 = arith.addi %0, %c8_i32_0 : i32
    %c15_i32 = arith.constant 15 : i32
    %2 = arith.minsi %1, %c15_i32 : i32
    %c0_i32 = arith.constant 0 : i32
    %c0_i32_1 = arith.constant 0 : i32
    %c0_i32_2 = arith.constant 0 : i32
    return %arg0, %2, %c0_i32, %c0_i32_1 : i32, i32, i32, i32
  }
  func.func @transform_5(%arg0: i32, %arg1: i32) -> (i32, i32, i32) {
    %c0_i32 = arith.constant 0 : i32
    %c0_i32_0 = arith.constant 0 : i32
    %c0_i32_1 = arith.constant 0 : i32
    %c0_i32_2 = arith.constant 0 : i32
    return %c0_i32, %c0_i32_0, %c0_i32_1 : i32, i32, i32
  }
  func.func @transform_6(%arg0: i32, %arg1: i32) -> (i32, i32, i32, i32) {
    %c0_i32 = arith.constant 0 : i32
    %c0_i32_0 = arith.constant 0 : i32
    %c0_i32_1 = arith.constant 0 : i32
    return %arg0, %arg1, %c0_i32, %c0_i32_0 : i32, i32, i32, i32
  }
  func.func @transform_7(%arg0: i32, %arg1: i32) -> (i32, i32, i32, i32) {
    %c0_i32 = arith.constant 0 : i32
    %c0_i32_0 = arith.constant 0 : i32
    %c0_i32_1 = arith.constant 0 : i32
    return %arg0, %arg1, %c0_i32, %c0_i32_0 : i32, i32, i32, i32
  }
}

module attributes {stable_mosaic.version = 11 : i64} {
  func.func @_conv3_kernel(%arg0: i32, %arg1: i32, %arg2: memref<1x128xf32, #tpu.memory_space<vmem>>, %arg3: memref<1x128xf32, #tpu.memory_space<vmem>>, %arg4: memref<1x8x16x128xbf16, #tpu.memory_space<vmem>>, %arg5: memref<128x128xbf16, #tpu.memory_space<vmem>>, %arg6: memref<1x8x16x128xbf16, #tpu.memory_space<vmem>>, %arg7: memref<1x1x2x128xf32, #tpu.memory_space<vmem>>) attributes {dimension_semantics = [#tpu.dimension_semantics<parallel>, #tpu.dimension_semantics<parallel>], iteration_bounds = array<i64: 2, 2>, scalar_prefetch = 0 : i64, scratch_operands = 0 : i64, tpu.core_type = #tpu.core_type<tc>, window_params = [{pipeline_mode = #tpu.pipeline_mode<synchronous>, transform_indices = @transform_0, window_bounds = array<i64: 1, 128>}, {pipeline_mode = #tpu.pipeline_mode<synchronous>, transform_indices = @transform_1, window_bounds = array<i64: 1, 128>}, {transform_indices = @transform_2, window_bounds = array<i64: 1, 8, 16, 128>}, {pipeline_mode = #tpu.pipeline_mode<synchronous>, transform_indices = @transform_3, window_bounds = array<i64: 128, 128>}, {transform_indices = @transform_4, window_bounds = array<i64: 1, 8, 16, 128>}, {transform_indices = @transform_5, window_bounds = array<i64: 1, 1, 2, 128>}]} {
    %c0 = arith.constant 0 : index
    %c0_0 = arith.constant 0 : index
    %c0_1 = arith.constant 0 : index
    %c0_2 = arith.constant 0 : index
    %0 = vector.load %arg4[%c0, %c0_0, %c0_1, %c0_2] : memref<1x8x16x128xbf16, #tpu.memory_space<vmem>>, vector<1x8x16x128xbf16>
    %1 = vector.shape_cast %0 : vector<1x8x16x128xbf16> to vector<128x128xbf16>
    %2 = arith.extf %1 : vector<128x128xbf16> to vector<128x128xf32>
    %c0_3 = arith.constant 0 : index
    %c0_4 = arith.constant 0 : index
    %3 = vector.load %arg2[%c0_3, %c0_4] : memref<1x128xf32, #tpu.memory_space<vmem>>, vector<1x128xf32>
    %4 = vector.broadcast %3 : vector<1x128xf32> to vector<128x128xf32>
    %5 = arith.mulf %2, %4 : vector<128x128xf32>
    %c0_5 = arith.constant 0 : index
    %c0_6 = arith.constant 0 : index
    %6 = vector.load %arg3[%c0_5, %c0_6] : memref<1x128xf32, #tpu.memory_space<vmem>>, vector<1x128xf32>
    %7 = vector.broadcast %6 : vector<1x128xf32> to vector<128x128xf32>
    %8 = arith.addf %5, %7 : vector<128x128xf32>
    %cst = arith.constant 0.000000e+00 : f32
    %9 = vector.broadcast %cst : f32 to vector<128x128xf32>
    %10 = arith.maximumf %8, %9 : vector<128x128xf32>
    %11 = arith.truncf %10 : vector<128x128xf32> to vector<128x128xbf16>
    %c0_7 = arith.constant 0 : index
    %c0_8 = arith.constant 0 : index
    %12 = vector.load %arg5[%c0_7, %c0_8] : memref<128x128xbf16, #tpu.memory_space<vmem>>, vector<128x128xbf16>
    %cst_9 = arith.constant dense<0.000000e+00> : vector<128x128xf32>
    %13 = tpu.matmul %11, %12, %cst_9 {dimension_numbers = #tpu.dot_dimension_numbers<[1], [0], [0], [1], [0, 0, 1, 1], [], []>} : vector<128x128xbf16>, vector<128x128xbf16>, vector<128x128xf32> -> vector<128x128xf32>
    %14 = arith.truncf %13 : vector<128x128xf32> to vector<128x128xbf16>
    %15 = vector.shape_cast %14 : vector<128x128xbf16> to vector<1x8x16x128xbf16>
    %c0_10 = arith.constant 0 : index
    %c0_11 = arith.constant 0 : index
    %c0_12 = arith.constant 0 : index
    %c0_13 = arith.constant 0 : index
    %16 = vector.load %arg6[%c0_10, %c0_11, %c0_12, %c0_13] : memref<1x8x16x128xbf16, #tpu.memory_space<vmem>>, vector<1x8x16x128xbf16>
    tpu.vector_store %arg6[%c0_10, %c0_11, %c0_12, %c0_13], %15 {strides = array<i32>} : memref<1x8x16x128xbf16, #tpu.memory_space<vmem>>, vector<1x8x16x128xbf16>,
    %17 = arith.extf %14 : vector<128x128xbf16> to vector<128x128xf32>
    %cst_14 = arith.constant dense<0.000000e+00> : vector<128xf32>
    %18 = vector.multi_reduction <add>, %17, %cst_14 [0] : vector<128x128xf32> to vector<128xf32>
    %19 = vector.shape_cast %18 : vector<128xf32> to vector<1x128xf32>
    %c0_15 = arith.constant 0 : index
    %c0_16 = arith.constant 0 : index
    %c0_17 = arith.constant 0 : index
    %c0_18 = arith.constant 0 : index
    %20 = vector.load %arg7[%c0_15, %c0_16, %c0_17, %c0_18] : memref<1x1x2x128xf32, #tpu.memory_space<vmem>>, vector<1x1x1x128xf32>
    %21 = vector.shape_cast %20 : vector<1x1x1x128xf32> to vector<1x128xf32>
    %22 = vector.shape_cast %19 : vector<1x128xf32> to vector<1x1x1x128xf32>
    tpu.vector_store %arg7[%c0_15, %c0_16, %c0_17, %c0_18], %22 {strides = array<i32>} : memref<1x1x2x128xf32, #tpu.memory_space<vmem>>, vector<1x1x1x128xf32>,
    %23 = arith.mulf %17, %17 : vector<128x128xf32>
    %cst_19 = arith.constant dense<0.000000e+00> : vector<128xf32>
    %24 = vector.multi_reduction <add>, %23, %cst_19 [0] : vector<128x128xf32> to vector<128xf32>
    %25 = vector.shape_cast %24 : vector<128xf32> to vector<1x128xf32>
    %c0_20 = arith.constant 0 : index
    %c0_21 = arith.constant 0 : index
    %c1 = arith.constant 1 : index
    %c0_22 = arith.constant 0 : index
    %26 = vector.load %arg7[%c0_20, %c0_21, %c1, %c0_22] : memref<1x1x2x128xf32, #tpu.memory_space<vmem>>, vector<1x1x1x128xf32>
    %27 = vector.shape_cast %26 : vector<1x1x1x128xf32> to vector<1x128xf32>
    %28 = vector.shape_cast %25 : vector<1x128xf32> to vector<1x1x1x128xf32>
    tpu.vector_store %arg7[%c0_20, %c0_21, %c1, %c0_22], %28 {strides = array<i32>} : memref<1x1x2x128xf32, #tpu.memory_space<vmem>>, vector<1x1x1x128xf32>,
    return
  }
  func.func @transform_0(%arg0: i32, %arg1: i32) -> (i32, i32) {
    %c0_i32 = arith.constant 0 : i32
    %c0_i32_0 = arith.constant 0 : i32
    %c0_i32_1 = arith.constant 0 : i32
    return %c0_i32, %c0_i32_0 : i32, i32
  }
  func.func @transform_1(%arg0: i32, %arg1: i32) -> (i32, i32) {
    %c0_i32 = arith.constant 0 : i32
    %c0_i32_0 = arith.constant 0 : i32
    %c0_i32_1 = arith.constant 0 : i32
    return %c0_i32, %c0_i32_0 : i32, i32
  }
  func.func @transform_2(%arg0: i32, %arg1: i32) -> (i32, i32, i32, i32) {
    %c0_i32 = arith.constant 0 : i32
    %c0_i32_0 = arith.constant 0 : i32
    %c0_i32_1 = arith.constant 0 : i32
    return %arg0, %arg1, %c0_i32, %c0_i32_0 : i32, i32, i32, i32
  }
  func.func @transform_3(%arg0: i32, %arg1: i32) -> (i32, i32) {
    %c0_i32 = arith.constant 0 : i32
    %c0_i32_0 = arith.constant 0 : i32
    %c0_i32_1 = arith.constant 0 : i32
    return %c0_i32, %c0_i32_0 : i32, i32
  }
  func.func @transform_4(%arg0: i32, %arg1: i32) -> (i32, i32, i32, i32) {
    %c0_i32 = arith.constant 0 : i32
    %c0_i32_0 = arith.constant 0 : i32
    %c0_i32_1 = arith.constant 0 : i32
    return %arg0, %arg1, %c0_i32, %c0_i32_0 : i32, i32, i32, i32
  }
  func.func @transform_5(%arg0: i32, %arg1: i32) -> (i32, i32, i32, i32) {
    %c0_i32 = arith.constant 0 : i32
    %c0_i32_0 = arith.constant 0 : i32
    %c0_i32_1 = arith.constant 0 : i32
    return %arg0, %arg1, %c0_i32, %c0_i32_0 : i32, i32, i32, i32
  }
}

module attributes {stable_mosaic.version = 11 : i64} {
  func.func @_residual_kernel(%arg0: i32, %arg1: i32, %arg2: memref<1x128xf32, #tpu.memory_space<vmem>>, %arg3: memref<1x128xf32, #tpu.memory_space<vmem>>, %arg4: memref<1x8x16x128xbf16, #tpu.memory_space<vmem>>, %arg5: memref<1x8x16x128xf32, #tpu.memory_space<vmem>>, %arg6: memref<1x8x16x128xf32, #tpu.memory_space<vmem>>) attributes {dimension_semantics = [#tpu.dimension_semantics<parallel>, #tpu.dimension_semantics<parallel>], iteration_bounds = array<i64: 2, 2>, scalar_prefetch = 0 : i64, scratch_operands = 0 : i64, tpu.core_type = #tpu.core_type<tc>, window_params = [{pipeline_mode = #tpu.pipeline_mode<synchronous>, transform_indices = @transform_0, window_bounds = array<i64: 1, 128>}, {pipeline_mode = #tpu.pipeline_mode<synchronous>, transform_indices = @transform_1, window_bounds = array<i64: 1, 128>}, {transform_indices = @transform_2, window_bounds = array<i64: 1, 8, 16, 128>}, {transform_indices = @transform_3, window_bounds = array<i64: 1, 8, 16, 128>}, {transform_indices = @transform_4, window_bounds = array<i64: 1, 8, 16, 128>}]} {
    %c0 = arith.constant 0 : index
    %c0_0 = arith.constant 0 : index
    %c0_1 = arith.constant 0 : index
    %c0_2 = arith.constant 0 : index
    %0 = vector.load %arg4[%c0, %c0_0, %c0_1, %c0_2] : memref<1x8x16x128xbf16, #tpu.memory_space<vmem>>, vector<1x8x16x128xbf16>
    %1 = vector.shape_cast %0 : vector<1x8x16x128xbf16> to vector<128x128xbf16>
    %2 = arith.extf %1 : vector<128x128xbf16> to vector<128x128xf32>
    %c0_3 = arith.constant 0 : index
    %c0_4 = arith.constant 0 : index
    %c0_5 = arith.constant 0 : index
    %c0_6 = arith.constant 0 : index
    %3 = vector.load %arg5[%c0_3, %c0_4, %c0_5, %c0_6] : memref<1x8x16x128xf32, #tpu.memory_space<vmem>>, vector<1x8x16x128xf32>
    %4 = vector.shape_cast %3 : vector<1x8x16x128xf32> to vector<128x128xf32>
    %c0_7 = arith.constant 0 : index
    %c0_8 = arith.constant 0 : index
    %5 = vector.load %arg2[%c0_7, %c0_8] : memref<1x128xf32, #tpu.memory_space<vmem>>, vector<1x128xf32>
    %6 = vector.broadcast %5 : vector<1x128xf32> to vector<128x128xf32>
    %7 = arith.mulf %2, %6 : vector<128x128xf32>
    %c0_9 = arith.constant 0 : index
    %c0_10 = arith.constant 0 : index
    %8 = vector.load %arg3[%c0_9, %c0_10] : memref<1x128xf32, #tpu.memory_space<vmem>>, vector<1x128xf32>
    %9 = vector.broadcast %8 : vector<1x128xf32> to vector<128x128xf32>
    %10 = arith.addf %7, %9 : vector<128x128xf32>
    %11 = arith.addf %10, %4 : vector<128x128xf32>
    %cst = arith.constant 0.000000e+00 : f32
    %12 = vector.broadcast %cst : f32 to vector<128x128xf32>
    %13 = arith.maximumf %11, %12 : vector<128x128xf32>
    %14 = vector.shape_cast %13 : vector<128x128xf32> to vector<1x8x16x128xf32>
    %c0_11 = arith.constant 0 : index
    %c0_12 = arith.constant 0 : index
    %c0_13 = arith.constant 0 : index
    %c0_14 = arith.constant 0 : index
    %15 = vector.load %arg6[%c0_11, %c0_12, %c0_13, %c0_14] : memref<1x8x16x128xf32, #tpu.memory_space<vmem>>, vector<1x8x16x128xf32>
    tpu.vector_store %arg6[%c0_11, %c0_12, %c0_13, %c0_14], %14 {strides = array<i32>} : memref<1x8x16x128xf32, #tpu.memory_space<vmem>>, vector<1x8x16x128xf32>,
    return
  }
  func.func @transform_0(%arg0: i32, %arg1: i32) -> (i32, i32) {
    %c0_i32 = arith.constant 0 : i32
    %c0_i32_0 = arith.constant 0 : i32
    %c0_i32_1 = arith.constant 0 : i32
    return %c0_i32, %c0_i32_0 : i32, i32
  }
  func.func @transform_1(%arg0: i32, %arg1: i32) -> (i32, i32) {
    %c0_i32 = arith.constant 0 : i32
    %c0_i32_0 = arith.constant 0 : i32
    %c0_i32_1 = arith.constant 0 : i32
    return %c0_i32, %c0_i32_0 : i32, i32
  }
  func.func @transform_2(%arg0: i32, %arg1: i32) -> (i32, i32, i32, i32) {
    %c0_i32 = arith.constant 0 : i32
    %c0_i32_0 = arith.constant 0 : i32
    %c0_i32_1 = arith.constant 0 : i32
    return %arg0, %arg1, %c0_i32, %c0_i32_0 : i32, i32, i32, i32
  }
  func.func @transform_3(%arg0: i32, %arg1: i32) -> (i32, i32, i32, i32) {
    %c0_i32 = arith.constant 0 : i32
    %c0_i32_0 = arith.constant 0 : i32
    %c0_i32_1 = arith.constant 0 : i32
    return %arg0, %arg1, %c0_i32, %c0_i32_0 : i32, i32, i32, i32
  }
  func.func @transform_4(%arg0: i32, %arg1: i32) -> (i32, i32, i32, i32) {
    %c0_i32 = arith.constant 0 : i32
    %c0_i32_0 = arith.constant 0 : i32
    %c0_i32_1 = arith.constant 0 : i32
    return %arg0, %arg1, %c0_i32, %c0_i32_0 : i32, i32, i32, i32
  }
}

</mosaic_0001>

<bundles_post_ra>
// kernel: bottleneck_forward.4
= control target key start
LH: loop header
LB: loop body
LE: loop exit
PB: predicated region body
PF: predicated region fallthrough
CT: control target
= control target key end

     0   :  { %9 = vsyncpa [#allocation3], 0  ;;  %s1155_s0 = inlined_call_operand.hbm [shape: f32[2,16,16,128], index: 0, kind: input, shape index: {}]   ;;  %s1156_s1 = inlined_call_operand.vmem [shape: bf16[128,128], index: 1, kind: input, shape index: {}]   ;;  %s1157_s2 = inlined_call_operand.vmem [shape: bf16[2,16,16,128], index: 2, kind: output, shape index: {0}]   ;;  %s1158_s3 = inlined_call_operand.vmem [shape: f32[2,2,2,128], index: 3, kind: output, shape index: {1}]  }
   0x1   :  { %11 = vsyncpa [#allocation3 + $0x1], 0  ;;  %s965_s12 = smov 0   ;;  %s967_s13 = smov 0  }
   0x2   :  { %s969_s14 = smov 0   ;;  %s971_s15 = smov 0  }
   0x3   :  { %s973_s16 = smov 0   ;;  %s975_s17 = smov 0  }
   0x4   :  { %s977_s18 = smov 0   ;;  %s979_s19 = smov 0  }
   0x5 LB: > { %s641_s20 = sadd.s32 4294967295, %s941_s19   ;;  %s26_s21 = sadd.s32 1, %s933_s17  ;;  %s941_s19 = sphi %s979_s19, %s17_s19   ;;  %s937_s18 = sphi %s977_s18, %s1167_s18   ;;  %s933_s17 = sphi %s975_s17, %s1166_s17   ;;  %s929_s16 = sphi %s973_s16, %s1165_s16   ;;  %s925_s15 = sphi %s971_s15, %s1164_s15   ;;  %s921_s14 = sphi %s969_s14, %s1163_s14   ;;  %s917_s13 = sphi %s967_s13, %s1162_s13   ;;  %s913_s12 = sphi %s965_s12, %s1161_s12  }
   0x6   : > { %p27_p0 = scmp.ge.s32.totalorder %s26_s21, 2  ;;  %s29_s22 = sadd.s32 1, %s937_s18 }
   0x7   : > { %s38_s23 = sadd.s32 1, %s921_s14  ;;  %p45_p1 = scmp.ne.s32.totalorder %s921_s14, %s917_s13 }
   0x8   : > { %s1169_s21 = smov (%p27_p0, %s26_s21), 0  ;;  %s1171_s22 = smov (!%p27_p0, %s29_s22), %s937_s18 }
   0x9   : > { %s34_s24 = ssub.s32 %s933_s17, %s1169_s21  ;;  %p46_p2 = scmp.eq.s32.totalorder %s941_s19, 0 }
   0xa   : > { %p31_p3 = scmp.ge.s32.totalorder %s1171_s22, 2  ;;  %p51_p4 = scmp.ne.s32.totalorder %s917_s13, %s913_s12 }
   0xb   : > { %p1016_p5 = por %p46_p2, %p45_p1  ;;  %p52_p6 = scmp.eq.s32.totalorder %s641_s20, 0 }
   0xc   : > { %s1173_s22 = smov (%p31_p3, %s1171_s22), 0  ;;  %p778_p8 = scmp.lt.s32.totalorder %s941_s19, 4 }
   0xd   : > { %p1022_p7 = por %p52_p6, %p51_p4  ;;  %s33_s27 = ssub.s32 %s937_s18, %s1173_s22 }
   0xe   : > { %s35_s28 = sor.u32 %s34_s24, %s33_s27  ;;  %s155_s29 = sand.u32 1, %s921_s14  }
   0xf   : > { %p36_p9 = scmp.eq.s32.totalorder %s35_s28, 0  ;;  %s645_s30 = sshll.u32 %s155_s29, 7 }
  0x10   : > { %s692_s4 = sshll.u32 %s933_s17, 4  ;;  %s648_s6 = sshll.u32 %s937_s18, 5 }
  0x11   : > { %s1032_s5 = scalar_select %p36_p9, %s921_s14, %s38_s23  }
  0x12   : > { %s165_s7 = sadd.s32 %s692_s4, %s648_s6  ;;  %s159_s8 = scalar_lea.vmem [#allocation2], %s645_s30 }
  0x13   : > { %s170_s9 = sshll.u32 %s159_s8, 4  ;;  %s649_s10 = sshll.u32 %s165_s7, 3  ;;  %s171_s9 = int_to_ptr.vmem [resolvable:$true] %s170_s9 }
  0x14   : > { %s167_s20 = scalar_lea.hbm %s1155_s0, %s649_s10  ;;  %p775_p10 = pnand %p778_p8, %p1016_p5 }
  0x15   : > { %s168_s24 = sshll.u32 %s167_s20, 4  ;;  %p650_p11 = scmp.ge.s32.totalorder %s941_s19, 1  ;;  %s169_s24 = int_to_ptr.hbm [resolvable:$true] %s168_s24 }
  0x16   : > { %s156_s27 = scalar_lea.sflag [#allocation3], %s155_s29  ;;  %s943_s23 = smov 128  }
  0x17   : > { %s944_s28 = smov 8   ;;  %p178_p12 = scmp.lt.s32.totalorder %s941_s19, 5 }
  0x18   : > { %777 = dma.hbm_to_vmem [thread:$0]  (!%p775_p10), %s169_s24, 2048, %s171_s9, %s156_s27, %s943_s23, %s943_s23, %s944_s28  }
  0x19   : > { %p179_p13 = pnand %p650_p11, %p178_p12 }
  0x1a   : > { %s184_s30 = sand.u32 (!%p179_p13), 1, %s917_s13  }
  0x1b   : > { %182 = sbr.rel (%p179_p13) target bundleno = 260 (0x104), region = 28  ;;  %s651_s4 = sshll.u32 (!%p179_p13), %s184_s30, 7 }
  0x1c   : > { %s185_s6 = scalar_lea.sflag (!%p179_p13), [#allocation3], %s184_s30  ;;  %s1045_s7 = scalar_lea.vmem (!%p179_p13), [#allocation2], %s651_s4 }
  0x20   : > { %908 = dma.done.wait (%p1022_p7), %s185_s6, 2048  }
  0x21   : > { %910 = vsyncadd (%p1022_p7), %s185_s6, 4294965248  ;;  %v700_v0 = vld [vmem:[%s1156_s1 + $0x38] sm:$0xff]  ;;  %v699_v1 = vld [vmem:[%s1156_s1 + $0x30] sm:$0xff]  ;;  %s652_s25 = sshll.u32 %s925_s15, 3  ;;  %p227_p0 = scmp.lt.s32.totalorder %s929_s16, 1 }
  0x22   : > { %333 = vmatpush.bf16.msra.mxu0 %v700_v0  ;;  %748 = vmatpush.bf16.msra.mxu1 %v700_v0  ;;  %v698_v2 = vld [vmem:[%s1156_s1 + $0x28] sm:$0xff]  ;;  %v697_v3 = vld [vmem:[%s1156_s1 + $0x20] sm:$0xff]  ;;  %v696_v4 = vld [vmem:[%s1156_s1 + $0x18] sm:$0xff]  ;;  %p229_p1 = scmp.lt.s32.totalorder %s652_s25, 15  ;;  %p239_p2 = scmp.lt.s32.totalorder %s925_s15, 1 }
  0x23   : > { %749 = vmatpush.bf16.msra.mxu2 %v700_v0  ;;  %750 = vmatpush.bf16.msra.mxu3 %v700_v0  ;;  %v695_v5 = vld [vmem:[%s1156_s1 + $0x10] sm:$0xff]  ;;  %v694_v6 = vld [vmem:[%s1156_s1 + $0x8] sm:$0xff]  ;;  %v693_v7 = vld [vmem:[%s1156_s1] sm:$0xff]  ;;  %s1175_s16 = smov (!%p227_p0, %s929_s16), 1 }
  0x24   : > { %v245_v8 = vld [vmem:[%s1045_s7] sm:$0xff]  ;;  %v246_v9 = vld [vmem:[%s1045_s7 + $0x8] sm:$0xff]  ;;  %v247_v20 = vld [vmem:[%s1045_s7 + $0x10] sm:$0xff]  ;;  %s1177_s25 = smov (!%p229_p1, %s652_s25), 15  ;;  %s654_s8 = sshll.u32 %s1175_s16, 5 }
  0x25   : > { %v249_v10 = vld [vmem:[%s1045_s7 + $0x20] sm:$0xff]  ;;  %v250_v11 = vld [vmem:[%s1045_s7 + $0x28] sm:$0xff]  ;;  %v261_v16 = vpack.c.bf16 %v246_v9, %v245_v8  ;;  %v248_v21 = vld [vmem:[%s1045_s7 + $0x18] sm:$0xff]  ;;  %s653_s29 = sshll.u32 %s1177_s25, 1  ;;  %s1179_s15 = smov (!%p239_p2, %s925_s15), 1 }
  0x26   : > { %334 = vmatpush.bf16.msra.mxu0 %v699_v1  ;;  %751 = vmatpush.bf16.msra.mxu1 %v699_v1  ;;  %v253_v12 = vld [vmem:[%s1045_s7 + $0x40] sm:$0xff]  ;;  %v254_v13 = vld [vmem:[%s1045_s7 + $0x48] sm:$0xff]  ;;  %v263_v17 = vpack.c.bf16 %v250_v11, %v249_v10  ;;  %v251_v22 = vld [vmem:[%s1045_s7 + $0x30] sm:$0xff]  ;;  %v262_v28 = vpack.c.bf16 %v248_v21, %v247_v20  ;;  %s656_s12 = sshll.u32 %s1175_s16, 1 }
  0x27   : > { %752 = vmatpush.bf16.msra.mxu2 %v699_v1  ;;  %753 = vmatpush.bf16.msra.mxu3 %v699_v1  ;;  %v257_v14 = vld [vmem:[%s1045_s7 + $0x60] sm:$0xff]  ;;  %v258_v15 = vld [vmem:[%s1045_s7 + $0x68] sm:$0xff]  ;;  %v265_v18 = vpack.c.bf16 %v254_v13, %v253_v12  ;;  %v252_v23 = vld [vmem:[%s1045_s7 + $0x38] sm:$0xff]  ;;  %s242_s20 = sadd.s32 %s656_s12, %s1179_s15 }
  0x28   : > { %v267_v19 = vpack.c.bf16 %v258_v15, %v257_v14  ;;  %v255_v24 = vld [vmem:[%s1045_s7 + $0x50] sm:$0xff]  ;;  %v256_v25 = vld [vmem:[%s1045_s7 + $0x58] sm:$0xff]  ;;  %v264_v29 = vpack.c.bf16 %v252_v23, %v251_v22  ;;  %s657_s24 = sshll.u32 %s242_s20, 1 }
  0x29   : > { %v259_v26 = vld [vmem:[%s1045_s7 + $0x70] sm:$0xff]  ;;  %v260_v27 = vld [vmem:[%s1045_s7 + $0x78] sm:$0xff]  ;;  %v266_v30 = vpack.c.bf16 %v256_v25, %v255_v24  ;;  %s233_s7 = sadd.s32 %s654_s8, %s653_s29  ;;  %s244_s28 = scalar_lea.vmem %s1158_s3, %s657_s24 }
  0x2a   : > { %335 = vmatpush.bf16.msra.mxu0 %v698_v2  ;;  %754 = vmatpush.bf16.msra.mxu1 %v698_v2  ;;  %v268_v31 = vpack.c.bf16 %v260_v27, %v259_v26  ;;  %s655_s9 = sshll.u32 %s233_s7, 2 }
  0x2b   : > { %755 = vmatpush.bf16.msra.mxu2 %v698_v2  ;;  %756 = vmatpush.bf16.msra.mxu3 %v698_v2  ;;  %s1102_s26 = scalar_lea.vmem %s1157_s2, %s655_s9 }
  0x2e   : > { %336 = vmatpush.bf16.msra.mxu0 %v697_v3  ;;  %757 = vmatpush.bf16.msra.mxu1 %v697_v3 }
  0x2f   : > { %758 = vmatpush.bf16.msra.mxu2 %v697_v3  ;;  %759 = vmatpush.bf16.msra.mxu3 %v697_v3 }
  0x32   : > { %337 = vmatpush.bf16.msra.mxu0 %v696_v4  ;;  %760 = vmatpush.bf16.msra.mxu1 %v696_v4 }
  0x33   : > { %761 = vmatpush.bf16.msra.mxu2 %v696_v4  ;;  %762 = vmatpush.bf16.msra.mxu3 %v696_v4 }
  0x36   : > { %338 = vmatpush.bf16.msra.mxu0 %v695_v5  ;;  %763 = vmatpush.bf16.msra.mxu1 %v695_v5 }
  0x37   : > { %764 = vmatpush.bf16.msra.mxu2 %v695_v5  ;;  %765 = vmatpush.bf16.msra.mxu3 %v695_v5 }
  0x3a   : > { %339 = vmatpush.bf16.msra.mxu0 %v694_v6  ;;  %766 = vmatpush.bf16.msra.mxu1 %v694_v6 }
  0x3b   : > { %767 = vmatpush.bf16.msra.mxu2 %v694_v6  ;;  %768 = vmatpush.bf16.msra.mxu3 %v694_v6 }
  0x3e   : > { %340 = vmatpush.bf16.msra.mxu0 %v693_v7  ;;  %769 = vmatpush.bf16.msra.mxu1 %v693_v7 }
  0x3f   : > { %770 = vmatpush.bf16.msra.mxu2 %v693_v7  ;;  %771 = vmatpush.bf16.msra.mxu3 %v693_v7 }
  0x41   : > { %341 = vmatmul.bf16.vlgmr.msra.gmra.mxu0 %v261_v16  ;;  %351 = vmatmul.bf16.vlgmr.msra.gmra.mxu1 %v263_v17 }
  0x42   : > { %361 = vmatmul.bf16.vlgmr.msra.gmra.mxu2 %v265_v18  ;;  %371 = vmatmul.bf16.vlgmr.msra.gmra.mxu3 %v267_v19 }
  0x51   : > { %346 = vmatmul.bf16.gmra.mxu0 %v262_v28  ;;  %356 = vmatmul.bf16.gmra.mxu1 %v264_v29 }
  0x52   : > { %366 = vmatmul.bf16.gmra.mxu2 %v266_v30  ;;  %376 = vmatmul.bf16.gmra.mxu3 %v268_v31 }
  0xbe   : > { %v342_v32 = vpop.f32.mrf.mxu0  ;;  %v352_v33 = vpop.f32.mrf.mxu1 }
  0xbf   : > { %v382_v43 = vpack.c.bf16 %v342_v32, %v342_v32  ;;  %v386_v52 = vpack.c.bf16 %v352_v33, %v352_v33 }
  0xc1   : > { %v414_v50 = vunpack.c.l.bf16 %v382_v43  ;;  %v418_v1 = vunpack.c.l.bf16 %v386_v52 }
  0xc3   : > { %v452_v56 = vmul.f32 %v414_v50, %v414_v50  ;;  %v456_v12 = vmul.f32 %v418_v1, %v418_v1 }
  0xc5   : > { %v362_v34 = vpop.f32.mrf.mxu2  ;;  %v1097_v35 = vpop.f32.mrf.mxu3 }
  0xc6   : > { %v344_v36 = vpop.f32.mrf.mxu0  ;;  %v354_v37 = vpop.f32.mrf.mxu1  ;;  %v390_v11 = vpack.c.bf16 %v362_v34, %v362_v34 }
  0xc7   : > { %v704_v38 = vpack.c.bf16 %v344_v36, %v342_v32  ;;  %v714_v39 = vpack.c.bf16 %v354_v37, %v352_v33  ;;  %v383_v40 = vpack.c.bf16 %v344_v36, %v344_v36  ;;  %v387_v58 = vpack.c.bf16 %v354_v37, %v354_v37 }
  0xc8   : > { %v422_v25 = vunpack.c.l.bf16 %v390_v11  ;;  %v394_v36 = vpack.c.bf16 %v1097_v35, %v1097_v35 }
  0xc9   : > { %705 = vst [vmem:[%s1102_s26] sm:$0xff] %v704_v38   ;;  %v415_v49 = vunpack.c.l.bf16 %v383_v40  ;;  %v419_v6 = vunpack.c.l.bf16 %v387_v58 }
  0xca   : > { %742 = vst [vmem:[%s1102_s26 + $0x10] sm:$0xff] %v714_v39   ;;  %v460_v37 = vmul.f32 %v422_v25, %v422_v25 }
  0xcb   : > { %v453_v53 = vmul.f32 %v415_v49, %v415_v49  ;;  %v430_v57 = vadd.f32 %v415_v49, %v414_v50  ;;  %v457_v21 = vmul.f32 %v419_v6, %v419_v6 }
  0xcd   : > { %v364_v41 = vpop.f32.mrf.mxu2  ;;  %v1106_v42 = vpop.f32.mrf.mxu3  ;;  %v468_v2 = vadd.f32 %v453_v53, %v452_v56 }
  0xce   : > { %v347_v44 = vpop.f32.mrf.mxu0  ;;  %v357_v45 = vpop.f32.mrf.mxu1  ;;  %v724_v46 = vpack.c.bf16 %v364_v41, %v362_v34  ;;  %v734_v47 = vpack.c.bf16 %v1106_v42, %v1097_v35  ;;  %v391_v18 = vpack.c.bf16 %v364_v41, %v364_v41  ;;  %v395_v41 = vpack.c.bf16 %v1106_v42, %v1106_v42 }
  0xcf   : > { %v384_v48 = vpack.c.bf16 %v347_v44, %v347_v44  ;;  %v388_v4 = vpack.c.bf16 %v357_v45, %v357_v45 }
  0xd0   : > { %744 = vst [vmem:[%s1102_s26 + $0x20] sm:$0xff] %v724_v46   ;;  %v423_v30 = vunpack.c.l.bf16 %v391_v18  ;;  %v427_v35 = vunpack.c.l.bf16 %v395_v41 }
  0xd1   : > { %746 = vst [vmem:[%s1102_s26 + $0x30] sm:$0xff] %v734_v47   ;;  %v416_v51 = vunpack.c.l.bf16 %v384_v48  ;;  %v420_v13 = vunpack.c.l.bf16 %v388_v4  ;;  %v426_v47 = vunpack.c.l.bf16 %v394_v36 }
  0xd2   : > { %v461_v43 = vmul.f32 %v423_v30, %v423_v30 }
  0xd3   : > { %v454_v61 = vmul.f32 %v416_v51, %v416_v51  ;;  %v431_v3 = vadd.f32 %v430_v57, %v416_v51  ;;  %v458_v26 = vmul.f32 %v420_v13, %v420_v13  ;;  %v464_v57 = vmul.f32 %v426_v47, %v426_v47 }
  0xd5   : > { %v367_v54 = vpop.f32.mrf.mxu2  ;;  %v1112_v55 = vpop.f32.mrf.mxu3  ;;  %v469_v7 = vadd.f32 %v468_v2, %v454_v61 }
  0xd6   : > { %v349_v59 = vpop.f32.mrf.mxu0  ;;  %v359_v60 = vpop.f32.mrf.mxu1  ;;  %v392_v29 = vpack.c.bf16 %v367_v54, %v367_v54  ;;  %v396_v51 = vpack.c.bf16 %v1112_v55, %v1112_v55 }
  0xd7   : > { %v385_v62 = vpack.c.bf16 %v349_v59, %v349_v59  ;;  %v709_v63 = vpack.c.bf16 %v349_v59, %v347_v44  ;;  %v719_v0 = vpack.c.bf16 %v359_v60, %v357_v45  ;;  %v389_v10 = vpack.c.bf16 %v359_v60, %v359_v60 }
  0xd8   : > { %v424_v40 = vunpack.c.l.bf16 %v392_v29  ;;  %v428_v59 = vunpack.c.l.bf16 %v396_v51  ;;  %v465_v60 = vmul.f32 %v427_v35, %v427_v35 }
  0xd9   : > { %741 = vst [vmem:[%s1102_s26 + $0x8] sm:$0xff] %v709_v63   ;;  %v417_v5 = vunpack.c.l.bf16 %v385_v62  ;;  %v421_v23 = vunpack.c.l.bf16 %v389_v10 }
  0xda   : > { %743 = vst [vmem:[%s1102_s26 + $0x18] sm:$0xff] %v719_v0   ;;  %v462_v49 = vmul.f32 %v424_v40, %v424_v40 }
  0xdb   : > { %v432_v8 = vadd.f32 %v431_v3, %v417_v5  ;;  %v455_v9 = vmul.f32 %v417_v5, %v417_v5  ;;  %v459_v32 = vmul.f32 %v421_v23, %v421_v23 }
  0xdd   : > { %v433_v14 = vadd.f32 %v432_v8, %v418_v1  ;;  %v470_v15 = vadd.f32 %v469_v7, %v455_v9  ;;  %v369_v16 = vpop.f32.mrf.mxu2  ;;  %v379_v17 = vpop.f32.mrf.mxu3  ;;  %v466_v1 = vmul.f32 %v428_v59, %v428_v59 }
  0xde   : > { %v729_v19 = vpack.c.bf16 %v369_v16, %v367_v54  ;;  %v739_v20 = vpack.c.bf16 %v379_v17, %v1112_v55  ;;  %v393_v34 = vpack.c.bf16 %v369_v16, %v369_v16  ;;  %v397_v56 = vpack.c.bf16 %v379_v17, %v379_v17 }
  0xdf   : > { %v471_v22 = vadd.f32 %v470_v15, %v456_v12  ;;  %v434_v24 = vadd.f32 %v433_v14, %v419_v6 }
  0xe0   : > { %745 = vst [vmem:[%s1102_s26 + $0x28] sm:$0xff] %v729_v19   ;;  %v425_v46 = vunpack.c.l.bf16 %v393_v34  ;;  %v429_v63 = vunpack.c.l.bf16 %v397_v56 }
  0xe1   : > { %v435_v27 = vadd.f32 %v434_v24, %v420_v13  ;;  %v472_v28 = vadd.f32 %v471_v22, %v457_v21  ;;  %747 = vst [vmem:[%s1102_s26 + $0x38] sm:$0xff] %v739_v20  }
  0xe2   : > { %v463_v54 = vmul.f32 %v425_v46, %v425_v46  ;;  %v467_v4 = vmul.f32 %v429_v63, %v429_v63 }
  0xe3   : > { %v436_v31 = vadd.f32 %v435_v27, %v421_v23  ;;  %v473_v33 = vadd.f32 %v472_v28, %v458_v26 }
  0xe5   : > { %v437_v38 = vadd.f32 %v436_v31, %v422_v25  ;;  %v474_v39 = vadd.f32 %v473_v33, %v459_v32 }
  0xe7   : > { %v475_v44 = vadd.f32 %v474_v39, %v460_v37  ;;  %v438_v45 = vadd.f32 %v437_v38, %v423_v30 }
  0xe9   : > { %v439_v48 = vadd.f32 %v438_v45, %v424_v40  ;;  %v476_v50 = vadd.f32 %v475_v44, %v461_v43 }
  0xeb   : > { %v477_v52 = vadd.f32 %v476_v50, %v462_v49  ;;  %v440_v53 = vadd.f32 %v439_v48, %v425_v46 }
  0xed   : > { %v441_v42 = vadd.f32 %v440_v53, %v426_v47  ;;  %v478_v58 = vadd.f32 %v477_v52, %v463_v54 }
  0xef   : > { %v479_v61 = vadd.f32 %v478_v58, %v464_v57  ;;  %v442_v62 = vadd.f32 %v441_v42, %v427_v35 }
  0xf1   : > { %v443_v0 = vadd.f32 %v442_v62, %v428_v59  ;;  %v480_v2 = vadd.f32 %v479_v61, %v465_v60 }
  0xf3   : > { %v481_v55 = vadd.f32 %v480_v2, %v466_v1  ;;  %v444_v3 = vadd.f32 %v443_v0, %v429_v63 }
  0xf5   : > { %v445_v5 = vrot.slane %v444_v3, 4  ;;  %v482_v6 = vadd.f32 %v481_v55, %v467_v4 }
  0xf7   : > { %v446_v7 = vadd.f32 %v445_v5, %v444_v3  ;;  %v483_v8 = vrot.slane %v482_v6, 4 }
  0xf9   : > { %v447_v9 = vrot.slane %v446_v7, 2  ;;  %v484_v10 = vadd.f32 %v483_v8, %v482_v6 }
  0xfb   : > { %v448_v11 = vadd.f32 %v447_v9, %v446_v7  ;;  %v485_v12 = vrot.slane %v484_v10, 2 }
  0xfd   : > { %v449_v13 = vrot.slane %v448_v11, 1  ;;  %v486_v14 = vadd.f32 %v485_v12, %v484_v10 }
  0xff   : > { %v450_v15 = vadd.f32 %v449_v13, %v448_v11  ;;  %v487_v16 = vrot.slane %v486_v14, 1 }
 0x101   : > { %451 = vst [vmem:[%s244_s28] sm:$0x1] %v450_v15  ;;  %v488_v17 = vadd.f32 %v487_v16, %v486_v14 }
 0x103   : > { %489 = vst [vmem:[%s244_s28 + $0x1] sm:$0x1] %v488_v17 }
 0x104 PF: > { %s17_s19 = sadd.s32 1, %s941_s19   ;;  %s1161_s12 = smov %s917_s13 }
 0x105   : > { %p14_p3 = scmp.ge.s32.totalorder %s17_s19, 6   ;;  %s1162_s13 = smov %s921_s14 }
 0x106   : > { %s1163_s14 = smov %s1032_s5  ;;  %s1164_s15 = smov %s933_s17 }
 0x107   : > { %s1165_s16 = smov %s937_s18  ;;  %s1166_s17 = smov %s1169_s21 }
 0x108   : > { %s1167_s18 = smov %s1173_s22  ;;  %16 = sbr.rel (!%p14_p3) target bundleno = 5 (0x5), region = 80 }
 0x10d   :  { %544 = vsyncpa [#allocation3], 1 }
 0x10e   :  { %546 = vsyncpa [#allocation3 + $0x1], 1 }

// kernel: bottleneck_forward.6
= control target key start
LH: loop header
LB: loop body
LE: loop exit
PB: predicated region body
PF: predicated region fallthrough
CT: control target
= control target key end

     0   :  { %s1032_s18 = smov 0   ;;  %s1034_s19 = smov 0   ;;  %s1203_s0 = inlined_call_operand.vmem [shape: f32[1,128], index: 0, kind: input, shape index: {}]   ;;  %s1204_s1 = inlined_call_operand.vmem [shape: f32[1,128], index: 1, kind: input, shape index: {}]   ;;  %s1205_s2 = inlined_call_operand.vmem [shape: bf16[2,16,16,128], index: 2, kind: input, shape index: {}]   ;;  %s1206_s3 = inlined_call_operand.vmem [shape: bf16[128,128], index: 3, kind: input, shape index: {}]   ;;  %s1207_s4 = inlined_call_operand.vmem [shape: bf16[2,16,16,128], index: 4, kind: output, shape index: {0}]   ;;  %s1208_s5 = inlined_call_operand.vmem [shape: f32[2,2,2,128], index: 5, kind: output, shape index: {1}]  }
   0x1   :  { %s1036_s20 = smov 0   ;;  %s1038_s21 = smov 0  }
   0x2   :  { %s1040_s22 = smov 0  }
   0x3 LB: > { %s25_s23 = sadd.s32 1, %s992_s20  ;;  %s28_s24 = sadd.s32 1, %s996_s21  ;;  %s1000_s22 = sphi %s1040_s22, %s16_s22   ;;  %s996_s21 = sphi %s1038_s21, %s1212_s21   ;;  %s992_s20 = sphi %s1036_s20, %s1211_s20   ;;  %s988_s19 = sphi %s1034_s19, %s1210_s19   ;;  %s984_s18 = sphi %s1032_s18, %s1209_s18  }
   0x4   : > { %p26_p0 = scmp.ge.s32.totalorder %s25_s23, 2  ;;  %p757_p1 = scmp.ge.s32.totalorder %s1000_s22, 1 }
   0x5   : > { %p214_p2 = scmp.lt.s32.totalorder %s1000_s22, 5 }
   0x6   : > { %s1214_s23 = smov (%p26_p0, %s25_s23), 0  ;;  %s1216_s24 = smov (!%p26_p0, %s28_s24), %s996_s21 }
   0x7   : > { %p215_p3 = pnand %p757_p1, %p214_p2  ;;  %p30_p4 = scmp.ge.s32.totalorder %s1216_s24, 2 }
   0x8   : > { %s758_s27 = sshll.u32 (!%p215_p3), %s984_s18, 3  ;;  %p261_p5 = scmp.lt.s32.totalorder (!%p215_p3), %s988_s19, 1 }
   0x9   : > { %s1218_s24 = smov (%p30_p4, %s1216_s24), 0  ;;  %218 = sbr.rel (%p215_p3) target bundleno = 241 (0xf1), region = 36 }
   0xa   : > { %p263_p6 = scmp.lt.s32.totalorder (!%p215_p3), %s758_s27, 15  ;;  %p284_p7 = scmp.lt.s32.totalorder (!%p215_p3), %s984_s18, 1 }
   0xe   : > { %v809_v0 = vld [vmem:[%s1206_s3 + $0x38] sm:$0xff]  ;;  %v808_v1 = vld [vmem:[%s1206_s3 + $0x30] sm:$0xff]  ;;  %s1220_s19 = smov (!%p261_p5, %s988_s19), 1  ;;  %s1222_s27 = smov (!%p263_p6, %s758_s27), 15  ;;  %v807_v2 = vld [vmem:[%s1206_s3 + $0x28] sm:$0xff] }
   0xf   : > { %450 = vmatpush.bf16.msra.mxu0 %v809_v0  ;;  %896 = vmatpush.bf16.msra.mxu1 %v809_v0  ;;  %s760_s30 = sshll.u32 %s1220_s19, 5  ;;  %s759_s6 = sshll.u32 %s1222_s27, 1  ;;  %v806_v5 = vld [vmem:[%s1206_s3 + $0x20] sm:$0xff]  ;;  %v805_v15 = vld [vmem:[%s1206_s3 + $0x18] sm:$0xff]  ;;  %v804_v25 = vld [vmem:[%s1206_s3 + $0x10] sm:$0xff] }
  0x10   : > { %897 = vmatpush.bf16.msra.mxu2 %v809_v0  ;;  %898 = vmatpush.bf16.msra.mxu3 %v809_v0  ;;  %s1077_s9 = sadd.s32 %s760_s30, %s759_s6  ;;  %v1097_v10 = vld [vmem:[%s1203_s0] ss:$0 sm:$0xff]  ;;  %v803_v34 = vld [vmem:[%s1206_s3 + $0x8] sm:$0xff]  ;;  %s1224_s18 = smov (!%p284_p7, %s984_s18), 1 }
  0x11   : > { %s761_s10 = sshll.u32 %s1077_s9, 2  ;;  %v1107_v20 = vld [vmem:[%s1204_s1] ss:$0 sm:$0xff]  ;;  %s766_s9 = sshll.u32 %s1220_s19, 1 }
  0x12   : > { %s1085_s13 = scalar_lea.vmem %s1205_s2, %s761_s10  ;;  %v802_v44 = vld [vmem:[%s1206_s3] sm:$0xff]  ;;  %s1159_s14 = scalar_lea.vmem %s1207_s4, %s761_s10 }
  0x13   : > { %451 = vmatpush.bf16.msra.mxu0 %v808_v1  ;;  %899 = vmatpush.bf16.msra.mxu1 %v808_v1  ;;  %v811_v3 = vld [vmem:[%s1085_s13] sm:$0xff]   ;;  %v883_v4 = vld [vmem:[%s1085_s13 + $0x10] sm:$0xff]   ;;  %v882_v43 = vld [vmem:[%s1085_s13 + $0x8] sm:$0xff]   ;;  %s287_s10 = sadd.s32 %s766_s9, %s1224_s18 }
  0x14   : > { %900 = vmatpush.bf16.msra.mxu2 %v808_v1  ;;  %901 = vmatpush.bf16.msra.mxu3 %v808_v1  ;;  %v885_v6 = vld [vmem:[%s1085_s13 + $0x20] sm:$0xff]   ;;  %v887_v7 = vld [vmem:[%s1085_s13 + $0x30] sm:$0xff]   ;;  %v812_v8 = vunpack.c.l.bf16 %v811_v3  ;;  %v813_v9 = vunpack.c.h.bf16 %v811_v3  ;;  %v820_v11 = vunpack.c.l.bf16 %v883_v4  ;;  %v821_v12 = vunpack.c.h.bf16 %v883_v4  ;;  %v884_v47 = vld [vmem:[%s1085_s13 + $0x18] sm:$0xff]   ;;  %s767_s15 = sshll.u32 %s287_s10, 1 }
  0x15   : > { %v828_v13 = vunpack.c.l.bf16 %v885_v6  ;;  %v829_v14 = vunpack.c.h.bf16 %v885_v6  ;;  %v836_v16 = vunpack.c.l.bf16 %v887_v7  ;;  %v837_v17 = vunpack.c.h.bf16 %v887_v7  ;;  %v886_v48 = vld [vmem:[%s1085_s13 + $0x28] sm:$0xff]   ;;  %v888_v49 = vld [vmem:[%s1085_s13 + $0x38] sm:$0xff]   ;;  %s289_s25 = scalar_lea.vmem %s1208_s5, %s767_s15 }
  0x16   : > { %v326_v18 = vmul.f32 %v1097_v10, %v812_v8  ;;  %v327_v19 = vmul.f32 %v1097_v10, %v813_v9  ;;  %v330_v21 = vmul.f32 %v1097_v10, %v820_v11  ;;  %v331_v22 = vmul.f32 %v1097_v10, %v821_v12 }
  0x17   : > { %452 = vmatpush.bf16.msra.mxu0 %v807_v2  ;;  %902 = vmatpush.bf16.msra.mxu1 %v807_v2  ;;  %v334_v23 = vmul.f32 %v1097_v10, %v828_v13  ;;  %v335_v24 = vmul.f32 %v1097_v10, %v829_v14  ;;  %v338_v26 = vmul.f32 %v1097_v10, %v836_v16  ;;  %v816_v52 = vunpack.c.l.bf16 %v882_v43 }
  0x18   : > { %903 = vmatpush.bf16.msra.mxu2 %v807_v2  ;;  %904 = vmatpush.bf16.msra.mxu3 %v807_v2  ;;  %v339_v27 = vmul.f32 %v1097_v10, %v837_v17  ;;  %v346_v28 = vadd.f32 %v1107_v20, %v326_v18  ;;  %v347_v29 = vadd.f32 %v1107_v20, %v327_v19  ;;  %v817_v53 = vunpack.c.h.bf16 %v882_v43 }
  0x19   : > { %v350_v30 = vadd.f32 %v1107_v20, %v330_v21  ;;  %v351_v31 = vadd.f32 %v1107_v20, %v331_v22  ;;  %v354_v32 = vadd.f32 %v1107_v20, %v334_v23  ;;  %v355_v33 = vadd.f32 %v1107_v20, %v335_v24 }
  0x1a   : > { %v358_v35 = vadd.f32 %v1107_v20, %v338_v26  ;;  %v359_v36 = vadd.f32 %v1107_v20, %v339_v27  ;;  %v362_v37 = vmax.f32 %v346_v28, 0.0  ;;  %v363_v38 = vmax.f32 %v347_v29, 0.0 }
  0x1b   : > { %453 = vmatpush.bf16.msra.mxu0 %v806_v5  ;;  %905 = vmatpush.bf16.msra.mxu1 %v806_v5  ;;  %v366_v39 = vmax.f32 %v350_v30, 0.0  ;;  %v367_v40 = vmax.f32 %v351_v31, 0.0  ;;  %v370_v41 = vmax.f32 %v354_v32, 0.0  ;;  %v371_v42 = vmax.f32 %v355_v33, 0.0 }
  0x1c   : > { %906 = vmatpush.bf16.msra.mxu2 %v806_v5  ;;  %907 = vmatpush.bf16.msra.mxu3 %v806_v5  ;;  %v374_v45 = vmax.f32 %v358_v35, 0.0  ;;  %v375_v46 = vmax.f32 %v359_v36, 0.0  ;;  %v378_v50 = vpack.c.bf16 %v363_v38, %v362_v37  ;;  %v824_v55 = vunpack.c.l.bf16 %v884_v47 }
  0x1d   : > { %v380_v51 = vpack.c.bf16 %v367_v40, %v366_v39  ;;  %v382_v54 = vpack.c.bf16 %v371_v42, %v370_v41  ;;  %v825_v56 = vunpack.c.h.bf16 %v884_v47  ;;  %v832_v57 = vunpack.c.l.bf16 %v886_v48 }
  0x1e   : > { %v384_v58 = vpack.c.bf16 %v375_v46, %v374_v45  ;;  %v833_v59 = vunpack.c.h.bf16 %v886_v48  ;;  %v840_v60 = vunpack.c.l.bf16 %v888_v49  ;;  %v841_v61 = vunpack.c.h.bf16 %v888_v49 }
  0x1f   : > { %454 = vmatpush.bf16.msra.mxu0 %v805_v15  ;;  %908 = vmatpush.bf16.msra.mxu1 %v805_v15  ;;  %v328_v62 = vmul.f32 %v1097_v10, %v816_v52  ;;  %v329_v63 = vmul.f32 %v1097_v10, %v817_v53  ;;  %v332_v0 = vmul.f32 %v1097_v10, %v824_v55 }
  0x20   : > { %909 = vmatpush.bf16.msra.mxu2 %v805_v15  ;;  %910 = vmatpush.bf16.msra.mxu3 %v805_v15  ;;  %v333_v1 = vmul.f32 %v1097_v10, %v825_v56  ;;  %v336_v2 = vmul.f32 %v1097_v10, %v832_v57  ;;  %v337_v3 = vmul.f32 %v1097_v10, %v833_v59 }
  0x21   : > { %v340_v4 = vmul.f32 %v1097_v10, %v840_v60  ;;  %v341_v5 = vmul.f32 %v1097_v10, %v841_v61  ;;  %v348_v6 = vadd.f32 %v1107_v20, %v328_v62  ;;  %v349_v7 = vadd.f32 %v1107_v20, %v329_v63 }
  0x22   : > { %v352_v8 = vadd.f32 %v1107_v20, %v332_v0  ;;  %v353_v9 = vadd.f32 %v1107_v20, %v333_v1  ;;  %v356_v11 = vadd.f32 %v1107_v20, %v336_v2  ;;  %v357_v12 = vadd.f32 %v1107_v20, %v337_v3 }
  0x23   : > { %455 = vmatpush.bf16.msra.mxu0 %v804_v25  ;;  %911 = vmatpush.bf16.msra.mxu1 %v804_v25  ;;  %v360_v13 = vadd.f32 %v1107_v20, %v340_v4  ;;  %v361_v14 = vadd.f32 %v1107_v20, %v341_v5  ;;  %v364_v15 = vmax.f32 %v348_v6, 0.0  ;;  %v365_v16 = vmax.f32 %v349_v7, 0.0 }
  0x24   : > { %912 = vmatpush.bf16.msra.mxu2 %v804_v25  ;;  %913 = vmatpush.bf16.msra.mxu3 %v804_v25  ;;  %v368_v17 = vmax.f32 %v352_v8, 0.0  ;;  %v369_v10 = vmax.f32 %v353_v9, 0.0  ;;  %v372_v18 = vmax.f32 %v356_v11, 0.0  ;;  %v373_v19 = vmax.f32 %v357_v12, 0.0 }
  0x25   : > { %v376_v21 = vmax.f32 %v360_v13, 0.0  ;;  %v377_v22 = vmax.f32 %v361_v14, 0.0  ;;  %v379_v23 = vpack.c.bf16 %v365_v16, %v364_v15 }
  0x26   : > { %v381_v24 = vpack.c.bf16 %v369_v10, %v368_v17  ;;  %v383_v25 = vpack.c.bf16 %v373_v19, %v372_v18 }
  0x27   : > { %456 = vmatpush.bf16.msra.mxu0 %v803_v34  ;;  %914 = vmatpush.bf16.msra.mxu1 %v803_v34  ;;  %v385_v26 = vpack.c.bf16 %v377_v22, %v376_v21 }
  0x28   : > { %915 = vmatpush.bf16.msra.mxu2 %v803_v34  ;;  %916 = vmatpush.bf16.msra.mxu3 %v803_v34 }
  0x2b   : > { %457 = vmatpush.bf16.msra.mxu0 %v802_v44  ;;  %917 = vmatpush.bf16.msra.mxu1 %v802_v44 }
  0x2c   : > { %918 = vmatpush.bf16.msra.mxu2 %v802_v44  ;;  %919 = vmatpush.bf16.msra.mxu3 %v802_v44 }
  0x2e   : > { %458 = vmatmul.bf16.vlgmr.msra.gmra.mxu0 %v378_v50  ;;  %468 = vmatmul.bf16.vlgmr.msra.gmra.mxu1 %v380_v51 }
  0x2f   : > { %478 = vmatmul.bf16.vlgmr.msra.gmra.mxu2 %v382_v54  ;;  %488 = vmatmul.bf16.vlgmr.msra.gmra.mxu3 %v384_v58 }
  0x3e   : > { %463 = vmatmul.bf16.gmra.mxu0 %v379_v23  ;;  %473 = vmatmul.bf16.gmra.mxu1 %v381_v24 }
  0x3f   : > { %483 = vmatmul.bf16.gmra.mxu2 %v383_v25  ;;  %493 = vmatmul.bf16.gmra.mxu3 %v385_v26 }
  0xab   : > { %v459_v27 = vpop.f32.mrf.mxu0  ;;  %v469_v28 = vpop.f32.mrf.mxu1 }
  0xac   : > { %v499_v37 = vpack.c.bf16 %v459_v27, %v459_v27  ;;  %v503_v46 = vpack.c.bf16 %v469_v28, %v469_v28 }
  0xae   : > { %v531_v44 = vunpack.c.l.bf16 %v499_v37  ;;  %v535_v59 = vunpack.c.l.bf16 %v503_v46 }
  0xb0   : > { %v569_v50 = vmul.f32 %v531_v44, %v531_v44  ;;  %v573_v6 = vmul.f32 %v535_v59, %v535_v59 }
  0xb2   : > { %v479_v20 = vpop.f32.mrf.mxu2  ;;  %v1152_v29 = vpop.f32.mrf.mxu3 }
  0xb3   : > { %v461_v30 = vpop.f32.mrf.mxu0  ;;  %v471_v31 = vpop.f32.mrf.mxu1  ;;  %v507_v5 = vpack.c.bf16 %v479_v20, %v479_v20 }
  0xb4   : > { %v845_v32 = vpack.c.bf16 %v461_v30, %v459_v27  ;;  %v855_v33 = vpack.c.bf16 %v471_v31, %v469_v28  ;;  %v500_v34 = vpack.c.bf16 %v461_v30, %v461_v30  ;;  %v504_v52 = vpack.c.bf16 %v471_v31, %v471_v31 }
  0xb5   : > { %v539_v19 = vunpack.c.l.bf16 %v507_v5  ;;  %v511_v30 = vpack.c.bf16 %v1152_v29, %v1152_v29 }
  0xb6   : > { %846 = vst [vmem:[%s1159_s14] sm:$0xff] %v845_v32   ;;  %v532_v43 = vunpack.c.l.bf16 %v500_v34  ;;  %v536_v0 = vunpack.c.l.bf16 %v504_v52 }
  0xb7   : > { %890 = vst [vmem:[%s1159_s14 + $0x10] sm:$0xff] %v855_v33   ;;  %v577_v31 = vmul.f32 %v539_v19, %v539_v19 }
  0xb8   : > { %v570_v47 = vmul.f32 %v532_v43, %v532_v43  ;;  %v547_v51 = vadd.f32 %v532_v43, %v531_v44  ;;  %v574_v16 = vmul.f32 %v536_v0, %v536_v0 }
  0xba   : > { %v481_v35 = vpop.f32.mrf.mxu2  ;;  %v1163_v36 = vpop.f32.mrf.mxu3  ;;  %v585_v60 = vadd.f32 %v570_v47, %v569_v50 }
  0xbb   : > { %v464_v38 = vpop.f32.mrf.mxu0  ;;  %v474_v39 = vpop.f32.mrf.mxu1  ;;  %v865_v40 = vpack.c.bf16 %v481_v35, %v479_v20  ;;  %v875_v41 = vpack.c.bf16 %v1163_v36, %v1152_v29  ;;  %v508_v13 = vpack.c.bf16 %v481_v35, %v481_v35  ;;  %v512_v35 = vpack.c.bf16 %v1163_v36, %v1163_v36 }
  0xbc   : > { %v501_v42 = vpack.c.bf16 %v464_v38, %v464_v38  ;;  %v505_v62 = vpack.c.bf16 %v474_v39, %v474_v39 }
  0xbd   : > { %892 = vst [vmem:[%s1159_s14 + $0x20] sm:$0xff] %v865_v40   ;;  %v540_v25 = vunpack.c.l.bf16 %v508_v13  ;;  %v544_v29 = vunpack.c.l.bf16 %v512_v35 }
  0xbe   : > { %894 = vst [vmem:[%s1159_s14 + $0x30] sm:$0xff] %v875_v41   ;;  %v533_v45 = vunpack.c.l.bf16 %v501_v42  ;;  %v537_v7 = vunpack.c.l.bf16 %v505_v62  ;;  %v543_v41 = vunpack.c.l.bf16 %v511_v30 }
  0xbf   : > { %v578_v37 = vmul.f32 %v540_v25, %v540_v25 }
  0xc0   : > { %v571_v55 = vmul.f32 %v533_v45, %v533_v45  ;;  %v548_v61 = vadd.f32 %v547_v51, %v533_v45  ;;  %v575_v21 = vmul.f32 %v537_v7, %v537_v7  ;;  %v581_v51 = vmul.f32 %v543_v41, %v543_v41 }
  0xc2   : > { %v484_v48 = vpop.f32.mrf.mxu2  ;;  %v1169_v49 = vpop.f32.mrf.mxu3  ;;  %v586_v1 = vadd.f32 %v585_v60, %v571_v55 }
  0xc3   : > { %v466_v53 = vpop.f32.mrf.mxu0  ;;  %v476_v54 = vpop.f32.mrf.mxu1  ;;  %v509_v24 = vpack.c.bf16 %v484_v48, %v484_v48  ;;  %v513_v45 = vpack.c.bf16 %v1169_v49, %v1169_v49 }
  0xc4   : > { %v502_v56 = vpack.c.bf16 %v466_v53, %v466_v53  ;;  %v850_v57 = vpack.c.bf16 %v466_v53, %v464_v38  ;;  %v860_v58 = vpack.c.bf16 %v476_v54, %v474_v39  ;;  %v506_v4 = vpack.c.bf16 %v476_v54, %v476_v54 }
  0xc5   : > { %v541_v34 = vunpack.c.l.bf16 %v509_v24  ;;  %v545_v53 = vunpack.c.l.bf16 %v513_v45  ;;  %v582_v54 = vmul.f32 %v544_v29, %v544_v29 }
  0xc6   : > { %889 = vst [vmem:[%s1159_s14 + $0x8] sm:$0xff] %v850_v57   ;;  %v534_v63 = vunpack.c.l.bf16 %v502_v56  ;;  %v538_v10 = vunpack.c.l.bf16 %v506_v4 }
  0xc7   : > { %891 = vst [vmem:[%s1159_s14 + $0x18] sm:$0xff] %v860_v58   ;;  %v579_v43 = vmul.f32 %v541_v34, %v541_v34 }
  0xc8   : > { %v549_v2 = vadd.f32 %v548_v61, %v534_v63  ;;  %v572_v3 = vmul.f32 %v534_v63, %v534_v63  ;;  %v576_v27 = vmul.f32 %v538_v10, %v538_v10 }
  0xca   : > { %v550_v8 = vadd.f32 %v549_v2, %v535_v59  ;;  %v587_v9 = vadd.f32 %v586_v1, %v572_v3  ;;  %v486_v11 = vpop.f32.mrf.mxu2  ;;  %v496_v12 = vpop.f32.mrf.mxu3  ;;  %v583_v59 = vmul.f32 %v545_v53, %v545_v53 }
  0xcb   : > { %v870_v14 = vpack.c.bf16 %v486_v11, %v484_v48  ;;  %v880_v15 = vpack.c.bf16 %v496_v12, %v1169_v49  ;;  %v510_v20 = vpack.c.bf16 %v486_v11, %v486_v11  ;;  %v514_v50 = vpack.c.bf16 %v496_v12, %v496_v12 }
  0xcc   : > { %v588_v17 = vadd.f32 %v587_v9, %v573_v6  ;;  %v551_v18 = vadd.f32 %v550_v8, %v536_v0 }
  0xcd   : > { %893 = vst [vmem:[%s1159_s14 + $0x28] sm:$0xff] %v870_v14   ;;  %v542_v40 = vunpack.c.l.bf16 %v510_v20  ;;  %v546_v57 = vunpack.c.l.bf16 %v514_v50 }
  0xce   : > { %v552_v22 = vadd.f32 %v551_v18, %v537_v7  ;;  %v589_v23 = vadd.f32 %v588_v17, %v574_v16  ;;  %895 = vst [vmem:[%s1159_s14 + $0x38] sm:$0xff] %v880_v15  }
  0xcf   : > { %v580_v48 = vmul.f32 %v542_v40, %v542_v40  ;;  %v584_v62 = vmul.f32 %v546_v57, %v546_v57 }
  0xd0   : > { %v553_v26 = vadd.f32 %v552_v22, %v538_v10  ;;  %v590_v28 = vadd.f32 %v589_v23, %v575_v21 }
  0xd2   : > { %v554_v32 = vadd.f32 %v553_v26, %v539_v19  ;;  %v591_v33 = vadd.f32 %v590_v28, %v576_v27 }
  0xd4   : > { %v592_v38 = vadd.f32 %v591_v33, %v577_v31  ;;  %v555_v39 = vadd.f32 %v554_v32, %v540_v25 }
  0xd6   : > { %v556_v42 = vadd.f32 %v555_v39, %v541_v34  ;;  %v593_v44 = vadd.f32 %v592_v38, %v578_v37 }
  0xd8   : > { %v594_v46 = vadd.f32 %v593_v44, %v579_v43  ;;  %v557_v47 = vadd.f32 %v556_v42, %v542_v40 }
  0xda   : > { %v558_v36 = vadd.f32 %v557_v47, %v543_v41  ;;  %v595_v52 = vadd.f32 %v594_v46, %v580_v48 }
  0xdc   : > { %v596_v55 = vadd.f32 %v595_v52, %v581_v51  ;;  %v559_v56 = vadd.f32 %v558_v36, %v544_v29 }
  0xde   : > { %v560_v58 = vadd.f32 %v559_v56, %v545_v53  ;;  %v597_v60 = vadd.f32 %v596_v55, %v582_v54 }
  0xe0   : > { %v598_v49 = vadd.f32 %v597_v60, %v583_v59  ;;  %v561_v61 = vadd.f32 %v560_v58, %v546_v57 }
  0xe2   : > { %v562_v63 = vrot.slane %v561_v61, 4  ;;  %v599_v0 = vadd.f32 %v598_v49, %v584_v62 }
  0xe4   : > { %v563_v1 = vadd.f32 %v562_v63, %v561_v61  ;;  %v600_v2 = vrot.slane %v599_v0, 4 }
  0xe6   : > { %v564_v3 = vrot.slane %v563_v1, 2  ;;  %v601_v4 = vadd.f32 %v600_v2, %v599_v0 }
  0xe8   : > { %v565_v5 = vadd.f32 %v564_v3, %v563_v1  ;;  %v602_v6 = vrot.slane %v601_v4, 2 }
  0xea   : > { %v566_v7 = vrot.slane %v565_v5, 1  ;;  %v603_v8 = vadd.f32 %v602_v6, %v601_v4 }
  0xec   : > { %v567_v9 = vadd.f32 %v566_v7, %v565_v5  ;;  %v604_v11 = vrot.slane %v603_v8, 1 }
  0xee   : > { %568 = vst [vmem:[%s289_s25] sm:$0x1] %v567_v9  ;;  %v605_v12 = vadd.f32 %v604_v11, %v603_v8 }
  0xf0   : > { %606 = vst [vmem:[%s289_s25 + $0x1] sm:$0x1] %v605_v12 }
  0xf1 PF: > { %s16_s22 = sadd.s32 1, %s1000_s22   ;;  %s1209_s18 = smov %s992_s20 }
  0xf2   : > { %p13_p8 = scmp.ge.s32.totalorder %s16_s22, 6   ;;  %s1210_s19 = smov %s996_s21 }
  0xf3   : > { %s1211_s20 = smov %s1214_s23  ;;  %s1212_s21 = smov %s1218_s24 }
  0xf4   :  { %15 = sbr.rel (!%p13_p8) target bundleno = 3 (0x3), region = 78 }

// kernel: bottleneck_forward.7
= control target key start
LH: loop header
LB: loop body
LE: loop exit
PB: predicated region body
PF: predicated region fallthrough
CT: control target
= control target key end

     0   :  { %9 = vsyncpa [#allocation3], 0  ;;  %s1012_s0 = inlined_call_operand.vmem [shape: f32[1,128], index: 0, kind: input, shape index: {}]   ;;  %s1013_s1 = inlined_call_operand.vmem [shape: f32[1,128], index: 1, kind: input, shape index: {}]   ;;  %s1014_s2 = inlined_call_operand.vmem [shape: bf16[2,16,16,128], index: 2, kind: input, shape index: {}]   ;;  %s1015_s3 = inlined_call_operand.vmem [shape: f32[2,16,16,128], index: 3, kind: input, shape index: {}]   ;;  %s1016_s4 = inlined_call_operand.hbm [shape: f32[2,16,16,128], index: 4, kind: output, shape index: {}]  }
   0x1   :  { %11 = vsyncpa [#allocation3 + $0x1], 0  ;;  %s789_s15 = smov 0   ;;  %s791_s16 = smov 0  }
   0x2   :  { %s793_s17 = smov 0   ;;  %s795_s18 = smov 0  }
   0x3   :  { %s797_s19 = smov 0   ;;  %s799_s20 = smov 0  }
   0x4   :  { %s801_s21 = smov 0   ;;  %s803_s22 = smov 0  }
   0x5 LB: > { %s530_s23 = sadd.s32 4294967295, %s760_s22   ;;  %s531_s24 = sadd.s32 4294967294, %s760_s22   ;;  %s760_s22 = sphi %s803_s22, %s17_s22   ;;  %s756_s21 = sphi %s801_s21, %s1025_s21   ;;  %s752_s20 = sphi %s799_s20, %s1024_s20   ;;  %s748_s19 = sphi %s797_s19, %s1023_s19   ;;  %s744_s18 = sphi %s795_s18, %s1022_s18   ;;  %s740_s17 = sphi %s793_s17, %s1021_s17   ;;  %s736_s16 = sphi %s791_s16, %s1020_s16   ;;  %s732_s15 = sphi %s789_s15, %s1019_s15  }
   0x6   : > { %s26_s25 = sadd.s32 1, %s752_s20  ;;  %s29_s26 = sadd.s32 1, %s756_s21 }
   0x7   : > { %p27_p0 = scmp.ge.s32.totalorder %s26_s25, 2  ;;  %p146_p1 = scmp.ne.s32.totalorder %s740_s17, %s736_s16 }
   0x8   : > { %p147_p2 = scmp.eq.s32.totalorder %s530_s23, 3  ;;  %p152_p5 = scmp.ne.s32.totalorder %s736_s16, %s732_s15 }
   0x9   : > { %s1027_s25 = smov (%p27_p0, %s26_s25), 0  ;;  %s1029_s26 = smov (!%p27_p0, %s29_s26), %s756_s21 }
   0xa   : > { %s132_s27 = ssub.s32 %s752_s20, %s1027_s25  ;;  %p840_p3 = por %p147_p2, %p146_p1 }
   0xb   : > { %p31_p4 = scmp.ge.s32.totalorder %s1029_s26, 2  ;;  %p153_p6 = scmp.eq.s32.totalorder %s531_s24, 3 }
   0xc   : > { %p534_p7 = scmp.ge.s32.totalorder %s760_s22, 1  ;;  %p205_p9 = scmp.lt.s32.totalorder %s760_s22, 5 }
   0xd   : > { %s1031_s26 = smov (%p31_p4, %s1029_s26), 0  ;;  %p849_p8 = por %p153_p6, %p152_p5 }
   0xe   : > { %s131_s30 = ssub.s32 %s756_s21, %s1031_s26  ;;  %s136_s5 = sadd.s32 1, %s740_s17 }
   0xf   : > { %s133_s6 = sor.u32 %s132_s27, %s131_s30  ;;  %p206_p10 = pnand %p534_p7, %p205_p9 }
  0x10   : > { %p134_p11 = scmp.eq.s32.totalorder %s133_s6, 0  ;;  %s536_s8 = sshll.u32 (!%p206_p10), %s744_s18, 3 }
  0x11   : > { %209 = sbr.rel (%p206_p10) target bundleno = 59 (0x3b), region = 36  ;;  %p247_p12 = scmp.lt.s32.totalorder (!%p206_p10), %s748_s19, 1 }
  0x12   : > { %s858_s7 = scalar_select %p134_p11, %s740_s17, %s136_s5  }
  0x13   : > { %p249_p13 = scmp.lt.s32.totalorder (!%p206_p10), %s536_s8, 15  ;;  %s551_s23 = sshll.u32 (!%p206_p10), %s744_s18, 4 }
  0x14   : > { %s547_s24 = sshll.u32 (!%p206_p10), %s748_s19, 5 }
  0x15   : > { %s935_s18 = sadd.s32 (!%p206_p10), %s551_s23, %s547_s24  ;;  %s686_s24 = scalar_lea.hbm (!%p206_p10), %s1016_s4, 512 }
  0x16   : > { %s248_s9 = scalar_select %p247_p12, %s748_s19, 1  ;;  %v871_v0 = vld [vmem:[%s1012_s0] ss:$0 sm:$0xff] }
  0x17   : > { %s1033_s8 = smov (!%p249_p13, %s536_s8), 15  ;;  %v882_v3 = vld [vmem:[%s1013_s1] ss:$0 sm:$0xff]  ;;  %s548_s19 = sshll.u32 %s935_s18, 3 }
  0x18   : > { %s538_s10 = sshll.u32 %s248_s9, 5  ;;  %s537_s11 = sshll.u32 %s1033_s8, 1 }
  0x19   : > { %s253_s12 = sadd.s32 %s538_s10, %s537_s11  ;;  %s420_s5 = scalar_lea.hbm %s1016_s4, %s548_s19 }
  0x1a   : > { %s539_s13 = sshll.u32 %s253_s12, 2  ;;  %s543_s14 = sshll.u32 %s253_s12, 3 }
  0x1b   : > { %s866_s27 = scalar_lea.vmem %s1014_s2, %s539_s13  ;;  %s877_s9 = scalar_lea.vmem %s1015_s3, %s543_s14 }
  0x1c   : > { %v553_v1 = vld [vmem:[%s866_s27] sm:$0xff]   ;;  %v584_v5 = vld [vmem:[%s866_s27 + $0x8] sm:$0xff]   ;;  %s243_s12 = sand.u32 1, %s736_s16   ;;  %v585_v8 = vld [vmem:[%s866_s27 + $0x10] sm:$0xff]   ;;  %s423_s8 = sshll.u32 %s420_s5, 4  ;;  %s424_s8 = int_to_ptr.hbm [resolvable:$true] %s423_s8 }
  0x1d   : > { %v554_v2 = vunpack.c.l.bf16 %v553_v1  ;;  %v555_v4 = vunpack.c.h.bf16 %v553_v1  ;;  %v558_v6 = vunpack.c.l.bf16 %v584_v5  ;;  %v559_v7 = vunpack.c.h.bf16 %v584_v5  ;;  %v586_v13 = vld [vmem:[%s866_s27 + $0x18] sm:$0xff]   ;;  %v301_v14 = vld [vmem:[%s877_s9] sm:$0xff]  ;;  %v302_v15 = vld [vmem:[%s877_s9 + $0x8] sm:$0xff]  ;;  %s896_s13 = sshll.u32 %s243_s12, 7  ;;  %s680_s10 = sshra.s32 %s424_s8, 4  ;;  %s681_s10 = int_to_ptr.hbm [resolvable:$true] %s680_s10 }
  0x1e   : > { %v562_v11 = vunpack.c.l.bf16 %v585_v8  ;;  %v563_v12 = vunpack.c.h.bf16 %v585_v8  ;;  %v566_v18 = vunpack.c.l.bf16 %v586_v13  ;;  %v567_v19 = vunpack.c.h.bf16 %v586_v13  ;;  %v303_v22 = vld [vmem:[%s877_s9 + $0x10] sm:$0xff]  ;;  %v304_v23 = vld [vmem:[%s877_s9 + $0x18] sm:$0xff]  ;;  %v305_v28 = vld [vmem:[%s877_s9 + $0x20] sm:$0xff]  ;;  %s920_s14 = scalar_lea.vmem [#allocation2], %s896_s13  ;;  %s682_s11 = scalar_lea.hbm %s681_s10, 128 }
  0x1f   : > { %v321_v9 = vmul.f32 %v871_v0, %v554_v2  ;;  %v322_v10 = vmul.f32 %v871_v0, %v555_v4  ;;  %v323_v16 = vmul.f32 %v871_v0, %v558_v6  ;;  %v324_v17 = vmul.f32 %v871_v0, %v559_v7  ;;  %v306_v29 = vld [vmem:[%s877_s9 + $0x28] sm:$0xff]  ;;  %v307_v36 = vld [vmem:[%s877_s9 + $0x30] sm:$0xff]  ;;  %v308_v37 = vld [vmem:[%s877_s9 + $0x38] sm:$0xff]  ;;  %s421_s6 = sshll.u32 %s920_s14, 4  ;;  %p683_p0 = scmp.ne.s32.totalorder %s681_s10, %s682_s11  ;;  %s422_s6 = int_to_ptr.vmem [resolvable:$true] %s421_s6 }
  0x20   : > { %v325_v24 = vmul.f32 %v871_v0, %v562_v11  ;;  %v326_v25 = vmul.f32 %v871_v0, %v563_v12  ;;  %v327_v30 = vmul.f32 %v871_v0, %v566_v18  ;;  %v328_v31 = vmul.f32 %v871_v0, %v567_v19  ;;  %v587_v42 = vld [vmem:[%s866_s27 + $0x20] sm:$0xff]   ;;  %v588_v47 = vld [vmem:[%s866_s27 + $0x28] sm:$0xff]   ;;  %v589_v52 = vld [vmem:[%s866_s27 + $0x30] sm:$0xff]   ;;  %p687_p4 = scmp.lt.s32.totalorder %s681_s10, %s1016_s4  ;;  %p688_p5 = scmp.lt.s32.totalorder %s686_s24, %s682_s11 }
  0x21   : > { %v341_v20 = vadd.f32 %v882_v3, %v321_v9  ;;  %v342_v21 = vadd.f32 %v882_v3, %v322_v10  ;;  %v343_v26 = vadd.f32 %v882_v3, %v323_v16  ;;  %v344_v27 = vadd.f32 %v882_v3, %v324_v17  ;;  %v590_v57 = vld [vmem:[%s866_s27 + $0x38] sm:$0xff]   ;;  %v309_v4 = vld [vmem:[%s877_s9 + $0x40] sm:$0xff]  ;;  %v310_v5 = vld [vmem:[%s877_s9 + $0x48] sm:$0xff]  ;;  %p684_p1 = pnand %p683_p0, %p840_p3 }
  0x22   : > { %v345_v34 = vadd.f32 %v882_v3, %v325_v24  ;;  %v346_v35 = vadd.f32 %v882_v3, %v326_v25  ;;  %v347_v40 = vadd.f32 %v882_v3, %v327_v30  ;;  %v348_v41 = vadd.f32 %v882_v3, %v328_v31  ;;  %v311_v12 = vld [vmem:[%s877_s9 + $0x50] sm:$0xff]  ;;  %v312_v13 = vld [vmem:[%s877_s9 + $0x58] sm:$0xff]  ;;  %v313_v18 = vld [vmem:[%s877_s9 + $0x60] sm:$0xff]  ;;  %p689_p6 = por %p688_p5, %p687_p4 }
  0x23   : > { %v357_v32 = vadd.f32 %v341_v20, %v301_v14  ;;  %v358_v33 = vadd.f32 %v342_v21, %v302_v15  ;;  %v359_v38 = vadd.f32 %v343_v26, %v303_v22  ;;  %v360_v39 = vadd.f32 %v344_v27, %v304_v23  ;;  %v314_v19 = vld [vmem:[%s877_s9 + $0x68] sm:$0xff]  ;;  %v315_v26 = vld [vmem:[%s877_s9 + $0x70] sm:$0xff]  ;;  %v316_v27 = vld [vmem:[%s877_s9 + $0x78] sm:$0xff]  ;;  %s406_s9 = scalar_lea.sflag [#allocation3], %s243_s12  ;;  %p685_p2 = pneg %p684_p1 }
  0x24   : > { %v361_v45 = vadd.f32 %v345_v34, %v305_v28  ;;  %v362_v46 = vadd.f32 %v346_v35, %v306_v29  ;;  %v363_v50 = vadd.f32 %v347_v40, %v307_v36  ;;  %v364_v51 = vadd.f32 %v348_v41, %v308_v37 }
  0x25   : > { %v373_v43 = vmax.f32 %v357_v32, 0.0  ;;  %v374_v44 = vmax.f32 %v358_v33, 0.0  ;;  %v375_v48 = vmax.f32 %v359_v38, 0.0  ;;  %v376_v49 = vmax.f32 %v360_v39, 0.0  ;;  %p690_p7 = pnand %p689_p6, %p685_p2 }
  0x26   : > { %v377_v53 = vmax.f32 %v361_v45, 0.0  ;;  %v378_v54 = vmax.f32 %v362_v46, 0.0  ;;  %v570_v55 = vunpack.c.l.bf16 %v587_v42  ;;  %v571_v56 = vunpack.c.h.bf16 %v587_v42 }
  0x27   : > { %389 = vst [vmem:[%s920_s14] sm:$0xff] %v373_v43  ;;  %v379_v58 = vmax.f32 %v363_v50, 0.0  ;;  %v380_v59 = vmax.f32 %v364_v51, 0.0  ;;  %v574_v60 = vunpack.c.l.bf16 %v588_v47  ;;  %v575_v61 = vunpack.c.h.bf16 %v588_v47 }
  0x28   : > { %390 = vst [vmem:[%s920_s14 + $0x8] sm:$0xff] %v374_v44  ;;  %v329_v62 = vmul.f32 %v871_v0, %v570_v55  ;;  %v330_v63 = vmul.f32 %v871_v0, %v571_v56  ;;  %v578_v1 = vunpack.c.l.bf16 %v589_v52  ;;  %v579_v2 = vunpack.c.h.bf16 %v589_v52 }
  0x29   : > { %391 = vst [vmem:[%s920_s14 + $0x10] sm:$0xff] %v375_v48  ;;  %v331_v6 = vmul.f32 %v871_v0, %v574_v60  ;;  %v332_v7 = vmul.f32 %v871_v0, %v575_v61  ;;  %v582_v8 = vunpack.c.l.bf16 %v590_v57  ;;  %v583_v9 = vunpack.c.h.bf16 %v590_v57 }
  0x2a   : > { %392 = vst [vmem:[%s920_s14 + $0x18] sm:$0xff] %v376_v49  ;;  %v349_v10 = vadd.f32 %v882_v3, %v329_v62  ;;  %v350_v11 = vadd.f32 %v882_v3, %v330_v63  ;;  %v333_v14 = vmul.f32 %v871_v0, %v578_v1  ;;  %v334_v15 = vmul.f32 %v871_v0, %v579_v2 }
  0x2b   : > { %393 = vst [vmem:[%s920_s14 + $0x20] sm:$0xff] %v377_v53  ;;  %v351_v16 = vadd.f32 %v882_v3, %v331_v6  ;;  %v352_v17 = vadd.f32 %v882_v3, %v332_v7  ;;  %v335_v20 = vmul.f32 %v871_v0, %v582_v8  ;;  %v336_v21 = vmul.f32 %v871_v0, %v583_v9 }
  0x2c   : > { %394 = vst [vmem:[%s920_s14 + $0x28] sm:$0xff] %v378_v54  ;;  %v365_v22 = vadd.f32 %v349_v10, %v309_v4  ;;  %v366_v23 = vadd.f32 %v350_v11, %v310_v5  ;;  %v353_v24 = vadd.f32 %v882_v3, %v333_v14  ;;  %v354_v25 = vadd.f32 %v882_v3, %v334_v15 }
  0x2d   : > { %395 = vst [vmem:[%s920_s14 + $0x30] sm:$0xff] %v379_v58  ;;  %v367_v28 = vadd.f32 %v351_v16, %v311_v12  ;;  %v368_v29 = vadd.f32 %v352_v17, %v312_v13  ;;  %v355_v30 = vadd.f32 %v882_v3, %v335_v20  ;;  %v356_v0 = vadd.f32 %v882_v3, %v336_v21 }
  0x2e   : > { %396 = vst [vmem:[%s920_s14 + $0x38] sm:$0xff] %v380_v59  ;;  %v381_v31 = vmax.f32 %v365_v22, 0.0  ;;  %v382_v32 = vmax.f32 %v366_v23, 0.0  ;;  %v369_v33 = vadd.f32 %v353_v24, %v313_v18  ;;  %v370_v34 = vadd.f32 %v354_v25, %v314_v19 }
  0x2f   : > { %v383_v35 = vmax.f32 %v367_v28, 0.0  ;;  %v384_v36 = vmax.f32 %v368_v29, 0.0  ;;  %v371_v37 = vadd.f32 %v355_v30, %v315_v26  ;;  %v372_v38 = vadd.f32 %v356_v0, %v316_v27 }
  0x30   : > { %397 = vst [vmem:[%s920_s14 + $0x40] sm:$0xff] %v381_v31  ;;  %v385_v3 = vmax.f32 %v369_v33, 0.0  ;;  %v386_v39 = vmax.f32 %v370_v34, 0.0 }
  0x31   : > { %398 = vst [vmem:[%s920_s14 + $0x48] sm:$0xff] %v382_v32  ;;  %v387_v40 = vmax.f32 %v371_v37, 0.0  ;;  %v388_v41 = vmax.f32 %v372_v38, 0.0 }
  0x32   : > { %399 = vst [vmem:[%s920_s14 + $0x50] sm:$0xff] %v383_v35 }
  0x33   : > { %400 = vst [vmem:[%s920_s14 + $0x58] sm:$0xff] %v384_v36 }
  0x34   : > { %401 = vst [vmem:[%s920_s14 + $0x60] sm:$0xff] %v385_v3 }
  0x35   : > { %402 = vst [vmem:[%s920_s14 + $0x68] sm:$0xff] %v386_v39 }
  0x36   : > { %403 = vst [vmem:[%s920_s14 + $0x70] sm:$0xff] %v387_v40 }
  0x37   : > { %404 = vst [vmem:[%s920_s14 + $0x78] sm:$0xff] %v388_v41 }
  0x38   : > { %693 = shalt.err (!%p690_p7)
}
  0x39   : > { %s762_s12 = smov 128   ;;  %s763_s14 = smov 8  }
  0x3a   : > { %591 = dma.vmem_to_hbm [thread:$0]  (%p840_p3), %s422_s6, 2048, %s424_s8, %s406_s9, %s762_s12, %s762_s12, %s763_s14  }
  0x3b PF: > { %p597_p9 = scmp.ge.s32.totalorder %s760_s22, 2  ;;  %s438_s27 = sand.u32 1, %s732_s15  }
  0x3c   : > { %s439_s30 = scalar_lea.sflag [#allocation3], %s438_s27 }
  0x3d   : > { %p594_p10 = pnand %p597_p9, %p849_p8 }
  0x3f   : > { %p595_p11 = pneg %p594_p10 }
  0x41   : > { %727 = dma.done.wait (%p595_p11), %s439_s30, 2048  }
  0x42   : > { %729 = vsyncadd (%p595_p11), %s439_s30, 4294965248  ;;  %s17_s22 = sadd.s32 1, %s760_s22   ;;  %s1019_s15 = smov %s736_s16 }
  0x43   : > { %p14_p12 = scmp.ge.s32.totalorder %s17_s22, 6   ;;  %s1020_s16 = smov %s740_s17 }
  0x44   : > { %s1021_s17 = smov %s858_s7  ;;  %s1022_s18 = smov %s752_s20 }
  0x45   : > { %s1023_s19 = smov %s756_s21  ;;  %s1024_s20 = smov %s1027_s25 }
  0x46   : > { %s1025_s21 = smov %s1031_s26  ;;  %16 = sbr.rel (!%p14_p12) target bundleno = 5 (0x5), region = 74 }
  0x4b   :  { %445 = vsyncpa [#allocation3], 1 }
  0x4c   :  { %447 = vsyncpa [#allocation3 + $0x1], 1 }

// kernel: bottleneck_forward.5
= control target key start
LH: loop header
LB: loop body
LE: loop exit
PB: predicated region body
PF: predicated region fallthrough
CT: control target
= control target key end

     0   :  { %s4583_s24 = smov 0   ;;  %s4585_s25 = smov 0   ;;  %s5749_s0 = inlined_call_operand.vmem [shape: f32[1,128], index: 0, kind: input, shape index: {}]   ;;  %s5750_s1 = inlined_call_operand.vmem [shape: f32[1,128], index: 1, kind: input, shape index: {}]   ;;  %s5751_s2 = inlined_call_operand.vmem [shape: bf16[2,16,16,128], index: 2, kind: input, shape index: {}, may-alias: {2,3,4}]   ;;  %s5752_s3 = inlined_call_operand.vmem [shape: bf16[2,16,16,128], index: 3, kind: input, shape index: {}, may-alias: {2,3,4}]   ;;  %s5753_s4 = inlined_call_operand.vmem [shape: bf16[2,16,16,128], index: 4, kind: input, shape index: {}, may-alias: {2,3,4}]   ;;  %s5754_s5 = inlined_call_operand.vmem [shape: bf16[9,128,128], index: 5, kind: input, shape index: {}]   ;;  %s5755_s6 = inlined_call_operand.vmem [shape: bf16[2,16,16,128], index: 6, kind: output, shape index: {0}]   ;;  %s5756_s7 = inlined_call_operand.vmem [shape: f32[2,2,2,128], index: 7, kind: output, shape index: {1}]  }
   0x1   :  { %s4587_s26 = smov 0   ;;  %s4589_s27 = smov 0  }
   0x2   :  { %s4591_s28 = smov 0  }
   0x3 LB: > { %s27_s29 = sadd.s32 1, %s4533_s26  ;;  %s30_s30 = sadd.s32 1, %s4537_s27  ;;  %s4541_s28 = sphi %s4591_s28, %s18_s28   ;;  %s4537_s27 = sphi %s4589_s27, %s5777_s27   ;;  %s4533_s26 = sphi %s4587_s26, %s5776_s26   ;;  %s4529_s25 = sphi %s4585_s25, %s5775_s25   ;;  %s4525_s24 = sphi %s4583_s24, %s5774_s24  }
   0x4   : > { %p28_p0 = scmp.ge.s32.totalorder %s27_s29, 2  ;;  %p3672_p1 = scmp.ge.s32.totalorder %s4541_s28, 1 }
   0x5   : > { %p328_p2 = scmp.lt.s32.totalorder %s4541_s28, 5 }
   0x6   : > { %s5779_s29 = smov (%p28_p0, %s27_s29), 0  ;;  %s5781_s30 = smov (!%p28_p0, %s30_s30), %s4537_s27 }
   0x7   : > { %p329_p3 = pnand %p3672_p1, %p328_p2  ;;  %p32_p4 = scmp.ge.s32.totalorder %s5781_s30, 2 }
   0x8   : > { %s4619_s10 = sshll.u32 (!%p329_p3), %s4525_s24, 3  ;;  %p405_p5 = scmp.lt.s32.totalorder (!%p329_p3), %s4529_s25, 1 }
   0x9   : > { %s5783_s30 = smov (%p32_p4, %s5781_s30), 0  ;;  %332 = sbr.rel (%p329_p3) target bundleno = 541 (0x21d), region = 44 }
   0xa   : > { %p407_p6 = scmp.lt.s32.totalorder (!%p329_p3), %s4619_s10, 15  ;;  %s4638_s15 = sadd.s32 (!%p329_p3), 4294967295, %s4619_s10 }
   0xb   : > { %p417_p7 = scmp.gt.s32.totalorder (!%p329_p3), %s4638_s15, 0  ;;  %p3679_p8 = scmp.lt.s32.totalorder (!%p329_p3), %s4638_s15, 15 }
   0xc   : > { %p597_p9 = scmp.eq.s32.totalorder (!%p329_p3), %s4525_s24, 0  ;;  %s433_s22 = sadd.s32 (!%p329_p3), 8, %s4619_s10 }
   0xd   : > { %p5463_p10 = scmp.lt.s32.totalorder (!%p329_p3), %s433_s22, 15  ;;  %p603_p11 = scmp.eq.s32.totalorder (!%p329_p3), %s4525_s24, 1 }
   0xe   : > { %v4263_v0 = vld [vmem:[%s5754_s5 + $0x78] sm:$0xff]  ;;  %vm609_vm0 = vcmask 1040384   ;;  %vm610_vm1 = vsmask.f32 256  ;;  %v4262_v1 = vld [vmem:[%s5754_s5 + $0x70] sm:$0xff]  ;;  %s5785_s25 = smov (!%p405_p5, %s4529_s25), 1 }
   0xf   : > { %4430 = vmatpush.bf16.msra.mxu1 %v4263_v0  ;;  %4431 = vmatpush.bf16.msra.mxu2 %v4263_v0  ;;  %s408_s13 = scalar_select %p407_p6, %s4619_s10, 15  ;;  %vm4630_vm2 = vmand %vm609_vm0, %vm610_vm1  ;;  %v618_v3 = vld [vmem:[#allocation2 + $0x18] sm:$0x1]  ;;  %vm642_vm3 = vsmask.f32 7938  ;;  %v4261_v6 = vld [vmem:[%s5754_s5 + $0x68] sm:$0xff] }
  0x10   : > { %4432 = vmatpush.bf16.msra.mxu3 %v4263_v0  ;;  %1282 = vmatpush.bf16.msra.mxu0 %v4263_v0  ;;  %s4635_s14 = sshll.u32 %s5785_s25, 5  ;;  %v619_v4 = vsel %vm4630_vm2, 0, %v618_v3  ;;  %v650_v5 = vld [vmem:[#allocation2 + $0x20] sm:$0x1]  ;;  %vm4650_vm4 = vmand %vm609_vm0, %vm642_vm3  ;;  %v624_v10 = vld [vmem:[#allocation2 + $0x30] sm:$0x1] }
  0x11   : > { %s3674_s16 = sshll.u32 %s408_s13, 1  ;;  %620 = vst [vmem:[#allocation2 + $0x18] sm:$0x1] %v619_v4  ;;  %v4658_v8 = vld [vmem:[%s5749_s0] ss:$0 sm:$0xff]  ;;  %v651_v9 = vsel %vm4650_vm4, 0, %v650_v5 }
  0x12   : > { %s4646_s19 = sadd.s32 %s4635_s14, %s3674_s16  ;;  %v4260_v11 = vld [vmem:[%s5754_s5 + $0x60] sm:$0xff]  ;;  %652 = vst [vmem:[#allocation2 + $0x20] sm:$0x1] %v651_v9  ;;  %v625_v13 = vsel %vm4630_vm2, 0, %v624_v10  ;;  %v656_v14 = vld [vmem:[#allocation2 + $0x38] sm:$0x1] }
  0x13   : > { %4433 = vmatpush.bf16.msra.mxu1 %v4262_v1  ;;  %4434 = vmatpush.bf16.msra.mxu2 %v4262_v1  ;;  %s3676_s20 = sshll.u32 %s4646_s19, 2  ;;  %v4675_v12 = vld [vmem:[%s5750_s1] ss:$0 sm:$0xff]  ;;  %626 = vst [vmem:[#allocation2 + $0x30] sm:$0x1] %v625_v13  ;;  %v657_v17 = vsel %vm4650_vm4, 0, %v656_v14 }
  0x14   : > { %4435 = vmatpush.bf16.msra.mxu3 %v4262_v1  ;;  %1283 = vmatpush.bf16.msra.mxu0 %v4262_v1  ;;  %s4670_s12 = scalar_lea.vmem %s5751_s2, %s3676_s20  ;;  %658 = vst [vmem:[#allocation2 + $0x38] sm:$0x1] %v657_v17  ;;  %v630_v23 = vld [vmem:[#allocation2 + $0x48] sm:$0x1]  ;;  %v662_v27 = vld [vmem:[#allocation2 + $0x50] sm:$0x1]  ;;  %s5705_s21 = scalar_lea.vmem %s5755_s6, %s3676_s20 }
  0x15   : > { %v4416_v15 = vld [vmem:[%s4670_s12 + $0x8] sm:$0xff]   ;;  %v4418_v16 = vld [vmem:[%s4670_s12 + $0x18] sm:$0xff]   ;;  %s418_s17 = scalar_select %p417_p7, %s4638_s15, 0  ;;  %v631_v26 = vsel %vm4630_vm2, 0, %v630_v23  ;;  %v663_v34 = vsel %vm4650_vm4, 0, %v662_v27  ;;  %vm696_vm5 = vcmask 1043456  }
  0x16   : > { %v4342_v18 = vunpack.c.l.bf16 %v4416_v15  ;;  %v4343_v19 = vunpack.c.h.bf16 %v4416_v15  ;;  %v4350_v20 = vunpack.c.l.bf16 %v4418_v16  ;;  %v4351_v21 = vunpack.c.h.bf16 %v4418_v16  ;;  %v4420_v22 = vld [vmem:[%s4670_s12 + $0x28] sm:$0xff]   ;;  %632 = vst [vmem:[#allocation2 + $0x48] sm:$0x1] %v631_v26  ;;  %s4702_s18 = scalar_select %p597_p9, 1, 0  ;;  %v4259_v35 = vld [vmem:[%s5754_s5 + $0x58] sm:$0xff]  ;;  %vm4739_vm8 = vmand %vm696_vm5, %vm642_vm3 }
  0x17   : > { %4436 = vmatpush.bf16.msra.mxu1 %v4261_v6  ;;  %4437 = vmatpush.bf16.msra.mxu2 %v4261_v6  ;;  %v4358_v24 = vunpack.c.l.bf16 %v4420_v22  ;;  %v4359_v25 = vunpack.c.h.bf16 %v4420_v22  ;;  %s5787_s17 = smov (!%p3679_p8, %s418_s17), 15  ;;  %664 = vst [vmem:[#allocation2 + $0x50] sm:$0x1] %v663_v34  ;;  %v612_v42 = vld [vmem:[#allocation2] sm:$0x1]  ;;  %v4258_v50 = vld [vmem:[%s5754_s5 + $0x50] sm:$0xff] }
  0x18   : > { %4438 = vmatpush.bf16.msra.mxu3 %v4261_v6  ;;  %1284 = vmatpush.bf16.msra.mxu0 %v4261_v6  ;;  %v508_v28 = vmul.f32 %v4658_v8, %v4342_v18  ;;  %v509_v29 = vmul.f32 %v4658_v8, %v4343_v19  ;;  %v512_v30 = vmul.f32 %v4658_v8, %v4350_v20  ;;  %s3684_s15 = sshll.u32 %s5787_s17, 1  ;;  %vm674_vm6 = vsmask.f32 4368  ;;  %v4257_v0 = vld [vmem:[%s5754_s5 + $0x48] sm:$0xff]  ;;  %v4256_v27 = vld [vmem:[%s5754_s5 + $0x40] sm:$0xff]  ;;  %s5789_s22 = smov (!%p5463_p10, %s433_s22), 15 }
  0x19   : > { %v513_v31 = vmul.f32 %v4658_v8, %v4351_v21  ;;  %v516_v32 = vmul.f32 %v4658_v8, %v4358_v24  ;;  %v517_v33 = vmul.f32 %v4658_v8, %v4359_v25  ;;  %s425_s23 = sadd.s32 %s3684_s15, %s4635_s14  ;;  %v599_v49 = vstv %s4702_s18  ;;  %vm4733_vm7 = vmor %vm610_vm1, %vm674_vm6  ;;  %v905_v16 = vld [vmem:[#allocation2 + $0x20] sm:$0x1]  ;;  %s5791_s22 = smov (!%p5463_p10, %s5789_s22), 15 }
  0x1a   : > { %v527_v36 = vadd.f32 %v4675_v12, %v508_v28  ;;  %v528_v37 = vadd.f32 %v4675_v12, %v509_v29  ;;  %v531_v38 = vadd.f32 %v4675_v12, %v512_v30  ;;  %s3686_s8 = sshll.u32 %s425_s23, 2  ;;  %v613_v55 = vsel %vm4630_vm2, 0, %v612_v42  ;;  %v915_v25 = vld [vmem:[#allocation2 + $0x30] sm:$0xf]  ;;  %s3691_s10 = sshll.u32 %s5791_s22, 1 }
  0x1b   : > { %4439 = vmatpush.bf16.msra.mxu1 %v4260_v11  ;;  %4440 = vmatpush.bf16.msra.mxu2 %v4260_v11  ;;  %v532_v39 = vadd.f32 %v4675_v12, %v513_v31  ;;  %v535_v40 = vadd.f32 %v4675_v12, %v516_v32  ;;  %v536_v41 = vadd.f32 %v4675_v12, %v517_v33  ;;  %s427_s13 = scalar_lea.vmem %s5752_s3, %s3686_s8  ;;  %v919_v26 = vld [vmem:[#allocation2 + $0x38] sm:$0x1]  ;;  %vm4754_vm9 = vcmp.eq.s32.totalorder %v599_v49, 1  ;;  %p462_p12 = scmp.lt.s32.totalorder %s4525_s24, 1 }
  0x1c   : > { %4441 = vmatpush.bf16.msra.mxu3 %v4260_v11  ;;  %1285 = vmatpush.bf16.msra.mxu0 %v4260_v11  ;;  %v543_v43 = vmax.f32 %v527_v36, 0.0  ;;  %v544_v44 = vmax.f32 %v528_v37, 0.0  ;;  %v547_v45 = vmax.f32 %v531_v38, 0.0  ;;  %v4721_v54 = vld [vmem:[%s427_s13] sm:$0xff]   ;;  %614 = vst [vmem:[#allocation2] sm:$0x1] %v613_v55 }
  0x1d   : > { %v548_v46 = vmax.f32 %v532_v39, 0.0  ;;  %v551_v47 = vmax.f32 %v535_v40, 0.0  ;;  %v552_v48 = vmax.f32 %v536_v41, 0.0  ;;  %v4370_v59 = vunpack.c.l.bf16 %v4721_v54  ;;  %v901_v11 = vld [vmem:[#allocation2 + $0x18] sm:$0xf]  ;;  %v4417_v39 = vld [vmem:[%s4670_s12 + $0x10] sm:$0xff]  }
  0x1e   : > { %v559_v51 = vpack.c.bf16 %v543_v43, %v543_v43  ;;  %v560_v52 = vpack.c.bf16 %v544_v44, %v544_v44  ;;  %v563_v53 = vpack.c.bf16 %v547_v45, %v547_v45  ;;  %v929_v36 = vld [vmem:[#allocation2 + $0x48] sm:$0xf]  ;;  %v4271_v43 = vld [vmem:[%s5754_s5 + $0xb8] sm:$0xff]  ;;  %v4770_v44 = vld [vmem:[#allocation2 + $0x24] sm:$0x1]  ;;  %v4371_v49 = vunpack.c.h.bf16 %v4721_v54  ;;  %s5793_s24 = smov (!%p462_p12, %s4525_s24), 1 }
  0x1f   : > { %4442 = vmatpush.bf16.msra.mxu1 %v4259_v35  ;;  %4443 = vmatpush.bf16.msra.mxu2 %v4259_v35  ;;  %v564_v56 = vpack.c.bf16 %v548_v46, %v548_v46  ;;  %v567_v57 = vpack.c.bf16 %v551_v47, %v551_v47  ;;  %v4725_v58 = vpack.c.bf16 %v552_v48, %v552_v48  ;;  %v4758_v38 = vld [vmem:[#allocation2 + $0x8] sm:$0x1]  ;;  %v4255_v48 = vld [vmem:[%s5754_s5 + $0x38] sm:$0xff]  ;;  %vm990_vm10 = vsmask.f32 3328  ;;  %s3698_s19 = sshll.u32 %s5785_s25, 1 }
  0x20   : > { %4444 = vmatpush.bf16.msra.mxu3 %v4259_v35  ;;  %1286 = vmatpush.bf16.msra.mxu0 %v4259_v35  ;;  %v751_v60 = vshrl.u32 %v559_v51, 16  ;;  %v754_v61 = vshll.u32 %v559_v51, 16  ;;  %v759_v62 = vshrl.u32 %v560_v52, 16  ;;  %v762_v63 = vshll.u32 %v560_v52, 16  ;;  %v4287_v51 = vld [vmem:[%s5754_s5 + $0xf8] sm:$0xff]  ;;  %s465_s20 = sadd.s32 %s3698_s19, %s5793_s24 }
  0x21   : > { %v785_v1 = vshrl.u32 %v563_v53, 16  ;;  %v788_v3 = vshll.u32 %v563_v53, 16  ;;  %v793_v4 = vshrl.u32 %v564_v56, 16  ;;  %v796_v5 = vshll.u32 %v564_v56, 16  ;;  %s5559_s11 = scalar_select %p603_p11, 1, 0 }
  0x22   : > { %v753_v9 = vrot.slane %v751_v60, 7  ;;  %v761_v10 = vrot.slane %v759_v62, 7  ;;  %v819_v13 = vshrl.u32 %v567_v57, 16  ;;  %v822_v14 = vshll.u32 %v567_v57, 16  ;;  %s3699_s22 = sshll.u32 %s465_s20, 1 }
  0x23   : > { %4445 = vmatpush.bf16.msra.mxu1 %v4258_v50  ;;  %4446 = vmatpush.bf16.msra.mxu2 %v4258_v50  ;;  %v787_v17 = vrot.slane %v785_v1, 7  ;;  %v795_v18 = vrot.slane %v793_v4, 7  ;;  %v827_v19 = vshrl.u32 %v4725_v58, 16  ;;  %v830_v20 = vshll.u32 %v4725_v58, 16  ;;  %v4798_v1 = vld [vmem:[#allocation2 + $0x3c] sm:$0x1] }
  0x24   : > { %4447 = vmatpush.bf16.msra.mxu3 %v4258_v50  ;;  %1287 = vmatpush.bf16.msra.mxu0 %v4258_v50  ;;  %v756_v21 = vor.u32 %v754_v61, %v753_v9  ;;  %v757_v22 = vrot.slane %v753_v9, 4  ;;  %v764_v23 = vor.u32 %v762_v63, %v761_v10  ;;  %v766_v24 = vrot.slane %v761_v10, 4  ;;  %v933_v50 = vld [vmem:[#allocation2 + $0x50] sm:$0x1] }
  0x25   : > { %v790_v28 = vor.u32 %v788_v3, %v787_v17  ;;  %v791_v29 = vrot.slane %v787_v17, 4  ;;  %v798_v30 = vor.u32 %v796_v5, %v795_v18  ;;  %v800_v31 = vrot.slane %v795_v18, 4  ;;  %v4806_v9 = vld [vmem:[%s4670_s12 + $0x30] sm:$0xff]  }
  0x26   : > { %v765_v32 = vsel %vm4733_vm7, %v757_v22, %v764_v23  ;;  %v902_v33 = vsel %vm4739_vm8, %v756_v21, %v901_v11  ;;  %v906_v34 = vsel %vm4630_vm2, %v766_v24, %v905_v16  ;;  %v821_v35 = vrot.slane %v819_v13, 7 }
  0x27   : > { %4448 = vmatpush.bf16.msra.mxu1 %v4257_v0  ;;  %4449 = vmatpush.bf16.msra.mxu2 %v4257_v0  ;;  %903 = vst [vmem:[#allocation2 + $0x18] sm:$0xf] %v902_v33  ;;  %v799_v40 = vsel %vm4733_vm7, %v791_v29, %v798_v30  ;;  %v916_v41 = vsel %vm4739_vm8, %v790_v28, %v915_v25  ;;  %v829_v47 = vrot.slane %v827_v19, 7  ;;  %v645_v53 = vsel %vm4650_vm4, 0, %v4758_v38  ;;  %v4270_v38 = vld [vmem:[%s5754_s5 + $0xb0] sm:$0xff] }
  0x28   : > { %4450 = vmatpush.bf16.msra.mxu3 %v4257_v0  ;;  %1288 = vmatpush.bf16.msra.mxu0 %v4257_v0  ;;  %v920_v42 = vsel %vm4630_vm2, %v800_v31, %v919_v26  ;;  %904 = vst [vmem:[#allocation2 + $0x1c] sm:$0xf] %v765_v32  ;;  %v824_v45 = vor.u32 %v822_v14, %v821_v35  ;;  %v825_v46 = vrot.slane %v821_v35, 4  ;;  %v4346_v55 = vunpack.c.l.bf16 %v4417_v39  ;;  %v4796_v0 = vld [vmem:[%s4670_s12 + $0x20] sm:$0xff]  }
  0x29   : > { %907 = vst [vmem:[#allocation2 + $0x20] sm:$0x1] %v906_v34  ;;  %v577_v52 = vmul.f32 %v4658_v8, %v4370_v59  ;;  %v4347_v56 = vunpack.c.h.bf16 %v4417_v39  ;;  %v832_v57 = vor.u32 %v830_v20, %v829_v47  ;;  %v834_v58 = vrot.slane %v829_v47, 4  ;;  %v4790_v59 = vld [vmem:[#allocation2 + $0x2c] sm:$0x1] }
  0x2a   : > { %917 = vst [vmem:[#allocation2 + $0x30] sm:$0xf] %v916_v41  ;;  %v930_v60 = vsel %vm4739_vm8, %v824_v45, %v929_v36  ;;  %v622_v54 = vsel %vm4630_vm2, 0, %v4770_v44  ;;  %v578_v61 = vmul.f32 %v4658_v8, %v4371_v49  ;;  %v510_v63 = vmul.f32 %v4658_v8, %v4346_v55 }
  0x2b   : > { %4451 = vmatpush.bf16.msra.mxu1 %v4256_v27  ;;  %4452 = vmatpush.bf16.msra.mxu2 %v4256_v27  ;;  %918 = vst [vmem:[#allocation2 + $0x34] sm:$0xf] %v799_v40  ;;  %v579_v62 = vadd.f32 %v4675_v12, %v577_v52  ;;  %vm991_vm11 = vsmask.f32 7440  ;;  %v833_v3 = vsel %vm4733_vm7, %v825_v46, %v832_v57  ;;  %v654_v14 = vsel %vm4650_vm4, 0, %v4790_v59 }
  0x2c   : > { %4453 = vmatpush.bf16.msra.mxu3 %v4256_v27  ;;  %921 = vst [vmem:[#allocation2 + $0x38] sm:$0x1] %v920_v42  ;;  %v934_v4 = vsel %vm4630_vm2, %v834_v58, %v933_v50  ;;  %1289 = vmatpush.bf16.msra.mxu0 %v4256_v27  ;;  %v511_v5 = vmul.f32 %v4658_v8, %v4347_v56  ;;  %v4354_v18 = vunpack.c.l.bf16 %v4796_v0  ;;  %v4355_v19 = vunpack.c.h.bf16 %v4796_v0  ;;  %vm4841_vm12 = vmor %vm990_vm10, %vm991_vm11 }
  0x2d   : > { %931 = vst [vmem:[#allocation2 + $0x48] sm:$0xf] %v930_v60  ;;  %v4809_v10 = vadd.f32 %v4675_v12, %v578_v61  ;;  %v581_v11 = vmax.f32 %v579_v62, 0.0  ;;  %v4812_v13 = vadd.f32 %v4675_v12, %v510_v63  ;;  %v628_v20 = vsel %vm4630_vm2, 0, %v4798_v1 }
  0x2e   : > { %v954_v16 = vld [vmem:[#allocation2 + $0x18] sm:$0xf]  ;;  %932 = vst [vmem:[#allocation2 + $0x4c] sm:$0xf] %v833_v3  ;;  %v4818_v17 = vadd.f32 %v4675_v12, %v511_v5  ;;  %v4362_v25 = vunpack.c.l.bf16 %v4806_v9  ;;  %vm1500_vm13 = vcmask 1042432   ;;  %vm1501_vm14 = vcmask 1046532  }
  0x2f   : > { %1656 = vmatpush.bf16.msrb.mxu2 %v4271_v43  ;;  %1427 = vmatpush.bf16.msrb.mxu1 %v4255_v48  ;;  %v4825_v21 = vld [vmem:[#allocation2 + $0x1c] sm:$0xf]  ;;  %v1042_v22 = vshrl.u32 %v954_v16, 16  ;;  %v1045_v23 = vshll.u32 %v954_v16, 16  ;;  %935 = vst [vmem:[#allocation2 + $0x50] sm:$0x1] %v934_v4  ;;  %v583_v24 = vpack.c.bf16 %v581_v11, %v581_v11  ;;  %vm5093_vm15 = vmor %vm1500_vm13, %vm1501_vm14 }
  0x30   : > { %1850 = vmatpush.bf16.msrb.mxu3 %v4287_v51  ;;  %v4828_v26 = vld [vmem:[#allocation2 + $0x20] sm:$0x1]  ;;  %v1051_v27 = vshll.u32 %v4825_v21, 16  ;;  %v1055_v28 = vshrl.u32 %v4825_v21, 16  ;;  %v582_v29 = vmax.f32 %v4809_v10, 0.0  ;;  %v545_v30 = vmax.f32 %v4812_v13, 0.0 }
  0x31   : > { %v1044_v31 = vrot.slane %v1042_v22, 4  ;;  %v1047_v32 = vrot.slane %v1045_v23, 5  ;;  %v1061_v33 = vshll.u32 %v4828_v26, 16  ;;  %v958_v34 = vld [vmem:[#allocation2 + $0x30] sm:$0xf]  ;;  %v4837_v35 = vsel %vm4754_vm9, 0, %v583_v24 }
  0x32   : > { %v1053_v36 = vrot.slane %v1051_v27, 5  ;;  %v1057_v39 = vrot.slane %v1055_v28, 4  ;;  %v959_v40 = vld [vmem:[#allocation2 + $0x34] sm:$0xf]  ;;  %v1090_v41 = vshrl.u32 %v958_v34, 16  ;;  %v1093_v42 = vshll.u32 %v958_v34, 16 }
  0x33   : > { %v1048_v43 = vor.u32 %v1047_v32, %v1044_v31  ;;  %v1063_v45 = vrot.slane %v1061_v33, 5  ;;  %v986_v46 = vld [vmem:[#allocation2 + $0x38] sm:$0x1]  ;;  %v1099_v47 = vshll.u32 %v959_v40, 16  ;;  %v1103_v48 = vshrl.u32 %v959_v40, 16  ;;  %1657 = vmatpush.bf16.msrb.mxu2 %v4270_v38  ;;  %v4293_v13 = vld [vmem:[%s5754_s5 + $0x128] sm:$0xff] }
  0x34   : > { %v1058_v50 = vor.u32 %v1057_v39, %v1053_v36  ;;  %v1092_v51 = vrot.slane %v1090_v41, 4  ;;  %v1095_v52 = vrot.slane %v1093_v42, 5  ;;  %v1109_v55 = vshll.u32 %v986_v46, 16  ;;  %v962_v56 = vld [vmem:[#allocation2 + $0x48] sm:$0xf]  ;;  %v4286_v39 = vld [vmem:[%s5754_s5 + $0xf0] sm:$0xff] }
  0x35   : > { %v1049_v57 = vrot.slane %v1048_v43, 4  ;;  %v1101_v58 = vrot.slane %v1099_v47, 5  ;;  %v1105_v60 = vrot.slane %v1103_v48, 4  ;;  %v963_v61 = vld [vmem:[#allocation2 + $0x4c] sm:$0xf]  ;;  %v1138_v62 = vshrl.u32 %v962_v56, 16  ;;  %1851 = vmatpush.bf16.msrb.mxu3 %v4286_v39 }
  0x36   : > { %v1059_v63 = vrot.slane %v1058_v50, 4  ;;  %v1096_v3 = vor.u32 %v1095_v52, %v1092_v51  ;;  %v1111_v4 = vrot.slane %v1109_v55, 5  ;;  %v1141_v5 = vshll.u32 %v962_v56, 16  ;;  %v988_v16 = vld [vmem:[#allocation2 + $0x50] sm:$0x1]  ;;  %v4295_v42 = vld [vmem:[%s5754_s5 + $0x138] sm:$0xff] }
  0x37   : > { %v1054_v10 = vsel %vm4841_vm12, %v1049_v57, %v1053_v36  ;;  %v1106_v11 = vor.u32 %v1105_v60, %v1101_v58  ;;  %v1140_v22 = vrot.slane %v1138_v62, 4  ;;  %v1147_v23 = vshll.u32 %v963_v61, 16  ;;  %646 = vst [vmem:[#allocation2 + $0x8] sm:$0x1] %v645_v53  ;;  %v4254_v53 = vld [vmem:[%s5754_s5 + $0x30] sm:$0xff]  ;;  %v4253_v48 = vld [vmem:[%s5754_s5 + $0x28] sm:$0xff]  ;;  %2228 = vmatpush.bf16.msrb.mxu0 %v4295_v42 }
  0x38   : > { %v1064_v24 = vsel %vm4841_vm12, %v1059_v63, %v1063_v45  ;;  %v1206_v27 = vunpack.c.l.b16 %v1054_v10  ;;  %v1097_v28 = vrot.slane %v1096_v3, 4  ;;  %v1143_v31 = vrot.slane %v1141_v5, 5  ;;  %623 = vst [vmem:[#allocation2 + $0x24] sm:$0x1] %v622_v54  ;;  %1428 = vmatpush.bf16.msrb.mxu1 %v4254_v53  ;;  %v4285_v52 = vld [vmem:[%s5754_s5 + $0xe8] sm:$0xff]  ;;  %v4252_v10 = vld [vmem:[%s5754_s5 + $0x20] sm:$0xff] }
  0x39   : > { %v1207_v32 = vunpack.c.l.b16 %v1064_v24  ;;  %v1107_v33 = vrot.slane %v1106_v11, 4  ;;  %v1149_v34 = vrot.slane %v1147_v23, 5  ;;  %v1151_v36 = vshrl.u32 %v963_v61, 16  ;;  %655 = vst [vmem:[#allocation2 + $0x2c] sm:$0x1] %v654_v14  ;;  %1852 = vmatpush.bf16.msrb.mxu3 %v4285_v52 }
  0x3a   : > { %v1102_v44 = vsel %vm4841_vm12, %v1097_v28, %v1101_v58  ;;  %v1144_v54 = vor.u32 %v1143_v31, %v1140_v22  ;;  %v1157_v40 = vshll.u32 %v988_v16, 16  ;;  %v584_v41 = vpack.c.bf16 %v582_v29, %v582_v29  ;;  %v4269_v29 = vld [vmem:[%s5754_s5 + $0xa8] sm:$0xff]  ;;  %629 = vst [vmem:[#allocation2 + $0x3c] sm:$0x1] %v628_v20  ;;  %v4294_v20 = vld [vmem:[%s5754_s5 + $0x130] sm:$0xff] }
  0x3b   : > { %v1220_v43 = vpack.c.b16 %v1207_v32, %v1206_v27  ;;  %v1112_v45 = vsel %vm4841_vm12, %v1107_v33, %v1111_v4  ;;  %v1210_v46 = vunpack.c.l.b16 %v1102_v44  ;;  %v1153_v47 = vrot.slane %v1151_v36, 4  ;;  %v659_v58 = vld [vmem:[#allocation2 + $0x44] sm:$0x1]  ;;  %1658 = vmatpush.bf16.msrb.mxu2 %v4269_v29  ;;  %v698_v11 = vld [vmem:[#allocation2] sm:$0xf]  ;;  %2229 = vmatpush.bf16.msrb.mxu0 %v4294_v20 }
  0x3c   : > { %v1211_v59 = vunpack.c.l.b16 %v1112_v45  ;;  %v1145_v14 = vrot.slane %v1144_v54, 4  ;;  %v1159_v50 = vrot.slane %v1157_v40, 5  ;;  %v602_v51 = vsel %vm4754_vm9, 0, %v584_v41  ;;  %1429 = vmatpush.bf16.msrb.mxu1 %v4253_v48  ;;  %v633_v54 = vld [vmem:[#allocation2 + $0x54] sm:$0x1]  ;;  %v4946_v20 = vld [vmem:[%s4670_s12] sm:$0xff]  }
  0x3d   : > { %1300 = vmatmul.bf16.vlgmr.msra.gmra.mxu1 %v1220_v43  ;;  %v1154_v55 = vor.u32 %v1153_v47, %v1149_v34  ;;  %v677_v56 = vshrl.u32 %v4837_v35, 16  ;;  %v680_v57 = vshll.u32 %v4837_v35, 16  ;;  %v685_v1 = vshrl.u32 %v602_v51, 16  ;;  %v4268_v35 = vld [vmem:[%s5754_s5 + $0xa0] sm:$0xff] }
  0x3e   : > { %v1222_v37 = vpack.c.b16 %v1211_v59, %v1210_v46  ;;  %v1150_v60 = vsel %vm4841_vm12, %v1145_v14, %v1149_v34  ;;  %v688_v61 = vshll.u32 %v602_v51, 16  ;;  %v546_v62 = vmax.f32 %v4818_v17, 0.0  ;;  %v4284_v17 = vld [vmem:[%s5754_s5 + $0xe0] sm:$0xff]  ;;  %v702_v33 = vld [vmem:[#allocation2 + $0x8] sm:$0x1] }
  0x3f   : > { %v1155_v63 = vrot.slane %v1154_v55, 4  ;;  %v1214_v3 = vunpack.c.l.b16 %v1150_v60  ;;  %v679_v4 = vrot.slane %v677_v56, 7  ;;  %v687_v5 = vrot.slane %v685_v1, 7  ;;  %1659 = vmatpush.bf16.msrb.mxu2 %v4268_v35  ;;  %1853 = vmatpush.bf16.msrb.mxu3 %v4284_v17  ;;  %v908_v46 = vld [vmem:[#allocation2 + $0x24] sm:$0xf] }
  0x40   : > { %1310 = vmatmul.bf16.vlgmr.msra.gmra.mxu2 %v1222_v37  ;;  %v561_v16 = vpack.c.bf16 %v545_v30, %v545_v30  ;;  %v562_v22 = vpack.c.bf16 %v546_v62, %v546_v62  ;;  %v514_v23 = vmul.f32 %v4658_v8, %v4354_v18  ;;  %v660_v24 = vsel %vm4650_vm4, 0, %v659_v58  ;;  %1430 = vmatpush.bf16.msrb.mxu1 %v4252_v10  ;;  %v912_v0 = vld [vmem:[#allocation2 + $0x2c] sm:$0x1] }
  0x41   : > { %v1160_v27 = vsel %vm4841_vm12, %v1155_v63, %v1159_v50  ;;  %v682_v28 = vor.u32 %v680_v57, %v679_v4  ;;  %v683_v31 = vrot.slane %v679_v4, 4  ;;  %v690_v32 = vor.u32 %v688_v61, %v687_v5  ;;  %661 = vst [vmem:[#allocation2 + $0x44] sm:$0x1] %v660_v24  ;;  %2230 = vmatpush.bf16.msrb.mxu0 %v4293_v13 }
  0x42   : > { %v1215_v30 = vunpack.c.l.b16 %v1160_v27  ;;  %v692_v34 = vrot.slane %v687_v5, 4  ;;  %v768_v36 = vshrl.u32 %v561_v16, 16  ;;  %v771_v18 = vshll.u32 %v561_v16, 16  ;;  %v922_v27 = vld [vmem:[#allocation2 + $0x3c] sm:$0xf] }
  0x43   : > { %v691_v38 = vsel %vm4733_vm7, %v683_v31, %v690_v32  ;;  %v699_v53 = vsel %vm4739_vm8, %v682_v28, %v698_v11  ;;  %v776_v39 = vshrl.u32 %v562_v22, 16  ;;  %v779_v44 = vshll.u32 %v562_v22, 16 }
  0x44   : > { %v1224_v40 = vpack.c.b16 %v1215_v30, %v1214_v3  ;;  %700 = vst [vmem:[#allocation2] sm:$0xf] %v699_v53  ;;  %v703_v41 = vsel %vm4630_vm2, %v692_v34, %v702_v33  ;;  %v770_v42 = vrot.slane %v768_v36, 7  ;;  %v515_v43 = vmul.f32 %v4658_v8, %v4355_v19 }
  0x45   : > { %701 = vst [vmem:[#allocation2 + $0x4] sm:$0xf] %v691_v38  ;;  %v778_v45 = vrot.slane %v776_v39, 7  ;;  %v533_v47 = vadd.f32 %v4675_v12, %v514_v23  ;;  %v4363_v29 = vunpack.c.h.bf16 %v4806_v9  ;;  %v518_v48 = vmul.f32 %v4658_v8, %v4362_v25  ;;  %v665_v9 = vld [vmem:[#allocation2 + $0x5c] sm:$0x1] }
  0x46   : > { %1320 = vmatmul.bf16.vlgmr.msra.gmra.mxu3 %v1224_v40  ;;  %704 = vst [vmem:[#allocation2 + $0x8] sm:$0x1] %v703_v41  ;;  %v773_v59 = vor.u32 %v771_v18, %v770_v42  ;;  %v774_v14 = vrot.slane %v770_v42, 4  ;;  %v534_v19 = vadd.f32 %v4675_v12, %v515_v43  ;;  %v634_v50 = vsel %vm4630_vm2, 0, %v633_v54 }
  0x47   : > { %v781_v51 = vor.u32 %v779_v44, %v778_v45  ;;  %v783_v52 = vrot.slane %v778_v45, 4  ;;  %v549_v55 = vmax.f32 %v533_v47, 0.0  ;;  %v519_v56 = vmul.f32 %v4658_v8, %v4363_v29  ;;  %635 = vst [vmem:[#allocation2 + $0x54] sm:$0x1] %v634_v50 }
  0x48   : > { %v909_v25 = vsel %vm4739_vm8, %v773_v59, %v908_v46  ;;  %v550_v57 = vmax.f32 %v534_v19, 0.0  ;;  %v4943_v1 = vadd.f32 %v4675_v12, %v518_v48  ;;  %v666_v3 = vsel %vm4650_vm4, 0, %v665_v9  ;;  %v926_v59 = vld [vmem:[#allocation2 + $0x44] sm:$0x1] }
  0x49   : > { %v782_v58 = vsel %vm4733_vm7, %v774_v14, %v781_v51  ;;  %910 = vst [vmem:[#allocation2 + $0x24] sm:$0xf] %v909_v25  ;;  %v913_v37 = vsel %vm4630_vm2, %v783_v52, %v912_v0  ;;  %v565_v60 = vpack.c.bf16 %v549_v55, %v549_v55  ;;  %v4953_v61 = vadd.f32 %v4675_v12, %v519_v56 }
  0x4a   : > { %911 = vst [vmem:[#allocation2 + $0x28] sm:$0xf] %v782_v58  ;;  %v566_v62 = vpack.c.bf16 %v550_v57, %v550_v57  ;;  %v553_v63 = vmax.f32 %v4943_v1, 0.0  ;;  %v4338_v10 = vunpack.c.l.bf16 %v4946_v20  ;;  %v4339_v11 = vunpack.c.h.bf16 %v4946_v20 }
  0x4b   : > { %v950_v4 = vld [vmem:[#allocation2] sm:$0xf]  ;;  %914 = vst [vmem:[#allocation2 + $0x2c] sm:$0x1] %v913_v37  ;;  %v802_v5 = vshrl.u32 %v565_v60, 16  ;;  %v805_v35 = vshll.u32 %v565_v60, 16 }
  0x4c   : > { %v4960_v17 = vld [vmem:[#allocation2 + $0x4] sm:$0xf]  ;;  %v994_v16 = vshrl.u32 %v950_v4, 16  ;;  %v997_v22 = vshll.u32 %v950_v4, 16  ;;  %v810_v23 = vshrl.u32 %v566_v62, 16  ;;  %v813_v24 = vshll.u32 %v566_v62, 16 }
  0x4d   : > { %v4962_v28 = vld [vmem:[#allocation2 + $0x8] sm:$0x1]  ;;  %v1003_v31 = vshll.u32 %v4960_v17, 16  ;;  %v1007_v32 = vshrl.u32 %v4960_v17, 16  ;;  %v804_v33 = vrot.slane %v802_v5, 7  ;;  %v554_v13 = vmax.f32 %v4953_v61, 0.0 }
  0x4e   : > { %v996_v30 = vrot.slane %v994_v16, 4  ;;  %v999_v34 = vrot.slane %v997_v22, 5  ;;  %v1013_v36 = vshll.u32 %v4962_v28, 16  ;;  %v812_v18 = vrot.slane %v810_v23, 7  ;;  %667 = vst [vmem:[#allocation2 + $0x5c] sm:$0x1] %v666_v3 }
  0x4f   : > { %v1005_v38 = vrot.slane %v1003_v31, 5  ;;  %v1009_v53 = vrot.slane %v1007_v32, 4  ;;  %v807_v39 = vor.u32 %v805_v35, %v804_v33  ;;  %v808_v44 = vrot.slane %v804_v33, 4  ;;  %v615_v60 = vld [vmem:[#allocation2 + $0xc] sm:$0x1]  ;;  %v4267_v5 = vld [vmem:[%s5754_s5 + $0x98] sm:$0xff] }
  0x50   : > { %v1000_v54 = vor.u32 %v999_v34, %v996_v30  ;;  %v1015_v40 = vrot.slane %v1013_v36, 5  ;;  %v956_v41 = vld [vmem:[#allocation2 + $0x24] sm:$0xf]  ;;  %v815_v42 = vor.u32 %v813_v24, %v812_v18  ;;  %v817_v43 = vrot.slane %v812_v18, 4  ;;  %v4251_v24 = vld [vmem:[%s5754_s5 + $0x18] sm:$0xff]  ;;  %1660 = vmatpush.bf16.msrb.mxu2 %v4267_v5 }
  0x51   : > { %v1010_v45 = vor.u32 %v1009_v53, %v1005_v38  ;;  %v4968_v46 = vld [vmem:[#allocation2 + $0x28] sm:$0xf]  ;;  %v1066_v47 = vshrl.u32 %v956_v41, 16  ;;  %v1069_v29 = vshll.u32 %v956_v41, 16  ;;  %v923_v48 = vsel %vm4739_vm8, %v807_v39, %v922_v27  ;;  %v4283_v27 = vld [vmem:[%s5754_s5 + $0xd8] sm:$0xff]  ;;  %v4292_v31 = vld [vmem:[%s5754_s5 + $0x120] sm:$0xff]  ;;  %1431 = vmatpush.bf16.msrb.mxu1 %v4251_v24 }
  0x52   : > { %v1001_v14 = vrot.slane %v1000_v54, 4  ;;  %v4972_v0 = vld [vmem:[#allocation2 + $0x2c] sm:$0x1]  ;;  %v1075_v19 = vshll.u32 %v4968_v46, 16  ;;  %v1079_v50 = vshrl.u32 %v4968_v46, 16  ;;  %v816_v51 = vsel %vm4733_vm7, %v808_v44, %v815_v42  ;;  %1854 = vmatpush.bf16.msrb.mxu3 %v4283_v27  ;;  %2231 = vmatpush.bf16.msrb.mxu0 %v4292_v31 }
  0x53   : > { %v1011_v52 = vrot.slane %v1010_v45, 4  ;;  %v1068_v55 = vrot.slane %v1066_v47, 4  ;;  %v1071_v56 = vrot.slane %v1069_v29, 5  ;;  %v1085_v9 = vshll.u32 %v4972_v0, 16  ;;  %924 = vst [vmem:[#allocation2 + $0x3c] sm:$0xf] %v923_v48 }
  0x54   : > { %v1006_v25 = vsel %vm4841_vm12, %v1001_v14, %v1005_v38  ;;  %v1077_v57 = vrot.slane %v1075_v19, 5  ;;  %v1081_v58 = vrot.slane %v1079_v50, 4  ;;  %925 = vst [vmem:[#allocation2 + $0x40] sm:$0xf] %v816_v51  ;;  %v927_v37 = vsel %vm4630_vm2, %v817_v43, %v926_v59  ;;  %v936_v44 = vld [vmem:[#allocation2 + $0x54] sm:$0xf] }
  0x55   : > { %v1016_v61 = vsel %vm4841_vm12, %v1011_v52, %v1015_v40  ;;  %v1202_v62 = vunpack.c.l.b16 %v1006_v25  ;;  %v1072_v3 = vor.u32 %v1071_v56, %v1068_v55  ;;  %v1087_v4 = vrot.slane %v1085_v9, 5  ;;  %928 = vst [vmem:[#allocation2 + $0x44] sm:$0x1] %v927_v37 }
  0x56   : > { %v1203_v35 = vunpack.c.l.b16 %v1016_v61  ;;  %v1082_v16 = vor.u32 %v1081_v58, %v1077_v57  ;;  %v569_v22 = vpack.c.bf16 %v553_v63, %v553_v63  ;;  %v570_v23 = vpack.c.bf16 %v554_v13, %v554_v13 }
  0x57   : > { %v1073_v32 = vrot.slane %v1072_v3, 4  ;;  %v506_v1 = vmul.f32 %v4658_v8, %v4338_v10  ;;  %v507_v63 = vmul.f32 %v4658_v8, %v4339_v11  ;;  %v616_v33 = vsel %vm4630_vm2, 0, %v615_v60  ;;  %v4250_v3 = vld [vmem:[%s5754_s5 + $0x10] sm:$0xff] }
  0x58   : > { %v1218_v13 = vpack.c.b16 %v1203_v35, %v1202_v62  ;;  %v1083_v30 = vrot.slane %v1082_v16, 4  ;;  %v836_v34 = vshrl.u32 %v569_v22, 16  ;;  %v839_v36 = vshll.u32 %v569_v22, 16  ;;  %617 = vst [vmem:[#allocation2 + $0xc] sm:$0x1] %v616_v33  ;;  %v4266_v62 = vld [vmem:[%s5754_s5 + $0x90] sm:$0xff]  ;;  %1432 = vmatpush.bf16.msrb.mxu1 %v4250_v3 }
  0x59   : > { %v1078_v18 = vsel %vm4841_vm12, %v1073_v32, %v1077_v57  ;;  %v844_v38 = vshrl.u32 %v570_v23, 16  ;;  %v847_v53 = vshll.u32 %v570_v23, 16  ;;  %v525_v20 = vadd.f32 %v4675_v12, %v506_v1  ;;  %v647_v57 = vld [vmem:[#allocation2 + $0x14] sm:$0x1]  ;;  %v4291_v23 = vld [vmem:[%s5754_s5 + $0x118] sm:$0xff]  ;;  %1661 = vmatpush.bf16.msrb.mxu2 %v4266_v62  ;;  %v4265_v32 = vld [vmem:[%s5754_s5 + $0x88] sm:$0xff] }
  0x5a   : > { %1290 = vmatmul.bf16.vlgmr.msra.gmra.mxu0 %v1218_v13  ;;  %v1088_v8 = vsel %vm4841_vm12, %v1083_v30, %v1087_v4  ;;  %v1208_v10 = vunpack.c.l.b16 %v1078_v18  ;;  %v960_v11 = vld [vmem:[#allocation2 + $0x3c] sm:$0xf]  ;;  %v838_v39 = vrot.slane %v836_v34, 7  ;;  %v526_v54 = vadd.f32 %v4675_v12, %v507_v63  ;;  %v4282_v22 = vld [vmem:[%s5754_s5 + $0xd0] sm:$0xff]  ;;  %v4249_v1 = vld [vmem:[%s5754_s5 + $0x8] sm:$0xff] }
  0x5b   : > { %v1209_v40 = vunpack.c.l.b16 %v1088_v8  ;;  %v5014_v41 = vld [vmem:[#allocation2 + $0x40] sm:$0xf]  ;;  %v1114_v42 = vshrl.u32 %v960_v11, 16  ;;  %v1117_v43 = vshll.u32 %v960_v11, 16  ;;  %v846_v45 = vrot.slane %v844_v38, 7  ;;  %1855 = vmatpush.bf16.msrb.mxu3 %v4282_v22  ;;  %2232 = vmatpush.bf16.msrb.mxu0 %v4291_v23  ;;  %v4281_v13 = vld [vmem:[%s5754_s5 + $0xc8] sm:$0xff] }
  0x5c   : > { %v5016_v47 = vld [vmem:[#allocation2 + $0x44] sm:$0x1]  ;;  %v1123_v29 = vshll.u32 %v5014_v41, 16  ;;  %v1127_v48 = vshrl.u32 %v5014_v41, 16  ;;  %v841_v59 = vor.u32 %v839_v36, %v838_v39  ;;  %v842_v14 = vrot.slane %v838_v39, 4  ;;  %v4290_v30 = vld [vmem:[%s5754_s5 + $0x110] sm:$0xff]  ;;  %1433 = vmatpush.bf16.msrb.mxu1 %v4249_v1 }
  0x5d   : > { %v1221_v19 = vpack.c.b16 %v1209_v40, %v1208_v10  ;;  %v1116_v50 = vrot.slane %v1114_v42, 4  ;;  %v1119_v51 = vrot.slane %v1117_v43, 5  ;;  %v1133_v52 = vshll.u32 %v5016_v47, 16  ;;  %v940_v12 = vld [vmem:[#allocation2 + $0x5c] sm:$0x1]  ;;  %1662 = vmatpush.bf16.msrb.mxu2 %v4265_v32  ;;  %v4264_v42 = vld [vmem:[%s5754_s5 + $0x80] sm:$0xff] }
  0x5e   : > { %v1125_v55 = vrot.slane %v1123_v29, 5  ;;  %v1129_v56 = vrot.slane %v1127_v48, 4  ;;  %v849_v9 = vor.u32 %v847_v53, %v846_v45  ;;  %v851_v25 = vrot.slane %v846_v45, 4  ;;  %v1476_v10 = vld [vmem:[#allocation2] sm:$0xe] }
  0x5f   : > { %1305 = vmatmul.bf16.gmra.mxu1 %v1221_v19  ;;  %v1120_v58 = vor.u32 %v1119_v51, %v1116_v50  ;;  %v1135_v37 = vrot.slane %v1133_v52, 5  ;;  %v937_v60 = vsel %vm4739_vm8, %v841_v59, %v936_v44  ;;  %v541_v61 = vmax.f32 %v525_v20, 0.0  ;;  %v894_v44 = vld [vmem:[#allocation2 + $0xc] sm:$0xf]  ;;  %1856 = vmatpush.bf16.msrb.mxu3 %v4281_v13  ;;  %v4280_v43 = vld [vmem:[%s5754_s5 + $0xc0] sm:$0xff]  ;;  %v4319_v51 = vld [vmem:[%s5754_s5 + $0x1b8] sm:$0xff] }
  0x60   : > { %v1130_v4 = vor.u32 %v1129_v56, %v1125_v55  ;;  %v850_v5 = vsel %vm4733_vm7, %v842_v14, %v849_v9  ;;  %938 = vst [vmem:[#allocation2 + $0x54] sm:$0xf] %v937_v60  ;;  %v941_v35 = vsel %vm4630_vm2, %v851_v25, %v940_v12  ;;  %v542_v16 = vmax.f32 %v526_v54, 0.0  ;;  %v4248_v54 = vld [vmem:[%s5754_s5] sm:$0xff]  ;;  %2233 = vmatpush.bf16.msrb.mxu0 %v4290_v30  ;;  %v4289_v19 = vld [vmem:[%s5754_s5 + $0x108] sm:$0xff]  ;;  %v4327_v25 = vld [vmem:[%s5754_s5 + $0x1f8] sm:$0xff] }
  0x61   : > { %v1121_v24 = vrot.slane %v1120_v58, 4  ;;  %939 = vst [vmem:[#allocation2 + $0x58] sm:$0xf] %v850_v5  ;;  %v557_v27 = vpack.c.bf16 %v541_v61, %v541_v61  ;;  %v648_v31 = vsel %vm4650_vm4, 0, %v647_v57  ;;  %v3812_v45 = vrot.slane %v1476_v10, 9  ;;  %1434 = vmatpush.bf16.msrb.mxu1 %v4248_v54  ;;  %v4240_v60 = vld [vmem:[#allocation2] sm:$0xff]  ;;  %1663 = vmatpush.bf16.msrb.mxu2 %v4264_v42 }
  0x62   : > { %v1131_v63 = vrot.slane %v1130_v4, 4  ;;  %942 = vst [vmem:[#allocation2 + $0x5c] sm:$0x1] %v941_v35  ;;  %v558_v33 = vpack.c.bf16 %v542_v16, %v542_v16  ;;  %v1505_v50 = vrot.slane %v4960_v17, 5  ;;  %v1508_v61 = vrot.slane %v4962_v28, 5  ;;  %v4288_v35 = vld [vmem:[%s5754_s5 + $0x100] sm:$0xff] }
  0x63   : > { %v1126_v34 = vsel %vm4841_vm12, %v1121_v24, %v1125_v55  ;;  %649 = vst [vmem:[#allocation2 + $0x14] sm:$0x1] %v648_v31  ;;  %v734_v36 = vshrl.u32 %v557_v27, 16  ;;  %v737_v18 = vshll.u32 %v557_v27, 16  ;;  %1857 = vmatpush.bf16.msrb.mxu3 %v4280_v43 }
  0x64   : > { %v1136_v38 = vsel %vm4841_vm12, %v1131_v63, %v1135_v37  ;;  %v1212_v53 = vunpack.c.l.b16 %v1126_v34  ;;  %v742_v20 = vshrl.u32 %v558_v33, 16  ;;  %v745_v8 = vshll.u32 %v558_v33, 16  ;;  %2234 = vmatpush.bf16.msrb.mxu0 %v4289_v19 }
  0x65   : > { %v1213_v11 = vunpack.c.l.b16 %v1136_v38  ;;  %v736_v39 = vrot.slane %v734_v36, 7  ;;  %2673 = vmatpush.bf16.msra.mxu2 %v4319_v51  ;;  %v1507_v31 = vrot.slane %v1505_v50, 4  ;;  %v1506_v33 = vsel %vm5093_vm15, %v3812_v45, %v1505_v50  ;;  %v4303_v36 = vld [vmem:[%s5754_s5 + $0x178] sm:$0xff] }
  0x66   : > { %v744_v40 = vrot.slane %v742_v20, 7  ;;  %2478 = vmatpush.bf16.msra.mxu1 %v4303_v36 }
  0x67   : > { %v1223_v29 = vpack.c.b16 %v1213_v11, %v1212_v53  ;;  %v964_v48 = vld [vmem:[#allocation2 + $0x54] sm:$0xf]  ;;  %v739_v59 = vor.u32 %v737_v18, %v736_v39  ;;  %v740_v14 = vrot.slane %v736_v39, 4  ;;  %3051 = vmatpush.bf16.msra.mxu3 %v4327_v25  ;;  %v1509_v13 = vsel %vm5093_vm15, %v1507_v31, %v1508_v61  ;;  %v4335_v18 = vld [vmem:[%s5754_s5 + $0x238] sm:$0xff] }
  0x68   : > { %v5073_v52 = vld [vmem:[#allocation2 + $0x58] sm:$0xf]  ;;  %v1162_v12 = vshrl.u32 %v964_v48, 16  ;;  %v1165_v55 = vshll.u32 %v964_v48, 16  ;;  %v747_v56 = vor.u32 %v745_v8, %v744_v40  ;;  %v749_v9 = vrot.slane %v744_v40, 4  ;;  %2235 = vmatpush.bf16.msrb.mxu0 %v4288_v35 }
  0x69   : > { %1315 = vmatmul.bf16.gmra.mxu2 %v1223_v29  ;;  %v5078_v57 = vld [vmem:[#allocation2 + $0x5c] sm:$0x1]  ;;  %v1171_v58 = vshll.u32 %v5073_v52, 16  ;;  %v1175_v17 = vshrl.u32 %v5073_v52, 16  ;;  %v895_v37 = vsel %vm4739_vm8, %v739_v59, %v894_v44  ;;  %v1576_v8 = vunpack.c.l.b16 %v1506_v33  ;;  %v2299_v7 = vld [vmem:[#allocation2 + $0x54] sm:$0xe] }
  0x6a   : > { %v1164_v62 = vrot.slane %v1162_v12, 4  ;;  %v1167_v3 = vrot.slane %v1165_v55, 5  ;;  %v1181_v4 = vshll.u32 %v5078_v57, 16  ;;  %v748_v5 = vsel %vm4733_vm7, %v740_v14, %v747_v56  ;;  %896 = vst [vmem:[#allocation2 + $0xc] sm:$0xf] %v895_v37  ;;  %v4326_v37 = vld [vmem:[%s5754_s5 + $0x1f0] sm:$0xff] }
  0x6b   : > { %v1173_v16 = vrot.slane %v1171_v58, 5  ;;  %v1177_v22 = vrot.slane %v1175_v17, 4  ;;  %897 = vst [vmem:[#allocation2 + $0x10] sm:$0xf] %v748_v5  ;;  %v898_v23 = vld [vmem:[#allocation2 + $0x14] sm:$0x1]  ;;  %v1577_v10 = vunpack.c.l.b16 %v1509_v13  ;;  %3052 = vmatpush.bf16.msra.mxu3 %v4326_v37 }
  0x6c   : > { %v1168_v24 = vor.u32 %v1167_v3, %v1164_v62  ;;  %v899_v27 = vsel %vm4630_vm2, %v749_v9, %v898_v23  ;;  %v1183_v1 = vrot.slane %v1181_v4, 5  ;;  %3301 = vmatpush.bf16.msra.mxu0 %v4335_v18  ;;  %v4318_v17 = vld [vmem:[%s5754_s5 + $0x1b0] sm:$0xff] }
  0x6d   : > { %v1178_v32 = vor.u32 %v1177_v22, %v1173_v16  ;;  %900 = vst [vmem:[#allocation2 + $0x14] sm:$0x1] %v899_v27  ;;  %v1592_v56 = vpack.c.b16 %v1577_v10, %v1576_v8  ;;  %2674 = vmatpush.bf16.msra.mxu2 %v4318_v17  ;;  %v1918_v10 = vld [vmem:[#allocation2 + $0x18] sm:$0xf] }
  0x6e   : > { %v1169_v63 = vrot.slane %v1168_v24, 4  ;;  %v1478_v17 = vld [vmem:[#allocation2 + $0x18] sm:$0xe] }
  0x6f   : > { %v1179_v30 = vrot.slane %v1178_v32, 4  ;;  %1435 = vmatmul.bf16.vlgmr.msrb.gmra.mxu1 %v4240_v60 }
  0x70   : > { %v1174_v34 = vsel %vm4841_vm12, %v1169_v63, %v1173_v16 }
  0x71   : > { %v1184_v38 = vsel %vm4841_vm12, %v1179_v30, %v1183_v1  ;;  %v1216_v53 = vunpack.c.l.b16 %v1174_v34  ;;  %v952_v20 = vld [vmem:[#allocation2 + $0xc] sm:$0xf] }
  0x72   : > { %v1915_v11 = vld [vmem:[#allocation2 + $0xc] sm:$0xf]  ;;  %v1217_v39 = vunpack.c.l.b16 %v1184_v38  ;;  %v953_v44 = vld [vmem:[#allocation2 + $0x10] sm:$0xf]  ;;  %v1018_v54 = vshrl.u32 %v952_v20, 16  ;;  %v1021_v40 = vshll.u32 %v952_v20, 16 }
  0x73   : > { %v1027_v42 = vshll.u32 %v953_v44, 16  ;;  %v1031_v43 = vshrl.u32 %v953_v44, 16  ;;  %v5113_v45 = vld [vmem:[#allocation2 + $0x10] sm:$0xf]  ;;  %v1940_v29 = vshrl.u32 %v1915_v11, 16  ;;  %v1943_v50 = vshll.u32 %v1915_v11, 16 }
  0x74   : > { %v1225_v48 = vpack.c.b16 %v1217_v39, %v1216_v53  ;;  %v983_v59 = vld [vmem:[#allocation2 + $0x14] sm:$0x1]  ;;  %v1020_v14 = vrot.slane %v1018_v54, 4  ;;  %v1023_v19 = vrot.slane %v1021_v40, 5  ;;  %v1949_v25 = vshll.u32 %v5113_v45, 16  ;;  %v4241_v33 = vld [vmem:[#allocation2 + $0xc] sm:$0xff] }
  0x75   : > { %v1029_v51 = vrot.slane %v1027_v42, 5  ;;  %v1033_v12 = vrot.slane %v1031_v43, 4  ;;  %v1037_v55 = vshll.u32 %v983_v59, 16  ;;  %v1953_v58 = vshrl.u32 %v5113_v45, 16  ;;  %v1477_v62 = vld [vmem:[#allocation2 + $0xc] sm:$0xe] }
  0x76   : > { %1325 = vmatmul.bf16.gmra.mxu3 %v1225_v48  ;;  %v1024_v9 = vor.u32 %v1023_v19, %v1020_v14  ;;  %v1942_v4 = vrot.slane %v1940_v29, 4  ;;  %v1945_v5 = vrot.slane %v1943_v50, 5  ;;  %v1951_v16 = vrot.slane %v1949_v25, 5  ;;  %v5125_v27 = vld [vmem:[#allocation2 + $0x14] sm:$0x1]  ;;  %v4272_v43 = vld [vmem:[#allocation2 + $0xc] sm:$0xff] }
  0x77   : > { %v1034_v60 = vor.u32 %v1033_v12, %v1029_v51  ;;  %v1039_v61 = vrot.slane %v1037_v55, 5  ;;  %v1955_v22 = vrot.slane %v1953_v58, 4  ;;  %v1512_v23 = vrot.slane %v953_v44, 5  ;;  %v4302_v11 = vld [vmem:[%s5754_s5 + $0x170] sm:$0xff]  ;;  %v5140_v29 = vld [vmem:[#allocation2 + $0x1c] sm:$0xf] }
  0x78   : > { %v1025_v3 = vrot.slane %v1024_v9, 4  ;;  %v3813_v31 = vrot.slane %v1477_v62, 9  ;;  %v1515_v32 = vrot.slane %v983_v59, 5  ;;  %v1946_v34 = vor.u32 %v1945_v5, %v1942_v4  ;;  %v4334_v39 = vld [vmem:[%s5754_s5 + $0x230] sm:$0xff]  ;;  %2479 = vmatpush.bf16.msra.mxu1 %v4302_v11  ;;  %v4325_v9 = vld [vmem:[%s5754_s5 + $0x1e8] sm:$0xff] }
  0x79   : > { %v1035_v35 = vrot.slane %v1034_v60, 4  ;;  %1664 = vmatmul.bf16.vlgmr.msrb.gmra.mxu2 %v1592_v56  ;;  %v1514_v13 = vrot.slane %v1512_v23, 4  ;;  %v1956_v36 = vor.u32 %v1955_v22, %v1951_v16  ;;  %v1959_v18 = vshll.u32 %v5125_v27, 16  ;;  %3302 = vmatpush.bf16.msra.mxu0 %v4334_v39  ;;  %v4317_v56 = vld [vmem:[%s5754_s5 + $0x1a8] sm:$0xff] }
  0x7a   : > { %v1030_v24 = vsel %vm4841_vm12, %v1025_v3, %v1029_v51  ;;  %v1513_v53 = vsel %vm5093_vm15, %v3813_v31, %v1512_v23  ;;  %v1947_v8 = vrot.slane %v1946_v34, 4  ;;  %v1964_v48 = vshrl.u32 %v1918_v10, 16  ;;  %2675 = vmatpush.bf16.msra.mxu2 %v4317_v56  ;;  %3053 = vmatpush.bf16.msra.mxu3 %v4325_v9  ;;  %v5155_v3 = vld [vmem:[#allocation2 + $0x20] sm:$0x1] }
  0x7b   : > { %v1040_v1 = vsel %vm4841_vm12, %v1035_v35, %v1039_v61  ;;  %v1204_v63 = vunpack.c.l.b16 %v1030_v24  ;;  %v1516_v20 = vsel %vm5093_vm15, %v1514_v13, %v1515_v32  ;;  %v1957_v44 = vrot.slane %v1956_v36, 4  ;;  %v4333_v13 = vld [vmem:[%s5754_s5 + $0x228] sm:$0xff] }
  0x7c   : > { %v1205_v30 = vunpack.c.l.b16 %v1040_v1  ;;  %v1961_v54 = vrot.slane %v1959_v18, 5  ;;  %v1578_v40 = vunpack.c.l.b16 %v1513_v53  ;;  %v1579_v42 = vunpack.c.l.b16 %v1516_v20  ;;  %v1479_v20 = vld [vmem:[#allocation2 + $0x24] sm:$0xe] }
  0x7d   : > { %v1967_v59 = vshll.u32 %v1918_v10, 16  ;;  %v1952_v14 = vsel %vm4841_vm12, %v1947_v8, %v1951_v16  ;;  %v1973_v51 = vshll.u32 %v5140_v29, 16  ;;  %v1977_v12 = vshrl.u32 %v5140_v29, 16  ;;  %v4242_v16 = vld [vmem:[#allocation2 + $0x18] sm:$0xff]  ;;  %3303 = vmatpush.bf16.msra.mxu0 %v4333_v13 }
  0x7e   : > { %v1219_v38 = vpack.c.b16 %v1205_v30, %v1204_v63  ;;  %v1962_v19 = vsel %vm4841_vm12, %v1957_v44, %v1961_v54  ;;  %v1593_v50 = vpack.c.b16 %v1579_v42, %v1578_v40  ;;  %v1519_v55 = vrot.slane %v4825_v21, 5  ;;  %v1921_v63 = vld [vmem:[#allocation2 + $0x24] sm:$0xf]  ;;  %v4273_v8 = vld [vmem:[#allocation2 + $0x18] sm:$0xff] }
  0x7f   : > { %1440 = vmatmul.bf16.gmra.mxu1 %v4241_v33  ;;  %v1966_v25 = vrot.slane %v1964_v48, 4  ;;  %v1969_v58 = vrot.slane %v1967_v59, 5  ;;  %v2148_v37 = vunpack.c.l.b16 %v1952_v14  ;;  %v2149_v60 = vunpack.c.l.b16 %v1962_v19  ;;  %v5163_v33 = vld [vmem:[#allocation2 + $0x28] sm:$0xf]  ;;  %v4316_v19 = vld [vmem:[%s5754_s5 + $0x1a0] sm:$0xff] }
  0x80   : > { %1295 = vmatmul.bf16.gmra.mxu0 %v1219_v38  ;;  %v1975_v61 = vrot.slane %v1973_v51, 5  ;;  %v1979_v62 = vrot.slane %v1977_v12, 4  ;;  %v3814_v21 = vrot.slane %v1478_v17, 9  ;;  %v1521_v4 = vrot.slane %v1519_v55, 4  ;;  %2676 = vmatpush.bf16.msra.mxu2 %v4316_v19  ;;  %v5189_v17 = vld [vmem:[#allocation2 + $0x2c] sm:$0x1] }
  0x81   : > { %v1522_v5 = vrot.slane %v4828_v26, 5  ;;  %v1970_v35 = vor.u32 %v1969_v58, %v1966_v25  ;;  %v2164_v22 = vpack.c.b16 %v2149_v60, %v2148_v37  ;;  %v1983_v24 = vshll.u32 %v5155_v3, 16  ;;  %v4301_v26 = vld [vmem:[%s5754_s5 + $0x168] sm:$0xff] }
  0x82   : > { %v1980_v23 = vor.u32 %v1979_v62, %v1975_v61  ;;  %v1520_v31 = vsel %vm5093_vm15, %v3814_v21, %v1519_v55  ;;  %v1526_v30 = vrot.slane %v4968_v46, 5  ;;  %v1529_v34 = vrot.slane %v4972_v0, 5  ;;  %2480 = vmatpush.bf16.msra.mxu1 %v4301_v26  ;;  %v4243_v37 = vld [vmem:[#allocation2 + $0x24] sm:$0xff] }
  0x83   : > { %v1523_v32 = vsel %vm5093_vm15, %v1521_v4, %v1522_v5  ;;  %v1971_v1 = vrot.slane %v1970_v35, 4  ;;  %v1985_v18 = vrot.slane %v1983_v24, 5  ;;  %v1580_v38 = vunpack.c.l.b16 %v1520_v31  ;;  %v4300_v4 = vld [vmem:[%s5754_s5 + $0x160] sm:$0xff]  ;;  %v5198_v31 = vld [vmem:[#allocation2 + $0x34] sm:$0xf] }
  0x84   : > { %v1981_v36 = vrot.slane %v1980_v23, 4  ;;  %v1581_v53 = vunpack.c.l.b16 %v1523_v32  ;;  %v3815_v10 = vrot.slane %v1479_v20, 9  ;;  %v1528_v11 = vrot.slane %v1526_v30, 4  ;;  %v4332_v5 = vld [vmem:[%s5754_s5 + $0x220] sm:$0xff]  ;;  %v1924_v23 = vld [vmem:[#allocation2 + $0x30] sm:$0xf] }
  0x85   : > { %v1988_v39 = vshrl.u32 %v1921_v63, 16  ;;  %v1991_v44 = vshll.u32 %v1921_v63, 16  ;;  %v1997_v54 = vshll.u32 %v5163_v33, 16  ;;  %v1976_v40 = vsel %vm4841_vm12, %v1971_v1, %v1975_v61  ;;  %v4274_v24 = vld [vmem:[#allocation2 + $0x24] sm:$0xff]  ;;  %3304 = vmatpush.bf16.msra.mxu0 %v4332_v5 }
  0x86   : > { %1858 = vmatmul.bf16.vlgmr.msrb.gmra.mxu3 %v4272_v43  ;;  %v2001_v46 = vshrl.u32 %v5163_v33, 16  ;;  %v1527_v0 = vsel %vm5093_vm15, %v3815_v10, %v1526_v30  ;;  %v1530_v42 = vsel %vm5093_vm15, %v1528_v11, %v1529_v34  ;;  %v1986_v43 = vsel %vm4841_vm12, %v1981_v36, %v1985_v18  ;;  %2481 = vmatpush.bf16.msra.mxu1 %v4300_v4  ;;  %v4496_v34 = vld [vmem:[#allocation2 + $0x34] sm:$0xf]  ;;  %v4315_v18 = vld [vmem:[%s5754_s5 + $0x198] sm:$0xff] }
  0x87   : > { %v1594_v48 = vpack.c.b16 %v1581_v53, %v1580_v38  ;;  %v1582_v59 = vunpack.c.l.b16 %v1527_v0  ;;  %v1583_v14 = vunpack.c.l.b16 %v1530_v42  ;;  %v2150_v12 = vunpack.c.l.b16 %v1976_v40  ;;  %v4323_v38 = vld [vmem:[%s5754_s5 + $0x1d8] sm:$0xff]  ;;  %v1480_v53 = vld [vmem:[#allocation2 + $0x30] sm:$0xe]  ;;  %2677 = vmatpush.bf16.msra.mxu2 %v4315_v18 }
  0x88   : > { %v2151_v55 = vunpack.c.l.b16 %v1986_v43  ;;  %v1990_v56 = vrot.slane %v1988_v39, 4  ;;  %v1993_v9 = vrot.slane %v1991_v44, 5  ;;  %v1999_v25 = vrot.slane %v1997_v54, 5  ;;  %v5212_v54 = vld [vmem:[#allocation2 + $0x38] sm:$0x1]  ;;  %v4244_v43 = vld [vmem:[#allocation2 + $0x30] sm:$0xff] }
  0x89   : > { %1669 = vmatmul.bf16.gmra.mxu2 %v1593_v50  ;;  %v4324_v50 = vld [vmem:[%s5754_s5 + $0x1e0] sm:$0xff]  ;;  %v1595_v51 = vpack.c.b16 %v1583_v14, %v1582_v59  ;;  %v2003_v58 = vrot.slane %v2001_v46, 4  ;;  %v2007_v21 = vshll.u32 %v5189_v17, 16  ;;  %v2012_v32 = vshrl.u32 %v1924_v23, 16  ;;  %v4497_v0 = vld [vmem:[#allocation2 + $0x38] sm:$0x1] }
  0x8a   : > { %3054 = vmatpush.bf16.msra.mxu3 %v4324_v50  ;;  %v2165_v60 = vpack.c.b16 %v2151_v55, %v2150_v12  ;;  %v1994_v61 = vor.u32 %v1993_v9, %v1990_v56  ;;  %v2015_v1 = vshll.u32 %v1924_v23, 16  ;;  %v2021_v13 = vshll.u32 %v5198_v31, 16  ;;  %v1927_v55 = vld [vmem:[#allocation2 + $0x3c] sm:$0xf] }
  0x8b   : > { %v2004_v62 = vor.u32 %v2003_v58, %v1999_v25  ;;  %v2025_v30 = vshrl.u32 %v5198_v31, 16  ;;  %v1533_v36 = vrot.slane %v4496_v34, 5  ;;  %v2014_v10 = vrot.slane %v2012_v32, 4  ;;  %v4299_v56 = vld [vmem:[%s5754_s5 + $0x158] sm:$0xff]  ;;  %v4314_v32 = vld [vmem:[%s5754_s5 + $0x190] sm:$0xff] }
  0x8c   : > { %v1995_v35 = vrot.slane %v1994_v61, 4  ;;  %v2017_v11 = vrot.slane %v2015_v1, 5  ;;  %v2023_v39 = vrot.slane %v2021_v13, 5  ;;  %v3816_v40 = vrot.slane %v1480_v53, 9  ;;  %v4331_v9 = vld [vmem:[%s5754_s5 + $0x218] sm:$0xff]  ;;  %2482 = vmatpush.bf16.msra.mxu1 %v4299_v56  ;;  %v4322_v1 = vld [vmem:[%s5754_s5 + $0x1d0] sm:$0xff]  ;;  %2678 = vmatpush.bf16.msra.mxu2 %v4314_v32 }
  0x8d   : > { %v2027_v44 = vrot.slane %v2025_v30, 4  ;;  %v1535_v46 = vrot.slane %v1533_v36, 4  ;;  %v1536_v42 = vrot.slane %v4497_v0, 5  ;;  %v2031_v19 = vshll.u32 %v5212_v54, 16  ;;  %v5225_v61 = vld [vmem:[#allocation2 + $0x40] sm:$0xf]  ;;  %3305 = vmatpush.bf16.msra.mxu0 %v4331_v9 }
  0x8e   : > { %v2000_v63 = vsel %vm4841_vm12, %v1995_v35, %v1999_v25  ;;  %3055 = vmatpush.bf16.msra.mxu3 %v4323_v38  ;;  %v2018_v59 = vor.u32 %v2017_v11, %v2014_v10  ;;  %v1534_v50 = vsel %vm5093_vm15, %v3816_v40, %v1533_v36  ;;  %v2039_v4 = vshll.u32 %v1927_v55, 16  ;;  %v1481_v13 = vld [vmem:[#allocation2 + $0x3c] sm:$0xe]  ;;  %v5240_v36 = vld [vmem:[#allocation2 + $0x44] sm:$0x1]  ;;  %v4298_v9 = vld [vmem:[%s5754_s5 + $0x150] sm:$0xff] }
  0x8f   : > { %1445 = vmatmul.bf16.gmra.mxu1 %v4242_v16  ;;  %v2005_v16 = vrot.slane %v2004_v62, 4  ;;  %v2152_v20 = vunpack.c.l.b16 %v2000_v63  ;;  %v2028_v14 = vor.u32 %v2027_v44, %v2023_v39  ;;  %v2033_v58 = vrot.slane %v2031_v19, 5  ;;  %v4275_v62 = vld [vmem:[#allocation2 + $0x30] sm:$0xff]  ;;  %v4422_v53 = vld [vmem:[%s4670_s12 + $0x38] sm:$0xff]   ;;  %v1930_v56 = vld [vmem:[#allocation2 + $0x48] sm:$0xf]  ;;  %s442_s12 = sadd.s32 %s3691_s10, %s4635_s14 }
  0x90   : > { %2236 = vmatmul.bf16.vlgmr.msrb.gmra.mxu0 %v2164_v22  ;;  %v2009_v22 = vrot.slane %v2007_v21, 5  ;;  %v2019_v12 = vrot.slane %v2018_v59, 4  ;;  %v2036_v21 = vshrl.u32 %v1927_v55, 16  ;;  %v2045_v5 = vshll.u32 %v5225_v61, 16  ;;  %v4245_v40 = vld [vmem:[#allocation2 + $0x3c] sm:$0xff]  ;;  %2483 = vmatpush.bf16.msra.mxu1 %v4298_v9  ;;  %v4246_v9 = vld [vmem:[#allocation2 + $0x48] sm:$0xff] }
  0x91   : > { %v2029_v25 = vrot.slane %v2028_v14, 4  ;;  %v2049_v35 = vshrl.u32 %v5225_v61, 16  ;;  %v4366_v10 = vunpack.c.l.bf16 %v4422_v53  ;;  %v4367_v11 = vunpack.c.h.bf16 %v4422_v53  ;;  %v5259_v14 = vld [vmem:[%s5750_s1] ss:$0 sm:$0xff]  ;;  %s3693_s23 = sshll.u32 %s442_s12, 2  ;;  %s467_s12 = scalar_lea.vmem %s5756_s7, %s3699_s22 }
  0x92   : > { %v2010_v26 = vsel %vm4841_vm12, %v2005_v16, %v2009_v22  ;;  %v2024_v16 = vsel %vm4841_vm12, %v2019_v12, %v2023_v39  ;;  %v2038_v63 = vrot.slane %v2036_v21, 4  ;;  %v2047_v18 = vrot.slane %v2045_v5, 5  ;;  %3056 = vmatpush.bf16.msra.mxu3 %v4322_v1  ;;  %v636_v21 = vld [vmem:[#allocation2 + $0x60] sm:$0x1]  ;;  %v5269_v5 = vld [vmem:[#allocation2 + $0x4c] sm:$0xf]  ;;  %s444_s9 = scalar_lea.vmem %s5753_s4, %s3693_s23 }
  0x93   : > { %v2034_v22 = vsel %vm4841_vm12, %v2029_v25, %v2033_v58  ;;  %v2154_v30 = vunpack.c.l.b16 %v2024_v16  ;;  %v2051_v38 = vrot.slane %v2049_v35, 4  ;;  %v2055_v44 = vshll.u32 %v5240_v36, 16  ;;  %v4330_v25 = vld [vmem:[%s5754_s5 + $0x210] sm:$0xff] }
  0x94   : > { %v2155_v34 = vunpack.c.l.b16 %v2034_v22  ;;  %3306 = vmatpush.bf16.msra.mxu0 %v4330_v25  ;;  %v2060_v16 = vshrl.u32 %v1930_v56, 16  ;;  %v637_v1 = vsel %vm4630_vm2, 0, %v636_v21 }
  0x95   : > { %v2052_v0 = vor.u32 %v2051_v38, %v2047_v18  ;;  %v2057_v12 = vrot.slane %v2055_v44, 5  ;;  %638 = vst [vmem:[#allocation2 + $0x60] sm:$0x1] %v637_v1  ;;  %v4321_v38 = vld [vmem:[%s5754_s5 + $0x1c8] sm:$0xff] }
  0x96   : > { %1863 = vmatmul.bf16.gmra.mxu3 %v4273_v8  ;;  %v2153_v8 = vunpack.c.l.b16 %v2010_v26  ;;  %v2041_v26 = vrot.slane %v2039_v4, 5  ;;  %v4276_v4 = vld [vmem:[#allocation2 + $0x3c] sm:$0xff] }
  0x97   : > { %v2053_v55 = vrot.slane %v2052_v0, 4  ;;  %3057 = vmatpush.bf16.msra.mxu3 %v4321_v38 }
  0x98   : > { %v2042_v39 = vor.u32 %v2041_v26, %v2038_v63  ;;  %v2069_v26 = vshll.u32 %v5269_v5, 16 }
  0x99   : > { %1674 = vmatmul.bf16.gmra.mxu2 %v1594_v48  ;;  %v2166_v48 = vpack.c.b16 %v2153_v8, %v2152_v20  ;;  %v3817_v20 = vrot.slane %v1481_v13, 9  ;;  %v2073_v13 = vshrl.u32 %v5269_v5, 16 }
  0x9c   : > { %v943_v21 = vld [vmem:[#allocation2 + $0x60] sm:$0xf] }
  0x9f   : > { %1450 = vmatmul.bf16.gmra.mxu1 %v4243_v37  ;;  %v1584_v37 = vunpack.c.l.b16 %v1534_v50 }
  0xa0   : > { %2241 = vmatmul.bf16.gmra.mxu0 %v2165_v60 }
  0xa6   : > { %1868 = vmatmul.bf16.gmra.mxu3 %v4274_v24  ;;  %v1540_v24 = vrot.slane %v5014_v41, 5  ;;  %v1543_v41 = vrot.slane %v5016_v47, 5 }
  0xa8   : > { %v1542_v8 = vrot.slane %v1540_v24, 4 }
  0xa9   : > { %1679 = vmatmul.bf16.gmra.mxu2 %v1595_v51  ;;  %v1537_v51 = vsel %vm5093_vm15, %v1535_v46, %v1536_v42  ;;  %v2167_v46 = vpack.c.b16 %v2155_v34, %v2154_v30  ;;  %v5248_v42 = vld [vmem:[%s5749_s0] ss:$0 sm:$0xff]  ;;  %v4500_v30 = vld [vmem:[#allocation2 + $0x4c] sm:$0xf] }
  0xaa   : > { %v1585_v60 = vunpack.c.l.b16 %v1537_v51  ;;  %v521_v47 = vmul.f32 %v5248_v42, %v4367_v11  ;;  %v1544_v59 = vsel %vm5093_vm15, %v1542_v8, %v1543_v41  ;;  %v2043_v51 = vrot.slane %v2042_v39, 4  ;;  %v668_v41 = vld [vmem:[#allocation2 + $0x68] sm:$0x1] }
  0xab   : > { %v1547_v34 = vrot.slane %v4500_v30, 5  ;;  %v2062_v8 = vrot.slane %v2060_v16, 4 }
  0xac   : > { %v1596_v23 = vpack.c.b16 %v1585_v60, %v1584_v37  ;;  %v540_v50 = vadd.f32 %v5259_v14, %v521_v47  ;;  %v1587_v60 = vunpack.c.l.b16 %v1544_v59  ;;  %v2048_v35 = vsel %vm4841_vm12, %v2043_v51, %v2047_v18  ;;  %v4313_v18 = vld [vmem:[%s5754_s5 + $0x188] sm:$0xff] }
  0xad   : > { %v2156_v53 = vunpack.c.l.b16 %v2048_v35  ;;  %2679 = vmatpush.bf16.msra.mxu2 %v4313_v18  ;;  %v2071_v47 = vrot.slane %v2069_v26, 5  ;;  %v1549_v51 = vrot.slane %v1547_v34, 4  ;;  %v4297_v26 = vld [vmem:[%s5754_s5 + $0x148] sm:$0xff] }
  0xae   : > { %2484 = vmatpush.bf16.msra.mxu1 %v4297_v26 }
  0xaf   : > { %1455 = vmatmul.bf16.gmra.mxu1 %v4244_v43  ;;  %v520_v43 = vmul.f32 %v5248_v42, %v4366_v10  ;;  %v1482_v10 = vld [vmem:[#allocation2 + $0x48] sm:$0xe] }
  0xb0   : > { %2246 = vmatmul.bf16.gmra.mxu0 %v2166_v48  ;;  %v1541_v48 = vsel %vm5093_vm15, %v3817_v20, %v1540_v24  ;;  %v2063_v24 = vshll.u32 %v1930_v56, 16 }
  0xb1   : > { %v539_v19 = vadd.f32 %v5259_v14, %v520_v43  ;;  %v1586_v37 = vunpack.c.l.b16 %v1541_v48  ;;  %v5287_v43 = vld [vmem:[#allocation2 + $0x50] sm:$0x1]  ;;  %v2075_v48 = vrot.slane %v2073_v13, 4  ;;  %v4329_v13 = vld [vmem:[%s5754_s5 + $0x208] sm:$0xff] }
  0xb2   : > { %v2065_v39 = vrot.slane %v2063_v24, 5  ;;  %v2079_v35 = vshll.u32 %v5287_v43, 16  ;;  %3307 = vmatpush.bf16.msra.mxu0 %v4329_v13 }
  0xb3   : > { %v555_v58 = vmax.f32 %v539_v19, 0.0  ;;  %v1597_v63 = vpack.c.b16 %v1587_v60, %v1586_v37  ;;  %v669_v19 = vsel %vm4650_vm4, 0, %v668_v41  ;;  %v5306_v41 = vld [vmem:[#allocation2 + $0x58] sm:$0xf] }
  0xb4   : > { %670 = vst [vmem:[#allocation2 + $0x68] sm:$0x1] %v669_v19  ;;  %v2066_v60 = vor.u32 %v2065_v39, %v2062_v8  ;;  %v1554_v19 = vrot.slane %v5073_v52, 5 }
  0xb5   : > { %v571_v22 = vpack.c.bf16 %v555_v58, %v555_v58 }
  0xb6   : > { %1873 = vmatmul.bf16.gmra.mxu3 %v4275_v62  ;;  %v556_v62 = vmax.f32 %v540_v50, 0.0  ;;  %v3818_v50 = vrot.slane %v1482_v10, 9  ;;  %v2067_v1 = vrot.slane %v2066_v60, 4  ;;  %v1556_v52 = vrot.slane %v1554_v19, 4 }
  0xb7   : > { %v853_v11 = vshrl.u32 %v571_v22, 16 }
  0xb8   : > { %v572_v32 = vpack.c.bf16 %v556_v62, %v556_v62 }
  0xb9   : > { %1684 = vmatmul.bf16.gmra.mxu2 %v1596_v23  ;;  %v2058_v23 = vsel %vm4841_vm12, %v2053_v55, %v2057_v12  ;;  %v855_v59 = vrot.slane %v853_v11, 7  ;;  %v4501_v12 = vld [vmem:[#allocation2 + $0x50] sm:$0x1] }
  0xba   : > { %v2157_v20 = vunpack.c.l.b16 %v2058_v23  ;;  %v5285_v44 = vpop.f32.mrf.mxu1  ;;  %v864_v0 = vshll.u32 %v572_v32, 16  ;;  %v1550_v55 = vrot.slane %v4501_v12, 5 }
  0xbb   : > { %v859_v58 = vrot.slane %v855_v59, 4 }
  0xbc   : > { %v2168_v37 = vpack.c.b16 %v2157_v20, %v2156_v53  ;;  %v1551_v23 = vsel %vm5093_vm15, %v1549_v51, %v1550_v55  ;;  %v947_v53 = vld [vmem:[#allocation2 + $0x68] sm:$0x1]  ;;  %v4312_v51 = vld [vmem:[%s5754_s5 + $0x180] sm:$0xff] }
  0xbd   : > { %v1589_v38 = vunpack.c.l.b16 %v1551_v23  ;;  %v4277_v20 = vld [vmem:[#allocation2 + $0x48] sm:$0xff]  ;;  %2680 = vmatpush.bf16.msra.mxu2 %v4312_v51 }
  0xbe   : > { %v2293_v51 = vld [vmem:[#allocation2 + $0xc] sm:$0xe] }
  0xbf   : > { %1460 = vmatmul.bf16.gmra.mxu1 %v4245_v40  ;;  %v856_v40 = vshll.u32 %v571_v22, 16  ;;  %v1548_v22 = vsel %vm5093_vm15, %v3818_v50, %v1547_v34  ;;  %v2081_v34 = vrot.slane %v2079_v35, 5  ;;  %v1483_v50 = vld [vmem:[#allocation2 + $0x54] sm:$0xe] }
  0xc0   : > { %2251 = vmatmul.bf16.gmra.mxu0 %v2167_v46  ;;  %v861_v46 = vshrl.u32 %v572_v32, 16  ;;  %v1588_v18 = vunpack.c.l.b16 %v1548_v22  ;;  %v3819_v60 = vrot.slane %v1483_v50, 9 }
  0xc1   : > { %v858_v25 = vor.u32 %v856_v40, %v855_v59  ;;  %v2093_v40 = vshll.u32 %v5306_v41, 16 }
  0xc2   : > { %v863_v56 = vrot.slane %v861_v46, 7  ;;  %v5308_v8 = vpop.f32.mrf.mxu1  ;;  %v2097_v46 = vshrl.u32 %v5306_v41, 16  ;;  %v1598_v59 = vpack.c.b16 %v1589_v38, %v1588_v18  ;;  %v4296_v38 = vld [vmem:[%s5754_s5 + $0x140] sm:$0xff] }
  0xc3   : > { %v944_v16 = vsel %vm4739_vm8, %v858_v25, %v943_v21  ;;  %v5322_v25 = vpop.f32.mrf.mxu2  ;;  %2485 = vmatpush.bf16.msra.mxu1 %v4296_v38 }
  0xc4   : > { %v866_v62 = vor.u32 %v864_v0, %v863_v56  ;;  %v868_v32 = vrot.slane %v863_v56, 4  ;;  %945 = vst [vmem:[#allocation2 + $0x60] sm:$0xf] %v944_v16  ;;  %v2072_v0 = vsel %vm4841_vm12, %v2067_v1, %v2071_v47  ;;  %v4320_v1 = vld [vmem:[%s5754_s5 + $0x1c0] sm:$0xff] }
  0xc5   : > { %v2158_v56 = vunpack.c.l.b16 %v2072_v0  ;;  %3058 = vmatpush.bf16.msra.mxu3 %v4320_v1  ;;  %v2327_v0 = vrot.slane %v5113_v45, 5 }
  0xc6   : > { %1878 = vmatmul.bf16.gmra.mxu3 %v4276_v4  ;;  %v2076_v4 = vor.u32 %v2075_v48, %v2071_v47  ;;  %v867_v24 = vsel %vm4733_vm7, %v859_v58, %v866_v62  ;;  %v948_v10 = vsel %vm4630_vm2, %v868_v32, %v947_v53  ;;  %v2095_v58 = vrot.slane %v2093_v40, 5 }
  0xc7   : > { %946 = vst [vmem:[#allocation2 + $0x64] sm:$0xf] %v867_v24  ;;  %v2099_v47 = vrot.slane %v2097_v46, 4  ;;  %v1557_v62 = vrot.slane %v5078_v57, 5  ;;  %v1555_v24 = vsel %vm5093_vm15, %v3819_v60, %v1554_v19  ;;  %v2329_v45 = vrot.slane %v2327_v0, 4 }
  0xc8   : > { %v2077_v30 = vrot.slane %v2076_v4, 4  ;;  %949 = vst [vmem:[#allocation2 + $0x68] sm:$0x1] %v948_v10  ;;  %v4247_v4 = vld [vmem:[#allocation2 + $0x54] sm:$0xff] }
  0xc9   : > { %1689 = vmatmul.bf16.gmra.mxu2 %v1597_v63  ;;  %v1933_v63 = vld [vmem:[#allocation2 + $0x54] sm:$0xf]  ;;  %v2100_v16 = vor.u32 %v2099_v47, %v2095_v58  ;;  %v1558_v32 = vsel %vm5093_vm15, %v1556_v52, %v1557_v62  ;;  %v2738_v62 = vld [vmem:[#allocation2 + $0x18] sm:$0xf] }
  0xca   : > { %v2084_v11 = vshrl.u32 %v1933_v63, 16  ;;  %v2087_v39 = vshll.u32 %v1933_v63, 16  ;;  %v2082_v48 = vsel %vm4841_vm12, %v2077_v30, %v2081_v34  ;;  %v1590_v30 = vunpack.c.l.b16 %v1555_v24  ;;  %v4278_v10 = vld [vmem:[#allocation2 + $0x54] sm:$0xff] }
  0xcb   : > { %v1936_v63 = vld [vmem:[#allocation2 + $0x60] sm:$0xf]  ;;  %v2101_v26 = vrot.slane %v2100_v16, 4  ;;  %v1591_v34 = vunpack.c.l.b16 %v1558_v32 }
  0xcc   : > { %v2086_v12 = vrot.slane %v2084_v11, 4  ;;  %v2089_v55 = vrot.slane %v2087_v39, 5  ;;  %v2108_v53 = vshrl.u32 %v1936_v63, 16  ;;  %v5342_v11 = vpop.f32.mrf.mxu2  ;;  %v2330_v39 = vrot.slane %v5125_v27, 5 }
  0xcd   : > { %v1599_v19 = vpack.c.b16 %v1591_v34, %v1590_v30 }
  0xce   : > { %v2090_v21 = vor.u32 %v2089_v55, %v2086_v12  ;;  %v5337_v18 = vld [vmem:[#allocation2 + $0x64] sm:$0xf]  ;;  %v5354_v12 = vpop.f32.mrf.mxu3  ;;  %v2110_v55 = vrot.slane %v2108_v53, 4  ;;  %v2331_v52 = vsel %vm5093_vm15, %v2329_v45, %v2330_v39 }
  0xcf   : > { %1465 = vmatmul.bf16.gmra.mxu1 %v4246_v9  ;;  %v2159_v9 = vunpack.c.l.b16 %v2082_v48  ;;  %v2117_v40 = vshll.u32 %v5337_v18, 16  ;;  %v2121_v46 = vshrl.u32 %v5337_v18, 16  ;;  %v5365_v16 = vld [vmem:[#allocation2 + $0x68] sm:$0x1]  ;;  %v2399_v24 = vunpack.c.l.b16 %v2331_v52 }
  0xd0   : > { %2256 = vmatmul.bf16.gmra.mxu0 %v2168_v37  ;;  %v5324_v37 = vld [vmem:[#allocation2 + $0x5c] sm:$0x1]  ;;  %v2091_v57 = vrot.slane %v2090_v21, 4  ;;  %v2127_v34 = vshll.u32 %v5365_v16, 16 }
  0xd1   : > { %v2169_v35 = vpack.c.b16 %v2159_v9, %v2158_v56  ;;  %v2103_v22 = vshll.u32 %v5324_v37, 16  ;;  %v4328_v56 = vld [vmem:[%s5754_s5 + $0x200] sm:$0xff]  ;;  %v3996_v9 = vrot.slane %v2293_v51, 9  ;;  %v2119_v47 = vrot.slane %v2117_v40, 5  ;;  %v5363_v21 = vld [vmem:[#allocation2 + $0x1c] sm:$0xf] }
  0xd2   : > { %v2096_v48 = vsel %vm4841_vm12, %v2091_v57, %v2095_v58  ;;  %v2123_v58 = vrot.slane %v2121_v46, 4  ;;  %3308 = vmatpush.bf16.msra.mxu0 %v4328_v56  ;;  %v2766_v57 = vshll.u32 %v2738_v62, 16 }
  0xd3   : > { %v2105_v13 = vrot.slane %v2103_v22, 5  ;;  %v2328_v60 = vsel %vm5093_vm15, %v3996_v9, %v2327_v0  ;;  %v4279_v9 = vld [vmem:[#allocation2 + $0x60] sm:$0xff] }
  0xd4   : > { %v2398_v22 = vunpack.c.l.b16 %v2328_v60  ;;  %v2124_v30 = vor.u32 %v2123_v58, %v2119_v47  ;;  %v2768_v0 = vrot.slane %v2766_v57, 5 }
  0xd6   : > { %1883 = vmatmul.bf16.gmra.mxu3 %v4277_v20  ;;  %v2111_v20 = vshll.u32 %v1936_v63, 16  ;;  %v2763_v63 = vshrl.u32 %v2738_v62, 16  ;;  %v2414_v38 = vpack.c.b16 %v2399_v24, %v2398_v22  ;;  %v2125_v51 = vrot.slane %v2124_v30, 4  ;;  %v5385_v30 = vld [vmem:[#allocation2 + $0x28] sm:$0xf] }
  0xd7   : > { %v1291_v32 = vpop.f32.mrf.mxu0 }
  0xd8   : > { %v2113_v27 = vrot.slane %v2111_v20, 5  ;;  %v2765_v46 = vrot.slane %v2763_v63, 4  ;;  %v4304_v63 = vld [vmem:[#allocation2 + $0x18] sm:$0xff] }
  0xd9   : > { %1694 = vmatmul.bf16.gmra.mxu2 %v1598_v59  ;;  %v2106_v59 = vsel %vm4841_vm12, %v2101_v26, %v2105_v13  ;;  %v2772_v26 = vshll.u32 %v5363_v21, 16  ;;  %v2776_v13 = vshrl.u32 %v5363_v21, 16 }
  0xda   : > { %v2114_v1 = vor.u32 %v2113_v27, %v2110_v55  ;;  %v2129_v55 = vrot.slane %v2127_v34, 5  ;;  %v5374_v27 = vld [vmem:[#allocation2 + $0x20] sm:$0x1]  ;;  %v2769_v45 = vor.u32 %v2768_v0, %v2765_v46 }
  0xdb   : > { %v2782_v60 = vshll.u32 %v5374_v27, 16 }
  0xdc   : > { %v5328_v23 = vpop.f32.mrf.mxu1  ;;  %v2115_v39 = vrot.slane %v2114_v1, 4  ;;  %v2130_v62 = vsel %vm4841_vm12, %v2125_v51, %v2129_v55  ;;  %v2741_v1 = vld [vmem:[#allocation2 + $0x24] sm:$0xf]  ;;  %v2796_v55 = vshll.u32 %v5385_v30, 16 }
  0xdd   : > { %v2163_v34 = vunpack.c.l.b16 %v2130_v62  ;;  %v2787_v46 = vshrl.u32 %v2741_v1, 16  ;;  %v2790_v0 = vshll.u32 %v2741_v1, 16 }
  0xde   : > { %v2120_v56 = vsel %vm4841_vm12, %v2115_v39, %v2119_v47 }
  0xdf   : > { %1470 = vmatmul.bf16.gmra.mxu1 %v4247_v4  ;;  %v2160_v4 = vunpack.c.l.b16 %v2096_v48  ;;  %v2774_v48 = vrot.slane %v2772_v26, 5  ;;  %v1293_v52 = vpop.f32.mrf.mxu0  ;;  %v2792_v1 = vrot.slane %v2790_v0, 5 }
  0xe0   : > { %2261 = vmatmul.bf16.gmra.mxu0 %v2169_v35  ;;  %v2161_v35 = vunpack.c.l.b16 %v2106_v59  ;;  %v2778_v59 = vrot.slane %v2776_v13, 4  ;;  %v2337_v13 = vrot.slane %v5155_v3, 5  ;;  %v2800_v3 = vshrl.u32 %v5385_v30, 16 }
  0xe2   : > { %v2170_v53 = vpack.c.b16 %v2161_v35, %v2160_v4  ;;  %v2779_v58 = vor.u32 %v2778_v59, %v2774_v48  ;;  %v2334_v4 = vrot.slane %v5140_v29, 5  ;;  %v2162_v35 = vunpack.c.l.b16 %v2120_v56 }
  0xe4   : > { %v5352_v50 = vpop.f32.mrf.mxu1  ;;  %v2336_v26 = vrot.slane %v2334_v4, 4 }
  0xe6   : > { %1888 = vmatmul.bf16.gmra.mxu3 %v4278_v10  ;;  %v2338_v39 = vsel %vm5093_vm15, %v2336_v26, %v2337_v13  ;;  %v2802_v26 = vrot.slane %v2800_v3, 4 }
  0xe7   : > { %v2401_v51 = vunpack.c.l.b16 %v2338_v39 }
  0xe9   : > { %1699 = vmatmul.bf16.gmra.mxu2 %v1599_v19  ;;  %v5372_v19 = vpop.f32.mrf.mxu3 }
  0xec   : > { %v5370_v20 = vpop.f32.mrf.mxu2  ;;  %v1436_v10 = vpop.f32.mrf.mxu1 }
  0xed   : > { %v1437_v40 = vadd.f32 %v1436_v10, %v1291_v32  ;;  %v2294_v32 = vld [vmem:[#allocation2 + $0x18] sm:$0xe]  ;;  %v2784_v10 = vrot.slane %v2782_v60, 5  ;;  %v3150_v60 = vrot.slane %v5363_v21, 5  ;;  %v3153_v21 = vrot.slane %v5374_v27, 5 }
  0xee   : > { %v3997_v47 = vrot.slane %v2294_v32, 9  ;;  %v2789_v32 = vrot.slane %v2787_v46, 4 }
  0xef   : > { %2486 = vmatmul.bf16.vlgmr.msra.gmra.mxu1 %v2414_v38  ;;  %v2770_v38 = vrot.slane %v2769_v45, 4  ;;  %v3152_v39 = vrot.slane %v3150_v60, 4 }
  0xf0   : > { %2266 = vmatmul.bf16.gmra.mxu0 %v2170_v53  ;;  %v2780_v53 = vrot.slane %v2779_v58, 4  ;;  %v2335_v29 = vsel %vm5093_vm15, %v3997_v47, %v2334_v4  ;;  %v3116_v4 = vld [vmem:[#allocation2 + $0x18] sm:$0xe]  ;;  %v2798_v47 = vrot.slane %v2796_v55, 5 }
  0xf1   : > { %v2400_v59 = vunpack.c.l.b16 %v2335_v29  ;;  %v2775_v45 = vsel %vm4841_vm12, %v2770_v38, %v2774_v48  ;;  %v4180_v38 = vrot.slane %v3116_v4, 9  ;;  %v3154_v55 = vsel %vm5093_vm15, %v3152_v39, %v3153_v21  ;;  %v5416_v39 = vld [vmem:[#allocation2 + $0x34] sm:$0xf] }
  0xf2   : > { %v2785_v58 = vsel %vm4841_vm12, %v2780_v53, %v2784_v10  ;;  %v2793_v53 = vor.u32 %v2792_v1, %v2789_v32  ;;  %v2803_v10 = vor.u32 %v2802_v26, %v2798_v47  ;;  %v2344_v26 = vrot.slane %v5189_v17, 5 }
  0xf4   : > { %v5382_v22 = vpop.f32.mrf.mxu2  ;;  %v1438_v24 = vpop.f32.mrf.mxu1 }
  0xf5   : > { %v1439_v57 = vadd.f32 %v1438_v24, %v1293_v52  ;;  %v2415_v52 = vpack.c.b16 %v2401_v51, %v2400_v59  ;;  %v2341_v51 = vrot.slane %v5163_v33, 5 }
  0xf6   : > { %1893 = vmatmul.bf16.gmra.mxu3 %v4279_v9  ;;  %v2171_v9 = vpack.c.b16 %v2163_v34, %v2162_v35  ;;  %v2971_v35 = vunpack.c.l.b16 %v2775_v45  ;;  %v2972_v34 = vunpack.c.l.b16 %v2785_v58  ;;  %v2794_v45 = vrot.slane %v2793_v53, 4 }
  0xf7   : > { %v2343_v1 = vrot.slane %v2341_v51, 4 }
  0xf8   : > { %v2987_v59 = vpack.c.b16 %v2972_v34, %v2971_v35  ;;  %v3222_v35 = vunpack.c.l.b16 %v3154_v55  ;;  %v2799_v17 = vsel %vm4841_vm12, %v2794_v45, %v2798_v47 }
  0xf9   : > { %v5393_v56 = vpop.f32.mrf.mxu3  ;;  %2681 = vmatmul.bf16.vlgmr.msra.gmra.mxu2 %v4304_v63  ;;  %v5400_v63 = vld [vmem:[#allocation2 + $0x2c] sm:$0x1] }
  0xfa   : > { %v2806_v46 = vshll.u32 %v5400_v63, 16 }
  0xfc   : > { %v1665_v62 = vpop.f32.mrf.mxu2  ;;  %v1441_v24 = vpop.f32.mrf.mxu1  ;;  %v2808_v58 = vrot.slane %v2806_v46, 5 }
  0xfd   : > { %v1296_v13 = vpop.f32.mrf.mxu0  ;;  %v1705_v29 = vadd.f32 %v1665_v62, %v1437_v40  ;;  %v3151_v40 = vsel %vm5093_vm15, %v4180_v38, %v3150_v60  ;;  %v2345_v38 = vsel %vm5093_vm15, %v2343_v1, %v2344_v26 }
  0xfe   : > { %v1442_v48 = vadd.f32 %v1441_v24, %v1296_v13  ;;  %v4305_v24 = vld [vmem:[#allocation2 + $0x24] sm:$0xff]  ;;  %v2744_v13 = vld [vmem:[#allocation2 + $0x30] sm:$0xf]  ;;  %v3221_v33 = vunpack.c.l.b16 %v3151_v40  ;;  %v2403_v53 = vunpack.c.l.b16 %v2345_v38 }
  0xff   : > { %2491 = vmatmul.bf16.gmra.mxu1 %v2415_v52  ;;  %v2295_v52 = vld [vmem:[#allocation2 + $0x24] sm:$0xe]  ;;  %v2811_v40 = vshrl.u32 %v2744_v13, 16  ;;  %v2814_v55 = vshll.u32 %v2744_v13, 16 }
 0x100   : > { %2271 = vmatmul.bf16.gmra.mxu0 %v2171_v9  ;;  %v2804_v9 = vrot.slane %v2803_v10, 4  ;;  %v3998_v32 = vrot.slane %v2295_v52, 9  ;;  %v3237_v52 = vpack.c.b16 %v3222_v35, %v3221_v33  ;;  %v5433_v35 = vld [vmem:[#allocation2 + $0x38] sm:$0x1] }
 0x101   : > { %v5404_v0 = vpop.f32.mrf.mxu3  ;;  %v2816_v13 = vrot.slane %v2814_v55, 5 }
 0x102   : > { %v2342_v34 = vsel %vm5093_vm15, %v3998_v32, %v2341_v51  ;;  %v2809_v46 = vsel %vm4841_vm12, %v2804_v9, %v2808_v58  ;;  %v3160_v9 = vrot.slane %v5400_v63, 5 }
 0x103   : > { %v2402_v21 = vunpack.c.l.b16 %v2342_v34  ;;  %v2974_v32 = vunpack.c.l.b16 %v2809_v46 }
 0x104   : > { %v1667_v3 = vpop.f32.mrf.mxu2  ;;  %v1443_v27 = vpop.f32.mrf.mxu1 }
 0x105   : > { %v1298_v62 = vpop.f32.mrf.mxu0  ;;  %v1706_v4 = vadd.f32 %v1667_v3, %v1439_v57  ;;  %v3157_v57 = vrot.slane %v5385_v30, 5  ;;  %v2820_v3 = vshll.u32 %v5416_v39, 16  ;;  %v2416_v30 = vpack.c.b16 %v2403_v53, %v2402_v21 }
 0x106   : > { %3059 = vmatmul.bf16.vlgmr.msra.gmra.mxu3 %v2987_v59  ;;  %v1444_v60 = vadd.f32 %v1443_v27, %v1298_v62  ;;  %v3117_v59 = vld [vmem:[#allocation2 + $0x24] sm:$0xe]  ;;  %v2824_v27 = vshrl.u32 %v5416_v39, 16  ;;  %v2973_v62 = vunpack.c.l.b16 %v2799_v17 }
 0x107   : > { %v3159_v26 = vrot.slane %v3157_v57, 4  ;;  %v5429_v38 = vrot.slane %v2820_v3, 5 }
 0x108   : > { %v2988_v53 = vpack.c.b16 %v2974_v32, %v2973_v62 }
 0x109   : > { %v1859_v10 = vpop.f32.mrf.mxu3  ;;  %2686 = vmatmul.bf16.gmra.mxu2 %v4305_v24  ;;  %v4181_v24 = vrot.slane %v3117_v59, 9  ;;  %v2830_v59 = vshll.u32 %v5433_v35, 16 }
 0x10a   : > { %v1899_v51 = vadd.f32 %v1859_v10, %v1705_v29  ;;  %v2813_v29 = vrot.slane %v2811_v40, 4  ;;  %v2826_v10 = vrot.slane %v2824_v27, 4  ;;  %v2348_v40 = vrot.slane %v5198_v31, 5 }
 0x10c   : > { %v1670_v1 = vpop.f32.mrf.mxu2  ;;  %v1446_v34 = vpop.f32.mrf.mxu1  ;;  %v2817_v17 = vor.u32 %v2816_v13, %v2813_v29  ;;  %v2827_v46 = vor.u32 %v2826_v10, %v5429_v38 }
 0x10d   : > { %v2237_v47 = vpop.f32.mrf.mxu0  ;;  %v1707_v45 = vadd.f32 %v1670_v1, %v1442_v48  ;;  %v5427_v58 = vadd.f32 %v1446_v34, %v5285_v44  ;;  %v3158_v48 = vsel %vm5093_vm15, %v4181_v24, %v3157_v57  ;;  %v3161_v44 = vsel %vm5093_vm15, %v3159_v26, %v3160_v9  ;;  %v4306_v57 = vld [vmem:[#allocation2 + $0x30] sm:$0xff]  ;;  %v5445_v26 = vld [vmem:[#allocation2 + $0x40] sm:$0xf] }
 0x10e   : > { %v5431_v33 = vadd.f32 %v2237_v47, %v1899_v51  ;;  %v3223_v51 = vunpack.c.l.b16 %v3158_v48  ;;  %v3224_v55 = vunpack.c.l.b16 %v3161_v44  ;;  %v2350_v24 = vrot.slane %v2348_v40, 4 }
 0x10f   : > { %2496 = vmatmul.bf16.gmra.mxu1 %v2416_v30  ;;  %v2747_v30 = vld [vmem:[#allocation2 + $0x3c] sm:$0xf]  ;;  %v2818_v34 = vrot.slane %v2817_v17, 4  ;;  %v2828_v31 = vrot.slane %v2827_v46, 4  ;;  %v2832_v47 = vrot.slane %v2830_v59, 5  ;;  %v2351_v9 = vrot.slane %v5212_v54, 5 }
 0x110   : > { %3309 = vmatmul.bf16.vlgmr.msra.gmra.mxu0 %v3237_v52  ;;  %v2296_v52 = vld [vmem:[#allocation2 + $0x30] sm:$0xe]  ;;  %v2835_v13 = vshrl.u32 %v2747_v30, 16  ;;  %v2844_v48 = vshll.u32 %v5445_v26, 16  ;;  %v3238_v46 = vpack.c.b16 %v3224_v55, %v3223_v51 }
 0x111   : > { %v1861_v21 = vpop.f32.mrf.mxu3  ;;  %v2823_v59 = vsel %vm4841_vm12, %v2818_v34, %v5429_v38 }
 0x112   : > { %v1900_v63 = vadd.f32 %v1861_v21, %v1706_v4  ;;  %v3999_v4 = vrot.slane %v2296_v52, 9  ;;  %v3118_v52 = vld [vmem:[#allocation2 + $0x30] sm:$0xe]  ;;  %v5467_v55 = vrot.slane %v2844_v48, 5 }
 0x114   : > { %v1672_v3 = vpop.f32.mrf.mxu2  ;;  %v1448_v27 = vpop.f32.mrf.mxu1  ;;  %v2349_v29 = vsel %vm5093_vm15, %v3999_v4, %v2348_v40  ;;  %v3164_v40 = vrot.slane %v5416_v39, 5  ;;  %v5473_v39 = vld [vmem:[#allocation2 + $0x44] sm:$0x1] }
 0x115   : > { %v2239_v62 = vpop.f32.mrf.mxu0  ;;  %v1708_v32 = vadd.f32 %v1672_v3, %v1444_v60  ;;  %v5443_v1 = vadd.f32 %v1448_v27, %v5308_v8  ;;  %v2838_v60 = vshll.u32 %v2747_v30, 16  ;;  %v2352_v8 = vsel %vm5093_vm15, %v2350_v24, %v2351_v9 }
 0x116   : > { %3064 = vmatmul.bf16.gmra.mxu3 %v2988_v53  ;;  %v5450_v10 = vadd.f32 %v2239_v62, %v1900_v63  ;;  %v2404_v21 = vunpack.c.l.b16 %v2349_v29  ;;  %v2848_v53 = vshrl.u32 %v5445_v26, 16  ;;  %v2405_v17 = vunpack.c.l.b16 %v2352_v8  ;;  %v2750_v8 = vld [vmem:[#allocation2 + $0x48] sm:$0xf] }
 0x117   : > { %v2833_v63 = vsel %vm4841_vm12, %v2828_v31, %v2832_v47  ;;  %v2840_v51 = vrot.slane %v2838_v60, 5  ;;  %v2975_v24 = vunpack.c.l.b16 %v2823_v59  ;;  %v4182_v47 = vrot.slane %v3118_v52, 9 }
 0x118   : > { %v2417_v3 = vpack.c.b16 %v2405_v17, %v2404_v21  ;;  %v2850_v62 = vrot.slane %v2848_v53, 4  ;;  %v2976_v34 = vunpack.c.l.b16 %v2833_v63  ;;  %v3166_v9 = vrot.slane %v3164_v40, 4  ;;  %v5489_v17 = vld [vmem:[#allocation2 + $0x4c] sm:$0xf] }
 0x119   : > { %v1864_v44 = vpop.f32.mrf.mxu3  ;;  %2691 = vmatmul.bf16.gmra.mxu2 %v4306_v57  ;;  %v3167_v29 = vrot.slane %v5433_v35, 5  ;;  %v3165_v53 = vsel %vm5093_vm15, %v4182_v47, %v3164_v40  ;;  %v4307_v40 = vld [vmem:[#allocation2 + $0x3c] sm:$0xff] }
 0x11a   : > { %v1901_v54 = vadd.f32 %v1864_v44, %v1707_v45  ;;  %v2837_v45 = vrot.slane %v2835_v13, 4  ;;  %v2854_v13 = vshll.u32 %v5473_v39, 16  ;;  %v2989_v48 = vpack.c.b16 %v2976_v34, %v2975_v24 }
 0x11b   : > { %v3168_v35 = vsel %vm5093_vm15, %v3166_v9, %v3167_v29  ;;  %v2355_v44 = vrot.slane %v5225_v61, 5  ;;  %v2868_v24 = vshll.u32 %v5489_v17, 16  ;;  %v2872_v34 = vshrl.u32 %v5489_v17, 16 }
 0x11c   : > { %v1675_v27 = vpop.f32.mrf.mxu2  ;;  %v1451_v30 = vpop.f32.mrf.mxu1  ;;  %v2856_v63 = vrot.slane %v2854_v13, 5  ;;  %v3225_v47 = vunpack.c.l.b16 %v3165_v53  ;;  %v3119_v53 = vld [vmem:[#allocation2 + $0x3c] sm:$0xe] }
 0x11d   : > { %v2242_v38 = vpop.f32.mrf.mxu0  ;;  %v1709_v57 = vadd.f32 %v1675_v27, %v5427_v58  ;;  %v5471_v4 = vadd.f32 %v1451_v30, %v5328_v23  ;;  %v2841_v58 = vor.u32 %v2840_v51, %v2837_v45  ;;  %v2851_v23 = vor.u32 %v2850_v62, %v5467_v55  ;;  %v2297_v27 = vld [vmem:[#allocation2 + $0x3c] sm:$0xe] }
 0x11e   : > { %v5475_v31 = vadd.f32 %v2242_v38, %v1901_v54  ;;  %v4000_v51 = vrot.slane %v2297_v27, 9  ;;  %v2357_v61 = vrot.slane %v2355_v44, 4  ;;  %v2358_v62 = vrot.slane %v5240_v36, 5 }
 0x11f   : > { %2501 = vmatmul.bf16.gmra.mxu1 %v2417_v3  ;;  %v2852_v59 = vrot.slane %v2851_v23, 4  ;;  %v2862_v38 = vshll.u32 %v2750_v8, 16 }
 0x120   : > { %3314 = vmatmul.bf16.gmra.mxu0 %v3238_v46  ;;  %v2842_v46 = vrot.slane %v2841_v58, 4  ;;  %v2356_v9 = vsel %vm5093_vm15, %v4000_v51, %v2355_v44  ;;  %v2359_v58 = vsel %vm5093_vm15, %v2357_v61, %v2358_v62  ;;  %v2874_v44 = vrot.slane %v2872_v34, 4 }
 0x121   : > { %v1866_v60 = vpop.f32.mrf.mxu3  ;;  %v2406_v23 = vunpack.c.l.b16 %v2356_v9 }
 0x122   : > { %v1902_v21 = vadd.f32 %v1866_v60, %v1708_v32  ;;  %v2859_v32 = vshrl.u32 %v2750_v8, 16  ;;  %v2847_v13 = vsel %vm4841_vm12, %v2842_v46, %v5467_v55  ;;  %v2857_v60 = vsel %vm4841_vm12, %v2852_v59, %v2856_v63 }
 0x123   : > { %v2407_v8 = vunpack.c.l.b16 %v2359_v58  ;;  %v4183_v63 = vrot.slane %v3119_v53, 9  ;;  %v2298_v53 = vld [vmem:[#allocation2 + $0x48] sm:$0xe] }
 0x124   : > { %v1677_v54 = vpop.f32.mrf.mxu2  ;;  %v1453_v3 = vpop.f32.mrf.mxu1 }
 0x125   : > { %v2244_v52 = vpop.f32.mrf.mxu0  ;;  %v1710_v30 = vadd.f32 %v1677_v54, %v5443_v1  ;;  %v5496_v45 = vadd.f32 %v1453_v3, %v5352_v50  ;;  %v3226_v1 = vunpack.c.l.b16 %v3168_v35  ;;  %v3171_v50 = vrot.slane %v5445_v26, 5  ;;  %v5515_v3 = vld [vmem:[#allocation2 + $0x50] sm:$0x1] }
 0x126   : > { %3069 = vmatmul.bf16.gmra.mxu3 %v2989_v48  ;;  %v5503_v29 = vadd.f32 %v2244_v52, %v1902_v21  ;;  %v2861_v21 = vrot.slane %v2859_v32, 4  ;;  %v2864_v26 = vrot.slane %v2862_v38, 5  ;;  %v5513_v35 = vrot.slane %v2868_v24, 5 }
 0x127   : > { %v2418_v54 = vpack.c.b16 %v2407_v8, %v2406_v23  ;;  %v3239_v27 = vpack.c.b16 %v3226_v1, %v3225_v47  ;;  %v2977_v52 = vunpack.c.l.b16 %v2847_v13  ;;  %v3173_v32 = vrot.slane %v3171_v50, 4  ;;  %v2753_v1 = vld [vmem:[#allocation2 + $0x54] sm:$0xf] }
 0x128   : > { %v2865_v61 = vor.u32 %v2864_v26, %v2861_v21  ;;  %v2875_v62 = vor.u32 %v2874_v44, %v5513_v35  ;;  %v2878_v38 = vshll.u32 %v5515_v3, 16  ;;  %v3172_v9 = vsel %vm5093_vm15, %v4183_v63, %v3171_v50  ;;  %v4373_v44 = vld [vmem:[%s444_s9] sm:$0xff]  }
 0x129   : > { %v1869_v36 = vpop.f32.mrf.mxu3  ;;  %2696 = vmatmul.bf16.gmra.mxu2 %v4307_v40  ;;  %v2978_v40 = vunpack.c.l.b16 %v2857_v60  ;;  %v2362_v13 = vrot.slane %v5269_v5, 5  ;;  %v5532_v60 = vld [vmem:[#allocation2 + $0x58] sm:$0xf]  ;;  %v3227_v8 = vunpack.c.l.b16 %v3172_v9  ;;  %v2883_v26 = vshrl.u32 %v2753_v1, 16 }
 0x12a   : > { %v1903_v48 = vadd.f32 %v1869_v36, %v1709_v57  ;;  %v3174_v57 = vrot.slane %v5473_v39, 5  ;;  %v2866_v58 = vrot.slane %v2865_v61, 4  ;;  %v2876_v23 = vrot.slane %v2875_v62, 4 }
 0x12b   : > { %v2990_v47 = vpack.c.b16 %v2978_v40, %v2977_v52  ;;  %v2880_v36 = vrot.slane %v2878_v38, 5  ;;  %v4001_v52 = vrot.slane %v2298_v53, 9  ;;  %v2364_v40 = vrot.slane %v2362_v13, 4 }
 0x12c   : > { %v1680_v51 = vpop.f32.mrf.mxu2  ;;  %v1456_v55 = vpop.f32.mrf.mxu1  ;;  %v2871_v5 = vsel %vm4841_vm12, %v2866_v58, %v5513_v35  ;;  %v2365_v63 = vrot.slane %v5287_v43, 5  ;;  %v4374_v61 = vunpack.c.l.bf16 %v4373_v44  ;;  %v4375_v62 = vunpack.c.h.bf16 %v4373_v44 }
 0x12d   : > { %v2247_v46 = vpop.f32.mrf.mxu0  ;;  %v1711_v59 = vadd.f32 %v1680_v51, %v5471_v4  ;;  %v3175_v4 = vsel %vm5093_vm15, %v3173_v32, %v3174_v57  ;;  %v2886_v51 = vshll.u32 %v2753_v1, 16  ;;  %v2892_v32 = vshll.u32 %v5532_v60, 16 }
 0x12e   : > { %v5522_v24 = vadd.f32 %v2247_v46, %v1903_v48  ;;  %v3228_v21 = vunpack.c.l.b16 %v3175_v4  ;;  %v2881_v46 = vsel %vm4841_vm12, %v2876_v23, %v2880_v36  ;;  %v2896_v57 = vshrl.u32 %v5532_v60, 16  ;;  %v3120_v4 = vld [vmem:[#allocation2 + $0x48] sm:$0xe] }
 0x12f   : > { %2506 = vmatmul.bf16.gmra.mxu1 %v2418_v54  ;;  %v2366_v35 = vsel %vm5093_vm15, %v2364_v40, %v2365_v63  ;;  %v5553_v43 = vunpack.c.l.b16 %v2871_v5  ;;  %v2885_v58 = vrot.slane %v2883_v26, 4  ;;  %v2888_v23 = vrot.slane %v2886_v51, 5 }
 0x130   : > { %3319 = vmatmul.bf16.gmra.mxu0 %v3239_v27  ;;  %v3240_v38 = vpack.c.b16 %v3228_v21, %v3227_v8  ;;  %v2409_v1 = vunpack.c.l.b16 %v2366_v35  ;;  %v589_v8 = vmul.f32 %v5248_v42, %v4374_v61  ;;  %v5561_v21 = vrot.slane %v2892_v32, 5 }
 0x131   : > { %v1871_v34 = vpop.f32.mrf.mxu3  ;;  %v2898_v53 = vrot.slane %v2896_v57, 4  ;;  %v590_v44 = vmul.f32 %v5248_v42, %v4375_v62  ;;  %v3181_v63 = vrot.slane %v5515_v3, 5  ;;  %v2889_v32 = vor.u32 %v2888_v23, %v2885_v58  ;;  %v4502_v42 = vld [vmem:[%s5750_s1] ss:$0 sm:$0xff] }
 0x132   : > { %v1904_v39 = vadd.f32 %v1871_v34, %v1710_v30  ;;  %v4308_v30 = vld [vmem:[#allocation2 + $0x48] sm:$0xff]  ;;  %v3178_v34 = vrot.slane %v5489_v17, 5  ;;  %v605_v61 = vstv %s5559_s11 }
 0x133   : > { %vm5585_vm0 = vcmp.eq.s32.totalorder %v605_v61, 1 }
 0x134   : > { %v1682_v48 = vpop.f32.mrf.mxu2  ;;  %v5534_v50 = vpop.f32.mrf.mxu1  ;;  %v3180_v26 = vrot.slane %v3178_v34, 4 }
 0x135   : > { %v2249_v54 = vpop.f32.mrf.mxu0  ;;  %v5537_v27 = vadd.f32 %v1682_v48, %v5496_v45  ;;  %v2363_v45 = vsel %vm5093_vm15, %v4001_v52, %v2362_v13  ;;  %v1457_v13 = vadd.f32 %v1456_v55, %v5322_v25  ;;  %v2980_v48 = vunpack.c.l.b16 %v2881_v46  ;;  %v639_v55 = vld [vmem:[#allocation2 + $0x6c] sm:$0x1] }
 0x136   : > { %3074 = vmatmul.bf16.gmra.mxu3 %v2990_v47  ;;  %v2408_v47 = vunpack.c.l.b16 %v2363_v45  ;;  %v4184_v52 = vrot.slane %v3120_v4, 9  ;;  %v591_v25 = vadd.f32 %v5259_v14, %v589_v8  ;;  %v5569_v51 = vadd.f32 %v2249_v54, %v1904_v39  ;;  %v671_v4 = vld [vmem:[#allocation2 + $0x74] sm:$0x1] }
 0x137   : > { %v592_v45 = vadd.f32 %v4502_v42, %v590_v44  ;;  %v640_v62 = vsel %vm4630_vm2, 0, %v639_v55  ;;  %v2899_v39 = vor.u32 %v2898_v53, %v5561_v21  ;;  %v2991_v3 = vpack.c.b16 %v2980_v48, %v5553_v43  ;;  %v4309_v55 = vld [vmem:[#allocation2 + $0x54] sm:$0xff] }
 0x138   : > { %v2419_v17 = vpack.c.b16 %v2409_v1, %v2408_v47  ;;  %v593_v57 = vmax.f32 %v591_v25, 0.0  ;;  %641 = vst [vmem:[#allocation2 + $0x6c] sm:$0x1] %v640_v62  ;;  %v3179_v58 = vsel %vm5093_vm15, %v4184_v52, %v3178_v34  ;;  %v3182_v23 = vsel %vm5093_vm15, %v3180_v26, %v3181_v63  ;;  %v2756_v26 = vld [vmem:[#allocation2 + $0x60] sm:$0xf] }
 0x139   : > { %v1874_v9 = vpop.f32.mrf.mxu3  ;;  %2701 = vmatmul.bf16.gmra.mxu2 %v4308_v30  ;;  %v594_v35 = vmax.f32 %v592_v45, 0.0  ;;  %v2369_v53 = vrot.slane %v5306_v41, 5  ;;  %v3230_v52 = vunpack.c.l.b16 %v3182_v23  ;;  %v2372_v42 = vrot.slane %v5324_v37, 5  ;;  %v5611_v45 = vld [vmem:[#allocation2 + $0x64] sm:$0xf] }
 0x13a   : > { %v1905_v36 = vadd.f32 %v1874_v9, %v1711_v59  ;;  %v5566_v59 = vld [vmem:[#allocation2 + $0x5c] sm:$0x1]  ;;  %v595_v47 = vpack.c.bf16 %v593_v57, %v593_v57 }
 0x13b   : > { %v2902_v54 = vshll.u32 %v5566_v59, 16  ;;  %v596_v48 = vpack.c.bf16 %v594_v35, %v594_v35  ;;  %v2371_v63 = vrot.slane %v2369_v53, 4 }
 0x13c   : > { %v1685_v30 = vpop.f32.mrf.mxu2  ;;  %v5564_v40 = vpop.f32.mrf.mxu1  ;;  %v607_v8 = vsel %vm5585_vm0, 0, %v595_v47  ;;  %v2910_v47 = vshll.u32 %v2756_v26, 16 }
 0x13d   : > { %v2252_v5 = vpop.f32.mrf.mxu0  ;;  %v5571_v46 = vadd.f32 %v1685_v30, %v1457_v13  ;;  %v2890_v13 = vrot.slane %v2889_v32, 4  ;;  %v2904_v34 = vrot.slane %v2902_v54, 5  ;;  %v706_v44 = vshrl.u32 %v607_v8, 16 }
 0x13e   : > { %v5580_v14 = vadd.f32 %v2252_v5, %v1905_v36  ;;  %v1459_v36 = vadd.f32 %v5534_v50, %v5342_v11  ;;  %v3229_v30 = vunpack.c.l.b16 %v3179_v58  ;;  %v4002_v5 = vrot.slane %v2299_v7, 9 }
 0x13f   : > { %2511 = vmatmul.bf16.gmra.mxu1 %v2419_v17  ;;  %v2900_v17 = vrot.slane %v2899_v39, 4  ;;  %v608_v32 = vsel %vm5585_vm0, 0, %v596_v48  ;;  %v2895_v41 = vsel %vm4841_vm12, %v2890_v13, %v5561_v21  ;;  %v709_v57 = vshll.u32 %v607_v8, 16  ;;  %v726_v48 = vld [vmem:[#allocation2 + $0x6c] sm:$0xf] }
 0x140   : > { %3324 = vmatmul.bf16.gmra.mxu0 %v3240_v38  ;;  %v672_v38 = vsel %vm4650_vm4, 0, %v671_v4  ;;  %v2370_v62 = vsel %vm5093_vm15, %v4002_v5, %v2369_v53  ;;  %v2907_v39 = vshrl.u32 %v2756_v26, 16  ;;  %v708_v54 = vrot.slane %v706_v44, 7 }
 0x141   : > { %v1876_v1 = vpop.f32.mrf.mxu3  ;;  %673 = vst [vmem:[#allocation2 + $0x74] sm:$0x1] %v672_v38  ;;  %v2905_v61 = vsel %vm4841_vm12, %v2900_v17, %v2904_v34  ;;  %v2410_v35 = vunpack.c.l.b16 %v2370_v62  ;;  %v714_v9 = vshrl.u32 %v608_v32, 16  ;;  %v3241_v4 = vpack.c.b16 %v3230_v52, %v3229_v30  ;;  %v3121_v30 = vld [vmem:[#allocation2 + $0x54] sm:$0xe] }
 0x142   : > { %v5598_v43 = vadd.f32 %v1876_v1, %v5537_v27  ;;  %v2916_v1 = vshll.u32 %v5611_v45, 16  ;;  %v2920_v58 = vshrl.u32 %v5611_v45, 16  ;;  %v3185_v38 = vrot.slane %v5532_v60, 5 }
 0x143   : > { %v711_v13 = vor.u32 %v709_v57, %v708_v54  ;;  %v1462_v8 = vadd.f32 %v5564_v40, %v5370_v20  ;;  %v2982_v17 = vunpack.c.l.b16 %v2905_v61  ;;  %v2909_v53 = vrot.slane %v2907_v39, 4 }
 0x144   : > { %v1687_v11 = vpop.f32.mrf.mxu2  ;;  %v5603_v50 = vpop.f32.mrf.mxu1  ;;  %v712_v7 = vrot.slane %v708_v54, 4  ;;  %v716_v26 = vrot.slane %v714_v9, 7  ;;  %v2922_v60 = vrot.slane %v2920_v58, 4  ;;  %v4185_v62 = vrot.slane %v3121_v30, 9 }
 0x145   : > { %v2254_v27 = vpop.f32.mrf.mxu0  ;;  %v1714_v25 = vadd.f32 %v1687_v11, %v1459_v36  ;;  %v2981_v36 = vunpack.c.l.b16 %v2895_v41  ;;  %v2912_v11 = vrot.slane %v2910_v47, 5  ;;  %v727_v41 = vsel %vm4739_vm8, %v711_v13, %v726_v48 }
 0x146   : > { %3079 = vmatmul.bf16.gmra.mxu3 %v2991_v3  ;;  %v2373_v3 = vsel %vm5093_vm15, %v2371_v63, %v2372_v42  ;;  %v5625_v63 = vrot.slane %v2916_v1, 5  ;;  %v721_v40 = vrot.slane %v716_v26, 4  ;;  %728 = vst [vmem:[#allocation2 + $0x6c] sm:$0xf] %v727_v41  ;;  %v5630_v57 = vadd.f32 %v2254_v27, %v5598_v43 }
 0x147   : > { %v2411_v37 = vunpack.c.l.b16 %v2373_v3  ;;  %v3187_v39 = vrot.slane %v3185_v38, 4  ;;  %v3188_v54 = vrot.slane %v5566_v59, 5  ;;  %v2913_v47 = vor.u32 %v2912_v11, %v2909_v53 }
 0x148   : > { %v730_v42 = vld [vmem:[#allocation2 + $0x74] sm:$0x1]  ;;  %v2992_v27 = vpack.c.b16 %v2982_v17, %v2981_v36  ;;  %v2923_v9 = vor.u32 %v2922_v60, %v5625_v63  ;;  %v2376_v59 = vrot.slane %v5337_v18, 5  ;;  %v3186_v6 = vsel %vm5093_vm15, %v4185_v62, %v3185_v38  ;;  %v4310_v36 = vld [vmem:[#allocation2 + $0x60] sm:$0xff] }
 0x149   : > { %v1879_v21 = vpop.f32.mrf.mxu3  ;;  %2706 = vmatmul.bf16.gmra.mxu2 %v4309_v55  ;;  %v2420_v34 = vpack.c.b16 %v2411_v37, %v2410_v35  ;;  %v717_v55 = vshll.u32 %v608_v32, 16  ;;  %v5634_v32 = vld [vmem:[#allocation2 + $0x68] sm:$0x1]  ;;  %v731_v3 = vsel %vm4630_vm2, %v721_v40, %v730_v42  ;;  %v3189_v2 = vsel %vm5093_vm15, %v3187_v39, %v3188_v54 }
 0x14a   : > { %v1907_v23 = vadd.f32 %v1879_v21, %v5571_v46  ;;  %v2926_v21 = vshll.u32 %v5634_v32, 16  ;;  %732 = vst [vmem:[#allocation2 + $0x74] sm:$0x1] %v731_v3  ;;  %v2914_v13 = vrot.slane %v2913_v47, 4  ;;  %v2924_v17 = vrot.slane %v2923_v9, 4 }
 0x14b   : > { %v719_v20 = vor.u32 %v717_v55, %v716_v26  ;;  %v2379_v18 = vrot.slane %v5365_v16, 5  ;;  %v3231_v53 = vunpack.c.l.b16 %v3186_v6 }
 0x14c   : > { %v1690_v44 = vpop.f32.mrf.mxu2  ;;  %v1466_v52 = vpop.f32.mrf.mxu1  ;;  %v2919_v16 = vsel %vm4841_vm12, %v2914_v13, %v5625_v63  ;;  %v3192_v63 = vrot.slane %v5611_v45, 5 }
 0x14d   : > { %v2257_v5 = vpop.f32.mrf.mxu0  ;;  %v1715_v46 = vadd.f32 %v1690_v44, %v1462_v8  ;;  %v720_v15 = vsel %vm4733_vm7, %v712_v7, %v719_v20  ;;  %v2378_v8 = vrot.slane %v2376_v59, 4  ;;  %v3232_v44 = vunpack.c.l.b16 %v3189_v2 }
 0x14e   : > { %v5632_v61 = vadd.f32 %v2257_v5, %v1907_v23  ;;  %729 = vst [vmem:[#allocation2 + $0x70] sm:$0xf] %v720_v15  ;;  %v1467_v60 = vadd.f32 %v1466_v52, %v5354_v12  ;;  %v3122_v12 = vld [vmem:[#allocation2 + $0x60] sm:$0xe] }
 0x14f   : > { %2516 = vmatmul.bf16.gmra.mxu1 %v2420_v34  ;;  %v2759_v34 = vld [vmem:[#allocation2 + $0x6c] sm:$0xf]  ;;  %v2380_v30 = vsel %vm5093_vm15, %v2378_v8, %v2379_v18  ;;  %v3242_v54 = vpack.c.b16 %v3232_v44, %v3231_v53  ;;  %v4186_v2 = vrot.slane %v3122_v12, 9 }
 0x150   : > { %3329 = vmatmul.bf16.gmra.mxu0 %v3241_v4  ;;  %v1464_v4 = vadd.f32 %v5603_v50, %v5382_v22  ;;  %v2928_v22 = vrot.slane %v2926_v21, 5  ;;  %v2413_v55 = vunpack.c.l.b16 %v2380_v30  ;;  %v2931_v42 = vshrl.u32 %v2759_v34, 16 }
 0x151   : > { %v1881_v35 = vpop.f32.mrf.mxu3  ;;  %v2934_v40 = vshll.u32 %v2759_v34, 16 }
 0x152   : > { %v1908_v43 = vadd.f32 %v1881_v35, %v1714_v25  ;;  %v2300_v25 = vld [vmem:[#allocation2 + $0x60] sm:$0xe]  ;;  %v2929_v41 = vsel %vm4841_vm12, %v2924_v17, %v2928_v22 }
 0x153   : > { %v4003_v48 = vrot.slane %v2300_v25, 9  ;;  %v2936_v9 = vrot.slane %v2934_v40, 5  ;;  %v3195_v25 = vrot.slane %v5634_v32, 5 }
 0x154   : > { %v1692_v37 = vpop.f32.mrf.mxu2  ;;  %v1468_v1 = vpop.f32.mrf.mxu1 }
 0x155   : > { %v2259_v58 = vpop.f32.mrf.mxu0  ;;  %v1716_v23 = vadd.f32 %v1692_v37, %v1464_v4  ;;  %v2377_v38 = vsel %vm5093_vm15, %v4003_v48, %v2376_v59  ;;  %v5657_v7 = vld [vmem:[#allocation2 + $0x70] sm:$0xf]  ;;  %v2761_v59 = vld [vmem:[#allocation2 + $0x74] sm:$0x1]  ;;  %v3194_v37 = vrot.slane %v3192_v63, 4  ;;  %v1469_v45 = vadd.f32 %v1468_v1, %v5372_v19 }
 0x156   : > { %3084 = vmatmul.bf16.gmra.mxu3 %v2992_v27  ;;  %v5651_v50 = vadd.f32 %v2259_v58, %v1908_v43  ;;  %v2412_v11 = vunpack.c.l.b16 %v2377_v38  ;;  %v2940_v62 = vshll.u32 %v5657_v7, 16  ;;  %v2944_v39 = vshrl.u32 %v5657_v7, 16  ;;  %v4311_v44 = vld [vmem:[#allocation2 + $0x6c] sm:$0xff] }
 0x157   : > { %v2984_v43 = vunpack.c.l.b16 %v2929_v41  ;;  %v2933_v27 = vrot.slane %v2931_v42, 4  ;;  %v2950_v8 = vshll.u32 %v2761_v59, 16  ;;  %v3193_v38 = vsel %vm5093_vm15, %v4186_v2, %v3192_v63 }
 0x158   : > { %v2421_v20 = vpack.c.b16 %v2413_v55, %v2412_v11  ;;  %v2942_v21 = vrot.slane %v2940_v62, 5  ;;  %v2946_v4 = vrot.slane %v2944_v39, 4  ;;  %v3196_v34 = vsel %vm5093_vm15, %v3194_v37, %v3195_v25 }
 0x159   : > { %v1884_v26 = vpop.f32.mrf.mxu3  ;;  %2711 = vmatmul.bf16.gmra.mxu2 %v4310_v36  ;;  %v2937_v13 = vor.u32 %v2936_v9, %v2933_v27  ;;  %v2952_v19 = vrot.slane %v2950_v8, 5  ;;  %v3233_v1 = vunpack.c.l.b16 %v3193_v38  ;;  %v3234_v11 = vunpack.c.l.b16 %v3196_v34 }
 0x15a   : > { %v1909_v5 = vadd.f32 %v1884_v26, %v1715_v46  ;;  %v2983_v46 = vunpack.c.l.b16 %v2919_v16  ;;  %v2947_v48 = vor.u32 %v2946_v4, %v2942_v21  ;;  %v3199_v39 = vrot.slane %v5657_v7, 5 }
 0x15b   : > { %v3243_v41 = vpack.c.b16 %v3234_v11, %v3233_v1 }
 0x15c   : > { %v1695_v15 = vpop.f32.mrf.mxu2  ;;  %v1471_v3 = vpop.f32.mrf.mxu1  ;;  %v2993_v36 = vpack.c.b16 %v2984_v43, %v2983_v46  ;;  %v2948_v30 = vrot.slane %v2947_v48, 4  ;;  %v3202_v46 = vrot.slane %v2761_v59, 5 }
 0x15d   : > { %v2262_v35 = vpop.f32.mrf.mxu0  ;;  %v1717_v47 = vadd.f32 %v1695_v15, %v1467_v60  ;;  %v1472_v55 = vadd.f32 %v1471_v3, %v5393_v56 }
 0x15e   : > { %v5668_v52 = vadd.f32 %v2262_v35, %v1909_v5  ;;  %v2953_v60 = vsel %vm4841_vm12, %v2948_v30, %v2952_v19  ;;  %v3123_v35 = vld [vmem:[#allocation2 + $0x6c] sm:$0xe] }
 0x15f   : > { %2521 = vmatmul.bf16.gmra.mxu1 %v2421_v20  ;;  %v2986_v15 = vunpack.c.l.b16 %v2953_v60  ;;  %v4187_v3 = vrot.slane %v3123_v35, 9 }
 0x160   : > { %3334 = vmatmul.bf16.gmra.mxu0 %v3242_v54 }
 0x161   : > { %v1886_v6 = vpop.f32.mrf.mxu3  ;;  %v3200_v7 = vsel %vm5093_vm15, %v4187_v3, %v3199_v39 }
 0x162   : > { %v1910_v58 = vadd.f32 %v1886_v6, %v1716_v23  ;;  %v2938_v23 = vrot.slane %v2937_v13, 4  ;;  %v3235_v37 = vunpack.c.l.b16 %v3200_v7 }
 0x164   : > { %v1697_v17 = vpop.f32.mrf.mxu2  ;;  %v1473_v22 = vpop.f32.mrf.mxu1  ;;  %v2943_v5 = vsel %vm4841_vm12, %v2938_v23, %v2942_v21 }
 0x165   : > { %v2264_v18 = vpop.f32.mrf.mxu0  ;;  %v1718_v53 = vadd.f32 %v1697_v17, %v1469_v45  ;;  %v2985_v54 = vunpack.c.l.b16 %v2943_v5  ;;  %v1474_v12 = vadd.f32 %v1473_v22, %v5404_v0 }
 0x166   : > { %3089 = vmatmul.bf16.gmra.mxu3 %v2993_v36  ;;  %v5676_v32 = vadd.f32 %v2264_v18, %v1910_v58 }
 0x167   : > { %v2994_v49 = vpack.c.b16 %v2986_v15, %v2985_v54 }
 0x169   : > { %v1889_v26 = vpop.f32.mrf.mxu3  ;;  %2716 = vmatmul.bf16.gmra.mxu2 %v4311_v44 }
 0x16a   : > { %v1911_v16 = vadd.f32 %v1889_v26, %v1717_v47  ;;  %v3201_v47 = vrot.slane %v3199_v39, 4 }
 0x16c   : > { %v1700_v42 = vpop.f32.mrf.mxu2  ;;  %v2487_v20 = vpop.f32.mrf.mxu1  ;;  %v3203_v4 = vsel %vm5093_vm15, %v3201_v47, %v3202_v46 }
 0x16d   : > { %v2267_v40 = vpop.f32.mrf.mxu0  ;;  %v1719_v62 = vadd.f32 %v1700_v42, %v1472_v55  ;;  %v3236_v25 = vunpack.c.l.b16 %v3203_v4  ;;  %v2527_v38 = vadd.f32 %v2487_v20, %v5431_v33 }
 0x16e   : > { %v5684_v63 = vadd.f32 %v2267_v40, %v1911_v16 }
 0x16f   : > { %v3244_v36 = vpack.c.b16 %v3236_v25, %v3235_v37 }
 0x170   : > { %3339 = vmatmul.bf16.gmra.mxu0 %v3243_v41 }
 0x171   : > { %v1891_v56 = vpop.f32.mrf.mxu3 }
 0x172   : > { %v1912_v43 = vadd.f32 %v1891_v56, %v1718_v53 }
 0x174   : > { %v1702_v27 = vpop.f32.mrf.mxu2  ;;  %v2489_v9 = vpop.f32.mrf.mxu1 }
 0x175   : > { %v2269_v21 = vpop.f32.mrf.mxu0  ;;  %v1720_v6 = vadd.f32 %v1702_v27, %v1474_v12  ;;  %v2528_v30 = vadd.f32 %v2489_v9, %v5450_v10 }
 0x176   : > { %3094 = vmatmul.bf16.gmra.mxu3 %v2994_v49  ;;  %v5691_v2 = vadd.f32 %v2269_v21, %v1912_v43 }
 0x179   : > { %v1894_v59 = vpop.f32.mrf.mxu3 }
 0x17a   : > { %v1913_v58 = vadd.f32 %v1894_v59, %v1719_v62 }
 0x17c   : > { %v2682_v45 = vpop.f32.mrf.mxu2  ;;  %v2492_v0 = vpop.f32.mrf.mxu1 }
 0x17d   : > { %v2272_v13 = vpop.f32.mrf.mxu0  ;;  %v2722_v53 = vadd.f32 %v2682_v45, %v2527_v38  ;;  %v2529_v41 = vadd.f32 %v2492_v0, %v5475_v31 }
 0x17e   : > { %v5693_v48 = vadd.f32 %v2272_v13, %v1913_v58 }
 0x180   : > { %3344 = vmatmul.bf16.gmra.mxu0 %v3244_v36 }
 0x181   : > { %v1896_v8 = vpop.f32.mrf.mxu3 }
 0x182   : > { %v1914_v17 = vadd.f32 %v1896_v8, %v1720_v6 }
 0x184   : > { %v2684_v22 = vpop.f32.mrf.mxu2  ;;  %v2494_v28 = vpop.f32.mrf.mxu1 }
 0x185   : > { %v2274_v18 = vpop.f32.mrf.mxu0  ;;  %v2723_v26 = vadd.f32 %v2684_v22, %v2528_v30  ;;  %v2530_v46 = vadd.f32 %v2494_v28, %v5503_v29 }
 0x186   : > { %v5696_v34 = vadd.f32 %v2274_v18, %v1914_v17 }
 0x189   : > { %v3060_v44 = vpop.f32.mrf.mxu3 }
 0x18a   : > { %v3100_v23 = vadd.f32 %v3060_v44, %v2722_v53 }
 0x18c   : > { %v2687_v19 = vpop.f32.mrf.mxu2  ;;  %v2497_v1 = vpop.f32.mrf.mxu1 }
 0x18d   : > { %v3310_v11 = vpop.f32.mrf.mxu0  ;;  %v2724_v62 = vadd.f32 %v2687_v19, %v2529_v41  ;;  %v2531_v58 = vadd.f32 %v2497_v1, %v5522_v24 }
 0x18e   : > { %v3350_v16 = vadd.f32 %v3310_v11, %v3100_v23 }
 0x190   : > { %v3366_v60 = vpack.c.bf16 %v3350_v16, %v3350_v16 }
 0x191   : > { %v3062_v55 = vpop.f32.mrf.mxu3 }
 0x192   : > { %v3101_v5 = vadd.f32 %v3062_v55, %v2723_v26  ;;  %v3398_v10 = vunpack.c.l.bf16 %v3366_v60 }
 0x194   : > { %v2689_v42 = vpop.f32.mrf.mxu2  ;;  %v2499_v20 = vpop.f32.mrf.mxu1  ;;  %v3436_v31 = vmul.f32 %v3398_v10, %v3398_v10 }
 0x195   : > { %v3312_v33 = vpop.f32.mrf.mxu0  ;;  %v2725_v9 = vadd.f32 %v2689_v42, %v2530_v46  ;;  %v2532_v23 = vadd.f32 %v2499_v20, %v5569_v51 }
 0x196   : > { %v3351_v40 = vadd.f32 %v3312_v33, %v3101_v5 }
 0x198   : > { %v3367_v39 = vpack.c.bf16 %v3351_v40, %v3351_v40  ;;  %v4379_v54 = vpack.c.bf16 %v3351_v40, %v3350_v16 }
 0x199   : > { %v3065_v15 = vpop.f32.mrf.mxu3 }
 0x19a   : > { %4380 = vst [vmem:[%s5705_s21] sm:$0xff] %v4379_v54   ;;  %v3399_v35 = vunpack.c.l.bf16 %v3367_v39  ;;  %v3102_v56 = vadd.f32 %v3065_v15, %v2724_v62 }
 0x19c   : > { %v3414_v3 = vadd.f32 %v3399_v35, %v3398_v10  ;;  %v3437_v47 = vmul.f32 %v3399_v35, %v3399_v35  ;;  %v2692_v43 = vpop.f32.mrf.mxu2  ;;  %v2502_v21 = vpop.f32.mrf.mxu1 }
 0x19d   : > { %v3315_v49 = vpop.f32.mrf.mxu0  ;;  %v2726_v29 = vadd.f32 %v2692_v43, %v2531_v58  ;;  %v2533_v33 = vadd.f32 %v2502_v21, %v5580_v14 }
 0x19e   : > { %v3452_v12 = vadd.f32 %v3437_v47, %v3436_v31  ;;  %v3352_v27 = vadd.f32 %v3315_v49, %v3102_v56 }
 0x1a0   : > { %v3368_v7 = vpack.c.bf16 %v3352_v27, %v3352_v27 }
 0x1a1   : > { %v3067_v4 = vpop.f32.mrf.mxu3 }
 0x1a2   : > { %v3400_v6 = vunpack.c.l.bf16 %v3368_v7  ;;  %v3103_v37 = vadd.f32 %v3067_v4, %v2725_v9 }
 0x1a4   : > { %v3415_v25 = vadd.f32 %v3414_v3, %v3400_v6  ;;  %v3438_v59 = vmul.f32 %v3400_v6, %v3400_v6  ;;  %v2694_v36 = vpop.f32.mrf.mxu2  ;;  %v2504_v28 = vpop.f32.mrf.mxu1 }
 0x1a5   : > { %v3317_v45 = vpop.f32.mrf.mxu0  ;;  %v2727_v1 = vadd.f32 %v2694_v36, %v2532_v23  ;;  %v2534_v47 = vadd.f32 %v2504_v28, %v5630_v57 }
 0x1a6   : > { %v3453_v0 = vadd.f32 %v3452_v12, %v3438_v59  ;;  %v3353_v13 = vadd.f32 %v3317_v45, %v3103_v37 }
 0x1a8   : > { %v3369_v8 = vpack.c.bf16 %v3353_v13, %v3353_v13  ;;  %v4384_v17 = vpack.c.bf16 %v3353_v13, %v3352_v27 }
 0x1a9   : > { %v3070_v22 = vpop.f32.mrf.mxu3 }
 0x1aa   : > { %4423 = vst [vmem:[%s5705_s21 + $0x8] sm:$0xff] %v4384_v17   ;;  %v3401_v18 = vunpack.c.l.bf16 %v3369_v8  ;;  %v3104_v38 = vadd.f32 %v3070_v22, %v2726_v29 }
 0x1ac   : > { %v3416_v53 = vadd.f32 %v3415_v25, %v3401_v18  ;;  %v3439_v44 = vmul.f32 %v3401_v18, %v3401_v18  ;;  %v2697_v30 = vpop.f32.mrf.mxu2  ;;  %v2507_v60 = vpop.f32.mrf.mxu1 }
 0x1ad   : > { %v3320_v19 = vpop.f32.mrf.mxu0  ;;  %v2728_v51 = vadd.f32 %v2697_v30, %v2533_v33  ;;  %v2535_v25 = vadd.f32 %v2507_v60, %v5632_v61 }
 0x1ae   : > { %v3454_v11 = vadd.f32 %v3453_v0, %v3439_v44  ;;  %v3354_v24 = vadd.f32 %v3320_v19, %v3104_v38 }
 0x1b0   : > { %v3370_v26 = vpack.c.bf16 %v3354_v24, %v3354_v24 }
 0x1b1   : > { %v3072_v16 = vpop.f32.mrf.mxu3 }
 0x1b2   : > { %v3402_v55 = vunpack.c.l.bf16 %v3370_v26  ;;  %v3105_v5 = vadd.f32 %v3072_v16, %v2727_v1 }
 0x1b4   : > { %v3417_v41 = vadd.f32 %v3416_v53, %v3402_v55  ;;  %v3440_v42 = vmul.f32 %v3402_v55, %v3402_v55  ;;  %v2699_v40 = vpop.f32.mrf.mxu2  ;;  %v2509_v49 = vpop.f32.mrf.mxu1 }
 0x1b5   : > { %v3322_v62 = vpop.f32.mrf.mxu0  ;;  %v2729_v27 = vadd.f32 %v2699_v40, %v2534_v47  ;;  %v2536_v38 = vadd.f32 %v2509_v49, %v5651_v50 }
 0x1b6   : > { %v3455_v10 = vadd.f32 %v3454_v11, %v3440_v42  ;;  %v3355_v39 = vadd.f32 %v3322_v62, %v3105_v5 }
 0x1b8   : > { %v3371_v20 = vpack.c.bf16 %v3355_v39, %v3355_v39  ;;  %v4389_v54 = vpack.c.bf16 %v3355_v39, %v3354_v24 }
 0x1b9   : > { %v3075_v15 = vpop.f32.mrf.mxu3 }
 0x1ba   : > { %4424 = vst [vmem:[%s5705_s21 + $0x10] sm:$0xff] %v4389_v54   ;;  %v3403_v35 = vunpack.c.l.bf16 %v3371_v20  ;;  %v3106_v56 = vadd.f32 %v3075_v15, %v2728_v51 }
 0x1bc   : > { %v3418_v31 = vadd.f32 %v3417_v41, %v3403_v35  ;;  %v3441_v3 = vmul.f32 %v3403_v35, %v3403_v35  ;;  %v2702_v46 = vpop.f32.mrf.mxu2  ;;  %v2512_v0 = vpop.f32.mrf.mxu1 }
 0x1bd   : > { %v3325_v43 = vpop.f32.mrf.mxu0  ;;  %v2730_v57 = vadd.f32 %v2702_v46, %v2535_v25  ;;  %v2537_v5 = vadd.f32 %v2512_v0, %v5668_v52 }
 0x1be   : > { %v3456_v12 = vadd.f32 %v3455_v10, %v3441_v3  ;;  %v3356_v14 = vadd.f32 %v3325_v43, %v3106_v56 }
 0x1c0   : > { %v3372_v9 = vpack.c.bf16 %v3356_v14, %v3356_v14 }
 0x1c1   : > { %v3077_v21 = vpop.f32.mrf.mxu3 }
 0x1c2   : > { %v3404_v7 = vunpack.c.l.bf16 %v3372_v9  ;;  %v3107_v4 = vadd.f32 %v3077_v21, %v2729_v27 }
 0x1c4   : > { %v3419_v6 = vadd.f32 %v3418_v31, %v3404_v7  ;;  %v3442_v37 = vmul.f32 %v3404_v7, %v3404_v7  ;;  %v2704_v59 = vpop.f32.mrf.mxu2  ;;  %v2514_v24 = vpop.f32.mrf.mxu1 }
 0x1c5   : > { %v3327_v58 = vpop.f32.mrf.mxu0  ;;  %v2731_v30 = vadd.f32 %v2704_v59, %v2536_v38  ;;  %v2538_v35 = vadd.f32 %v2514_v24, %v5676_v32 }
 0x1c6   : > { %v3457_v36 = vadd.f32 %v3456_v12, %v3442_v37  ;;  %v3357_v45 = vadd.f32 %v3327_v58, %v3107_v4 }
 0x1c8   : > { %v3373_v13 = vpack.c.bf16 %v3357_v45, %v3357_v45  ;;  %v4394_v29 = vpack.c.bf16 %v3357_v45, %v3356_v14 }
 0x1c9   : > { %v3080_v8 = vpop.f32.mrf.mxu3 }
 0x1ca   : > { %4425 = vst [vmem:[%s5705_s21 + $0x18] sm:$0xff] %v4394_v29   ;;  %v3405_v17 = vunpack.c.l.bf16 %v3373_v13  ;;  %v3108_v22 = vadd.f32 %v3080_v8, %v2730_v57 }
 0x1cc   : > { %v3420_v28 = vadd.f32 %v3419_v6, %v3405_v17  ;;  %v3443_v18 = vmul.f32 %v3405_v17, %v3405_v17  ;;  %v2707_v53 = vpop.f32.mrf.mxu2  ;;  %v2517_v20 = vpop.f32.mrf.mxu1 }
 0x1cd   : > { %v3330_v44 = vpop.f32.mrf.mxu0  ;;  %v2732_v50 = vadd.f32 %v2707_v53, %v2537_v5  ;;  %v2539_v9 = vadd.f32 %v2517_v20, %v5684_v63 }
 0x1ce   : > { %v3458_v23 = vadd.f32 %v3457_v36, %v3443_v18  ;;  %v3358_v61 = vadd.f32 %v3330_v44, %v3108_v22 }
 0x1d0   : > { %v3374_v19 = vpack.c.bf16 %v3358_v61, %v3358_v61 }
 0x1d1   : > { %v3082_v11 = vpop.f32.mrf.mxu3 }
 0x1d2   : > { %v3406_v1 = vunpack.c.l.bf16 %v3374_v19  ;;  %v3109_v26 = vadd.f32 %v3082_v11, %v2731_v30 }
 0x1d4   : > { %v3421_v16 = vadd.f32 %v3420_v28, %v3406_v1  ;;  %v3444_v55 = vmul.f32 %v3406_v1, %v3406_v1  ;;  %v2709_v60 = vpop.f32.mrf.mxu2  ;;  %v2519_v7 = vpop.f32.mrf.mxu1 }
 0x1d5   : > { %v3332_v41 = vpop.f32.mrf.mxu0  ;;  %v2733_v47 = vadd.f32 %v2709_v60, %v2538_v35  ;;  %v2540_v13 = vadd.f32 %v2519_v7, %v5691_v2 }
 0x1d6   : > { %v3459_v42 = vadd.f32 %v3458_v23, %v3444_v55  ;;  %v3359_v33 = vadd.f32 %v3332_v41, %v3109_v26 }
 0x1d8   : > { %v3375_v40 = vpack.c.bf16 %v3359_v33, %v3359_v33  ;;  %v4399_v62 = vpack.c.bf16 %v3359_v33, %v3358_v61 }
 0x1d9   : > { %v3085_v10 = vpop.f32.mrf.mxu3 }
 0x1da   : > { %4426 = vst [vmem:[%s5705_s21 + $0x20] sm:$0xff] %v4399_v62   ;;  %v3407_v39 = vunpack.c.l.bf16 %v3375_v40  ;;  %v3110_v51 = vadd.f32 %v3085_v10, %v2732_v50 }
 0x1dc   : > { %v3422_v54 = vadd.f32 %v3421_v16, %v3407_v39  ;;  %v3445_v15 = vmul.f32 %v3407_v39, %v3407_v39  ;;  %v2712_v31 = vpop.f32.mrf.mxu2  ;;  %v2522_v22 = vpop.f32.mrf.mxu1 }
 0x1dd   : > { %v3335_v56 = vpop.f32.mrf.mxu0  ;;  %v2734_v37 = vadd.f32 %v2712_v31, %v2539_v9  ;;  %v2541_v30 = vadd.f32 %v2522_v22, %v5693_v48 }
 0x1de   : > { %v3460_v3 = vadd.f32 %v3459_v42, %v3445_v15  ;;  %v3360_v52 = vadd.f32 %v3335_v56, %v3110_v51 }
 0x1e0   : > { %v3376_v46 = vpack.c.bf16 %v3360_v52, %v3360_v52 }
 0x1e1   : > { %v3087_v43 = vpop.f32.mrf.mxu3 }
 0x1e2   : > { %v3408_v49 = vunpack.c.l.bf16 %v3376_v46  ;;  %v3111_v12 = vadd.f32 %v3087_v43, %v2733_v47 }
 0x1e4   : > { %v3423_v14 = vadd.f32 %v3422_v54, %v3408_v49  ;;  %v3446_v27 = vmul.f32 %v3408_v49, %v3408_v49  ;;  %v2714_v32 = vpop.f32.mrf.mxu2  ;;  %v2524_v55 = vpop.f32.mrf.mxu1 }
 0x1e5   : > { %v3337_v21 = vpop.f32.mrf.mxu0  ;;  %v2735_v63 = vadd.f32 %v2714_v32, %v2540_v13  ;;  %v2542_v50 = vadd.f32 %v2524_v55, %v5696_v34 }
 0x1e6   : > { %v3461_v4 = vadd.f32 %v3460_v3, %v3446_v27  ;;  %v3361_v6 = vadd.f32 %v3337_v21, %v3111_v12 }
 0x1e8   : > { %v3377_v25 = vpack.c.bf16 %v3361_v6, %v3361_v6  ;;  %v4404_v59 = vpack.c.bf16 %v3361_v6, %v3360_v52 }
 0x1e9   : > { %v3090_v58 = vpop.f32.mrf.mxu3 }
 0x1ea   : > { %4427 = vst [vmem:[%s5705_s21 + $0x28] sm:$0xff] %v4404_v59   ;;  %v3409_v36 = vunpack.c.l.bf16 %v3377_v25  ;;  %v3112_v45 = vadd.f32 %v3090_v58, %v2734_v37 }
 0x1ec   : > { %v3424_v57 = vadd.f32 %v3423_v14, %v3409_v36  ;;  %v3447_v0 = vmul.f32 %v3409_v36, %v3409_v36  ;;  %v2717_v38 = vpop.f32.mrf.mxu2 }
 0x1ed   : > { %v3340_v29 = vpop.f32.mrf.mxu0  ;;  %v2736_v1 = vadd.f32 %v2717_v38, %v2541_v30 }
 0x1ee   : > { %v3462_v8 = vadd.f32 %v3461_v4, %v3447_v0  ;;  %v3362_v17 = vadd.f32 %v3340_v29, %v3112_v45 }
 0x1f0   : > { %v3378_v28 = vpack.c.bf16 %v3362_v17, %v3362_v17 }
 0x1f1   : > { %v3092_v18 = vpop.f32.mrf.mxu3 }
 0x1f2   : > { %v3410_v53 = vunpack.c.l.bf16 %v3378_v28  ;;  %v3113_v44 = vadd.f32 %v3092_v18, %v2735_v63 }
 0x1f4   : > { %v3425_v23 = vadd.f32 %v3424_v57, %v3410_v53  ;;  %v3448_v61 = vmul.f32 %v3410_v53, %v3410_v53  ;;  %v2719_v41 = vpop.f32.mrf.mxu2 }
 0x1f5   : > { %v3342_v19 = vpop.f32.mrf.mxu0  ;;  %v2737_v10 = vadd.f32 %v2719_v41, %v2542_v50 }
 0x1f6   : > { %v3463_v11 = vadd.f32 %v3462_v8, %v3448_v61  ;;  %v3363_v24 = vadd.f32 %v3342_v19, %v3113_v44 }
 0x1f8   : > { %v3379_v2 = vpack.c.bf16 %v3363_v24, %v3363_v24  ;;  %v4409_v26 = vpack.c.bf16 %v3363_v24, %v3362_v17 }
 0x1f9   : > { %v3095_v16 = vpop.f32.mrf.mxu3 }
 0x1fa   : > { %4428 = vst [vmem:[%s5705_s21 + $0x30] sm:$0xff] %v4409_v26   ;;  %v3411_v5 = vunpack.c.l.bf16 %v3379_v2  ;;  %v3114_v60 = vadd.f32 %v3095_v16, %v2736_v1 }
 0x1fc   : > { %v3426_v42 = vadd.f32 %v3425_v23, %v3411_v5  ;;  %v3449_v33 = vmul.f32 %v3411_v5, %v3411_v5 }
 0x1fd   : > { %v3345_v40 = vpop.f32.mrf.mxu0 }
 0x1fe   : > { %v3464_v48 = vadd.f32 %v3463_v11, %v3449_v33  ;;  %v3364_v62 = vadd.f32 %v3345_v40, %v3114_v60 }
 0x200   : > { %v3380_v39 = vpack.c.bf16 %v3364_v62, %v3364_v62 }
 0x201   : > { %v3097_v51 = vpop.f32.mrf.mxu3 }
 0x202   : > { %v3412_v20 = vunpack.c.l.bf16 %v3380_v39  ;;  %v3115_v54 = vadd.f32 %v3097_v51, %v2737_v10 }
 0x204   : > { %v3427_v15 = vadd.f32 %v3426_v42, %v3412_v20  ;;  %v3450_v35 = vmul.f32 %v3412_v20, %v3412_v20 }
 0x205   : > { %v3347_v56 = vpop.f32.mrf.mxu0 }
 0x206   : > { %v3465_v31 = vadd.f32 %v3464_v48, %v3450_v35  ;;  %v3365_v3 = vadd.f32 %v3347_v56, %v3115_v54 }
 0x208   : > { %v3381_v52 = vpack.c.bf16 %v3365_v3, %v3365_v3  ;;  %v4414_v47 = vpack.c.bf16 %v3365_v3, %v3364_v62 }
 0x20a   : > { %4429 = vst [vmem:[%s5705_s21 + $0x38] sm:$0xff] %v4414_v47   ;;  %v3413_v34 = vunpack.c.l.bf16 %v3381_v52 }
 0x20c   : > { %v3428_v46 = vadd.f32 %v3427_v15, %v3413_v34  ;;  %v3451_v43 = vmul.f32 %v3413_v34, %v3413_v34 }
 0x20e   : > { %v3429_v49 = vrot.slane %v3428_v46, 4  ;;  %v3466_v12 = vadd.f32 %v3465_v31, %v3451_v43 }
 0x210   : > { %v3430_v14 = vadd.f32 %v3429_v49, %v3428_v46  ;;  %v3467_v27 = vrot.slane %v3466_v12, 4 }
 0x212   : > { %v3431_v9 = vrot.slane %v3430_v14, 2  ;;  %v3468_v21 = vadd.f32 %v3467_v27, %v3466_v12 }
 0x214   : > { %v3432_v7 = vadd.f32 %v3431_v9, %v3430_v14  ;;  %v3469_v4 = vrot.slane %v3468_v21, 2 }
 0x216   : > { %v3433_v6 = vrot.slane %v3432_v7, 1  ;;  %v3470_v37 = vadd.f32 %v3469_v4, %v3468_v21 }
 0x218   : > { %v3434_v32 = vadd.f32 %v3433_v6, %v3432_v7  ;;  %v3471_v25 = vrot.slane %v3470_v37, 1 }
 0x21a   : > { %3435 = vst [vmem:[%s467_s12] sm:$0x1] %v3434_v32  ;;  %v3472_v59 = vadd.f32 %v3471_v25, %v3470_v37 }
 0x21c   : > { %3473 = vst [vmem:[%s467_s12 + $0x1] sm:$0x1] %v3472_v59 }
 0x21d PF: > { %s18_s28 = sadd.s32 1, %s4541_s28   ;;  %s5774_s24 = smov %s4533_s26 }
 0x21e   : > { %p15_p13 = scmp.ge.s32.totalorder %s18_s28, 6   ;;  %s5775_s25 = smov %s4537_s27 }
 0x21f   : > { %s5776_s26 = smov %s5779_s29  ;;  %s5777_s27 = smov %s5783_s30 }
 0x220   :  { %17 = sbr.rel (!%p15_p13) target bundleno = 3 (0x3), region = 103 }

</bundles_post_ra>
